<compile_context>
chip_gen: v7x
topology: tpu7x:2x2x1
jax: 0.10.0
libtpu: 0.0.40
codegen_flags: <defaults>
</compile_context>

<pallas_src>
import math

import jax
import jax.numpy as jnp
from jax.experimental import pallas as pl

INPUT_SIZE = 32
HIDDEN_SIZES = (64, 64)
ACTION_SIZE = 8
BATCH = 256          # single full-batch tile (fills MXU rows, one grid step)
OUT_W = 16           # merged output: [action (A) | logp (1) | unwritten pad]

HALF_LOG_2PI = 0.5 * math.log(2.0 * math.pi)


def actor_kernel(x_ref, w1_ref, b1_ref, w2_ref, b2_ref, w3_ref, b3_ref,
                 eps_ref, out_ref):
    A = eps_ref.shape[-1]

    # ---- MLP trunk: Linear -> ReLU -> Linear -> ReLU -> Linear ----
    h = x_ref[...]
    h = jnp.maximum(
        jnp.dot(h, w1_ref[...], preferred_element_type=jnp.float32) + b1_ref[...], 0.0)
    h = jnp.maximum(
        jnp.dot(h, w2_ref[...], preferred_element_type=jnp.float32) + b2_ref[...], 0.0)
    # w3/b3 are pre-sliced to the live A columns in the wrapper (cols A..2A are dead
    # because the reference reads x_log_std from the same columns as x_mu).
    x_mu = jnp.dot(h, w3_ref[...], preferred_element_type=jnp.float32) + b3_ref[...]

    # ---- head: clamp / exp (batched branch of the PyTorch code) ----
    x_log_std = jnp.clip(x_mu, -20.0, 2.0)            # reference quirk: same cols as mu
    x_std = jnp.exp(x_log_std + 1e-6)

    # Single whole-batch NaN guard (clip & exp propagate NaN, so one flag suffices).
    has_nan = jnp.any(jnp.isnan(x_mu))
    x_mu = jnp.where(has_nan, jnp.nan_to_num(x_mu, nan=1e-3), x_mu)
    x_std_fb = jnp.nan_to_num(x_mu, nan=1.0) + 1e-6    # reference quirk: uses x_mu
    x_std = jnp.where(has_nan, x_std_fb, x_std)
    # log(std): log(exp(z)) == z on the fast path; true log only for the fallback.
    log_scale = jnp.where(has_nan, jnp.log(x_std_fb), x_log_std + 1e-6)

    # ---- reparameterized sample (training=True): u = mu + std * eps ----
    eps = eps_ref[...]
    u = x_mu + x_std * eps
    action = jnp.tanh(u)

    # ---- Normal(mu, std).log_prob(u); (u - mu)^2 / (2 std^2) == 0.5 * eps^2 ----
    log_prob = -0.5 * (eps * eps) - log_scale - HALF_LOG_2PI
    # tanh-squash correction
    log_prob = log_prob - jnp.log(1.0 - action * action + 1e-7)
    logp = jnp.sum(log_prob, axis=1, keepdims=True)    # (B, 1)

    # ---- lane-dense merged output: action in lanes [0, A), logp in lane A ----
    # Padding lanes [A+1, OUT_W) are never read by the wrapper -> left unwritten.
    out_ref[:, :A] = action.astype(jnp.float32)
    out_ref[:, A:A + 1] = logp


def actor_forward(x, params, eps):
    """x: (B, input_size) f32; eps: (B, action_size) f32 -> (action (B,A), log_prob (B,))."""
    w1, b1, w2, b2, w3, b3 = params
    B, in_features = x.shape
    A = eps.shape[-1]

    # Dead-column elimination for the last Linear (see kernel comment).
    w3 = w3[:, :A]
    b3 = b3[:, :A]

    zero = lambda i: (0, 0)   # grid=(1,): every array is a single full block

    out = pl.pallas_call(
        actor_kernel,
        out_shape=jax.ShapeDtypeStruct((B, OUT_W), jnp.float32),
        grid=(1,),
        in_specs=[
            pl.BlockSpec((B, in_features), zero),
            pl.BlockSpec(w1.shape, zero),
            pl.BlockSpec(b1.shape, zero),
            pl.BlockSpec(w2.shape, zero),
            pl.BlockSpec(b2.shape, zero),
            pl.BlockSpec(w3.shape, zero),
            pl.BlockSpec(b3.shape, zero),
            pl.BlockSpec((B, A), zero),
        ],
        out_specs=pl.BlockSpec((B, OUT_W), zero),
    )(x, w1, b1, w2, b2, w3, b3, eps)

    # matches .sum(dim=1, keepdim=True).squeeze(-1) -> shape (B,)
    return out[:, :A], out[:, A]


def actor_reference(x, params, eps):
    """Pure-JAX reference mirroring the PyTorch forward (original formulas)."""
    w1, b1, w2, b2, w3, b3 = params
    A = eps.shape[-1]
    hp = jax.lax.Precision.HIGHEST
    h = jnp.maximum(jnp.dot(x, w1, precision=hp) + b1, 0.0)
    h = jnp.maximum(jnp.dot(h, w2, precision=hp) + b2, 0.0)
    o = jnp.dot(h, w3, precision=hp) + b3
    x_mu = o[:, :A]
    x_log_std = jnp.clip(o[:, :A], -20.0, 2.0)
    x_std = jnp.exp(x_log_std + 1e-6)
    x_mu = jnp.where(jnp.any(jnp.isnan(x_mu)), jnp.nan_to_num(x_mu, nan=1e-3), x_mu)
    x_std = jnp.where(jnp.any(jnp.isnan(x_std)),
                      jnp.nan_to_num(x_mu, nan=1.0) + 1e-6, x_std)
    u = x_mu + x_std * eps
    action = jnp.tanh(u)
    log_prob = (-((u - x_mu) ** 2) / (2.0 * x_std * x_std)
                - jnp.log(x_std) - 0.5 * jnp.log(2.0 * jnp.pi))
    log_prob = log_prob - jnp.log(1.0 - action * action + 1e-7)
    return action, jnp.sum(log_prob, axis=1)


def init_params(key, input_size, hidden_sizes, action_size):
    """Deterministic synthetic init (stand-in for layer_init_filter)."""
    sizes = [input_size] + list(hidden_sizes) + [action_size * 2]
    params = []
    for i in range(len(sizes) - 1):
        key, kw, kb = jax.random.split(key, 3)
        fan_in, fan_out = sizes[i], sizes[i + 1]
        scale = 1.0 / jnp.sqrt(jnp.float32(fan_in))
        w = jax.random.uniform(kw, (fan_in, fan_out), jnp.float32, -scale, scale)
        b = jax.random.uniform(kb, (1, fan_out), jnp.float32, -scale, scale)
        params += [w, b]
    return tuple(params)


if __name__ == "__main__":
    key = jax.random.PRNGKey(0)
    k_params, k_x, k_eps = jax.random.split(key, 3)

    params = init_params(k_params, INPUT_SIZE, HIDDEN_SIZES, ACTION_SIZE)
    x = jax.random.normal(k_x, (BATCH, INPUT_SIZE), jnp.float32)
    # rsample() noise, generated deterministically outside the kernel
    eps = jax.random.normal(k_eps, (BATCH, ACTION_SIZE), jnp.float32)

    action, log_prob = actor_forward(x, params, eps)
    jax.block_until_ready((action, log_prob))

    assert action.shape == (BATCH, ACTION_SIZE) and action.dtype == jnp.float32
    assert log_prob.shape == (BATCH,)
    assert not bool(jnp.any(jnp.isnan(action)))
    assert not bool(jnp.any(jnp.isnan(log_prob)))

    # Pure-JAX reference check.  Loose tolerances absorb MXU-vs-XLA f32 matmul
    # pass-count differences; genuine bugs show up as O(1) discrepancies.
    ref_act, ref_lp = actor_reference(x, params, eps)
    assert float(jnp.max(jnp.abs(action - ref_act))) < 5e-2
    assert float(jnp.max(jnp.abs(log_prob - ref_lp))) < 5e-1

    print("KERNEL_OK")
</pallas_src>

<mosaic_0001>
module attributes {stable_mosaic.version = 11 : i64} {
  func.func @actor_kernel(%arg0: i32, %arg1: memref<256x32xf32, #tpu.memory_space<vmem>>, %arg2: memref<32x64xf32, #tpu.memory_space<vmem>>, %arg3: memref<1x64xf32, #tpu.memory_space<vmem>>, %arg4: memref<64x64xf32, #tpu.memory_space<vmem>>, %arg5: memref<1x64xf32, #tpu.memory_space<vmem>>, %arg6: memref<64x8xf32, #tpu.memory_space<vmem>>, %arg7: memref<1x8xf32, #tpu.memory_space<vmem>>, %arg8: memref<256x8xf32, #tpu.memory_space<vmem>>, %arg9: memref<256x16xf32, #tpu.memory_space<vmem>>) attributes {dimension_semantics = [#tpu.dimension_semantics<arbitrary>], iteration_bounds = array<i64: 1>, scalar_prefetch = 0 : i64, scratch_operands = 0 : i64, tpu.core_type = #tpu.core_type<tc>, window_params = [{pipeline_mode = #tpu.pipeline_mode<synchronous>, transform_indices = @transform_0, window_bounds = array<i64: 256, 32>}, {pipeline_mode = #tpu.pipeline_mode<synchronous>, transform_indices = @transform_1, window_bounds = array<i64: 32, 64>}, {pipeline_mode = #tpu.pipeline_mode<synchronous>, transform_indices = @transform_2, window_bounds = array<i64: 1, 64>}, {pipeline_mode = #tpu.pipeline_mode<synchronous>, transform_indices = @transform_3, window_bounds = array<i64: 64, 64>}, {pipeline_mode = #tpu.pipeline_mode<synchronous>, transform_indices = @transform_4, window_bounds = array<i64: 1, 64>}, {pipeline_mode = #tpu.pipeline_mode<synchronous>, transform_indices = @transform_5, window_bounds = array<i64: 64, 8>}, {pipeline_mode = #tpu.pipeline_mode<synchronous>, transform_indices = @transform_6, window_bounds = array<i64: 1, 8>}, {pipeline_mode = #tpu.pipeline_mode<synchronous>, transform_indices = @transform_7, window_bounds = array<i64: 256, 8>}, {pipeline_mode = #tpu.pipeline_mode<synchronous>, transform_indices = @transform_8, window_bounds = array<i64: 256, 16>}]} {
    %c0 = arith.constant 0 : index
    %c0_0 = arith.constant 0 : index
    %0 = vector.load %arg1[%c0, %c0_0] : memref<256x32xf32, #tpu.memory_space<vmem>>, vector<256x32xf32>
    %c0_1 = arith.constant 0 : index
    %c0_2 = arith.constant 0 : index
    %1 = vector.load %arg2[%c0_1, %c0_2] : memref<32x64xf32, #tpu.memory_space<vmem>>, vector<32x64xf32>
    %cst = arith.constant dense<0.000000e+00> : vector<256x64xf32>
    %2 = tpu.matmul %0, %1, %cst {dimension_numbers = #tpu.dot_dimension_numbers<[1], [0], [0], [1], [0, 0, 1, 1], [], []>} : vector<256x32xf32>, vector<32x64xf32>, vector<256x64xf32> -> vector<256x64xf32>
    %c0_3 = arith.constant 0 : index
    %c0_4 = arith.constant 0 : index
    %3 = vector.load %arg3[%c0_3, %c0_4] : memref<1x64xf32, #tpu.memory_space<vmem>>, vector<1x64xf32>
    %4 = vector.broadcast %3 : vector<1x64xf32> to vector<256x64xf32>
    %5 = arith.addf %2, %4 : vector<256x64xf32>
    %cst_5 = arith.constant 0.000000e+00 : f32
    %6 = vector.broadcast %cst_5 : f32 to vector<256x64xf32>
    %7 = arith.maximumf %5, %6 : vector<256x64xf32>
    %c0_6 = arith.constant 0 : index
    %c0_7 = arith.constant 0 : index
    %8 = vector.load %arg4[%c0_6, %c0_7] : memref<64x64xf32, #tpu.memory_space<vmem>>, vector<64x64xf32>
    %cst_8 = arith.constant dense<0.000000e+00> : vector<256x64xf32>
    %9 = tpu.matmul %7, %8, %cst_8 {dimension_numbers = #tpu.dot_dimension_numbers<[1], [0], [0], [1], [0, 0, 1, 1], [], []>} : vector<256x64xf32>, vector<64x64xf32>, vector<256x64xf32> -> vector<256x64xf32>
    %c0_9 = arith.constant 0 : index
    %c0_10 = arith.constant 0 : index
    %10 = vector.load %arg5[%c0_9, %c0_10] : memref<1x64xf32, #tpu.memory_space<vmem>>, vector<1x64xf32>
    %11 = vector.broadcast %10 : vector<1x64xf32> to vector<256x64xf32>
    %12 = arith.addf %9, %11 : vector<256x64xf32>
    %cst_11 = arith.constant 0.000000e+00 : f32
    %13 = vector.broadcast %cst_11 : f32 to vector<256x64xf32>
    %14 = arith.maximumf %12, %13 : vector<256x64xf32>
    %c0_12 = arith.constant 0 : index
    %c0_13 = arith.constant 0 : index
    %15 = vector.load %arg6[%c0_12, %c0_13] : memref<64x8xf32, #tpu.memory_space<vmem>>, vector<64x8xf32>
    %cst_14 = arith.constant dense<0.000000e+00> : vector<256x8xf32>
    %16 = tpu.matmul %14, %15, %cst_14 {dimension_numbers = #tpu.dot_dimension_numbers<[1], [0], [0], [1], [0, 0, 1, 1], [], []>} : vector<256x64xf32>, vector<64x8xf32>, vector<256x8xf32> -> vector<256x8xf32>
    %c0_15 = arith.constant 0 : index
    %c0_16 = arith.constant 0 : index
    %17 = vector.load %arg7[%c0_15, %c0_16] : memref<1x8xf32, #tpu.memory_space<vmem>>, vector<1x8xf32>
    %18 = vector.broadcast %17 : vector<1x8xf32> to vector<256x8xf32>
    %19 = arith.addf %16, %18 : vector<256x8xf32>
    %cst_17 = arith.constant -2.000000e+01 : f32
    %cst_18 = arith.constant 2.000000e+00 : f32
    %20 = vector.broadcast %cst_17 : f32 to vector<256x8xf32>
    %21 = arith.maximumf %20, %19 : vector<256x8xf32>
    %22 = vector.broadcast %cst_18 : f32 to vector<256x8xf32>
    %23 = arith.minimumf %22, %21 : vector<256x8xf32>
    %cst_19 = arith.constant 9.99999997E-7 : f32
    %24 = vector.broadcast %cst_19 : f32 to vector<256x8xf32>
    %25 = arith.addf %23, %24 : vector<256x8xf32>
    %26 = math.exp %25 : vector<256x8xf32>
    %27 = arith.cmpf one, %19, %19 : vector<256x8xf32>
    %cst_20 = arith.constant 1.000000e+00 : f32
    %cst_21 = arith.constant 0.000000e+00 : f32
    %28 = vector.broadcast %cst_20 : f32 to vector<256x8xf32>
    %29 = vector.broadcast %cst_21 : f32 to vector<256x8xf32>
    %30 = arith.select %27, %28, %29 : vector<256x8xi1>, vector<256x8xf32>
    %31 = vector.shape_cast %30 : vector<256x8xf32> to vector<1x256x8xf32>
    %cst_22 = arith.constant dense<0xFF800000> : vector<1xf32>
    %32 = vector.multi_reduction <maximumf>, %31, %cst_22 [1, 2] : vector<1x256x8xf32> to vector<1xf32>
    %33 = vector.shape_cast %32 : vector<1xf32> to vector<1x1x1xf32>
    %34 = vector.extract %33[0, 0, 0] : f32 from vector<1x1x1xf32>
    %cst_23 = arith.constant 0.000000e+00 : f32
    %35 = arith.cmpf ogt, %34, %cst_23 : f32
    %cst_24 = arith.constant 1.000000e-03 : f32
    %36 = arith.cmpf one, %19, %19 : vector<256x8xf32>
    %37 = vector.broadcast %cst_24 : f32 to vector<256x8xf32>
    %38 = arith.select %36, %37, %19 : vector<256x8xi1>, vector<256x8xf32>
    %cst_25 = arith.constant 0x7F800000 : f32
    %39 = vector.broadcast %cst_25 : f32 to vector<256x8xf32>
    %40 = arith.cmpf oeq, %38, %39 : vector<256x8xf32>
    %cst_26 = arith.constant 3.40282347E+38 : f32
    %41 = vector.broadcast %cst_26 : f32 to vector<256x8xf32>
    %42 = arith.select %40, %41, %38 : vector<256x8xi1>, vector<256x8xf32>
    %cst_27 = arith.constant 0xFF800000 : f32
    %43 = vector.broadcast %cst_27 : f32 to vector<256x8xf32>
    %44 = arith.cmpf oeq, %42, %43 : vector<256x8xf32>
    %cst_28 = arith.constant -3.40282347E+38 : f32
    %45 = vector.broadcast %cst_28 : f32 to vector<256x8xf32>
    %46 = arith.select %44, %45, %42 : vector<256x8xi1>, vector<256x8xf32>
    %47 = arith.select %35, %46, %19 : vector<256x8xf32>
    %cst_29 = arith.constant 1.000000e+00 : f32
    %48 = arith.cmpf one, %47, %47 : vector<256x8xf32>
    %49 = vector.broadcast %cst_29 : f32 to vector<256x8xf32>
    %50 = arith.select %48, %49, %47 : vector<256x8xi1>, vector<256x8xf32>
    %cst_30 = arith.constant 0x7F800000 : f32
    %51 = vector.broadcast %cst_30 : f32 to vector<256x8xf32>
    %52 = arith.cmpf oeq, %50, %51 : vector<256x8xf32>
    %cst_31 = arith.constant 3.40282347E+38 : f32
    %53 = vector.broadcast %cst_31 : f32 to vector<256x8xf32>
    %54 = arith.select %52, %53, %50 : vector<256x8xi1>, vector<256x8xf32>
    %cst_32 = arith.constant 0xFF800000 : f32
    %55 = vector.broadcast %cst_32 : f32 to vector<256x8xf32>
    %56 = arith.cmpf oeq, %54, %55 : vector<256x8xf32>
    %cst_33 = arith.constant -3.40282347E+38 : f32
    %57 = vector.broadcast %cst_33 : f32 to vector<256x8xf32>
    %58 = arith.select %56, %57, %54 : vector<256x8xi1>, vector<256x8xf32>
    %cst_34 = arith.constant 9.99999997E-7 : f32
    %59 = vector.broadcast %cst_34 : f32 to vector<256x8xf32>
    %60 = arith.addf %58, %59 : vector<256x8xf32>
    %61 = arith.select %35, %60, %26 : vector<256x8xf32>
    %62 = math.log %60 : vector<256x8xf32>
    %cst_35 = arith.constant 9.99999997E-7 : f32
    %63 = vector.broadcast %cst_35 : f32 to vector<256x8xf32>
    %64 = arith.addf %23, %63 : vector<256x8xf32>
    %65 = arith.select %35, %62, %64 : vector<256x8xf32>
    %c0_36 = arith.constant 0 : index
    %c0_37 = arith.constant 0 : index
    %66 = vector.load %arg8[%c0_36, %c0_37] : memref<256x8xf32, #tpu.memory_space<vmem>>, vector<256x8xf32>
    %67 = arith.mulf %61, %66 : vector<256x8xf32>
    %68 = arith.addf %47, %67 : vector<256x8xf32>
    %69 = math.tanh %68 : vector<256x8xf32>
    %70 = arith.mulf %66, %66 : vector<256x8xf32>
    %cst_38 = arith.constant -5.000000e-01 : f32
    %71 = vector.broadcast %cst_38 : f32 to vector<256x8xf32>
    %72 = arith.mulf %71, %70 : vector<256x8xf32>
    %73 = arith.subf %72, %65 : vector<256x8xf32>
    %cst_39 = arith.constant 0.918938517 : f32
    %74 = vector.broadcast %cst_39 : f32 to vector<256x8xf32>
    %75 = arith.subf %73, %74 : vector<256x8xf32>
    %76 = arith.mulf %69, %69 : vector<256x8xf32>
    %cst_40 = arith.constant 1.000000e+00 : f32
    %77 = vector.broadcast %cst_40 : f32 to vector<256x8xf32>
    %78 = arith.subf %77, %76 : vector<256x8xf32>
    %cst_41 = arith.constant 1.000000e-07 : f32
    %79 = vector.broadcast %cst_41 : f32 to vector<256x8xf32>
    %80 = arith.addf %78, %79 : vector<256x8xf32>
    %81 = math.log %80 : vector<256x8xf32>
    %82 = arith.subf %75, %81 : vector<256x8xf32>
    %cst_42 = arith.constant dense<0.000000e+00> : vector<256xf32>
    %83 = vector.multi_reduction <add>, %82, %cst_42 [1] : vector<256x8xf32> to vector<256xf32>
    %84 = vector.shape_cast %83 : vector<256xf32> to vector<256x1xf32>
    %c0_43 = arith.constant 0 : index
    %c0_44 = arith.constant 0 : index
    %85 = vector.load %arg9[%c0_43, %c0_44] : memref<256x16xf32, #tpu.memory_space<vmem>>, vector<256x8xf32>
    tpu.vector_store %arg9[%c0_43, %c0_44], %69 {strides = array<i32>} : memref<256x16xf32, #tpu.memory_space<vmem>>, vector<256x8xf32>,
    %c0_45 = arith.constant 0 : index
    %c8 = arith.constant 8 : index
    %86 = vector.load %arg9[%c0_45, %c8] : memref<256x16xf32, #tpu.memory_space<vmem>>, vector<256x1xf32>
    tpu.vector_store %arg9[%c0_45, %c8], %84 {strides = array<i32>} : memref<256x16xf32, #tpu.memory_space<vmem>>, vector<256x1xf32>,
    return
  }
  func.func @transform_0(%arg0: i32) -> (i32, i32) {
    %c0_i32 = arith.constant 0 : i32
    %c0_i32_0 = arith.constant 0 : i32
    %c0_i32_1 = arith.constant 0 : i32
    return %c0_i32, %c0_i32_0 : i32, i32
  }
  func.func @transform_1(%arg0: i32) -> (i32, i32) {
    %c0_i32 = arith.constant 0 : i32
    %c0_i32_0 = arith.constant 0 : i32
    %c0_i32_1 = arith.constant 0 : i32
    return %c0_i32, %c0_i32_0 : i32, i32
  }
  func.func @transform_2(%arg0: i32) -> (i32, i32) {
    %c0_i32 = arith.constant 0 : i32
    %c0_i32_0 = arith.constant 0 : i32
    %c0_i32_1 = arith.constant 0 : i32
    return %c0_i32, %c0_i32_0 : i32, i32
  }
  func.func @transform_3(%arg0: i32) -> (i32, i32) {
    %c0_i32 = arith.constant 0 : i32
    %c0_i32_0 = arith.constant 0 : i32
    %c0_i32_1 = arith.constant 0 : i32
    return %c0_i32, %c0_i32_0 : i32, i32
  }
  func.func @transform_4(%arg0: i32) -> (i32, i32) {
    %c0_i32 = arith.constant 0 : i32
    %c0_i32_0 = arith.constant 0 : i32
    %c0_i32_1 = arith.constant 0 : i32
    return %c0_i32, %c0_i32_0 : i32, i32
  }
  func.func @transform_5(%arg0: i32) -> (i32, i32) {
    %c0_i32 = arith.constant 0 : i32
    %c0_i32_0 = arith.constant 0 : i32
    %c0_i32_1 = arith.constant 0 : i32
    return %c0_i32, %c0_i32_0 : i32, i32
  }
  func.func @transform_6(%arg0: i32) -> (i32, i32) {
    %c0_i32 = arith.constant 0 : i32
    %c0_i32_0 = arith.constant 0 : i32
    %c0_i32_1 = arith.constant 0 : i32
    return %c0_i32, %c0_i32_0 : i32, i32
  }
  func.func @transform_7(%arg0: i32) -> (i32, i32) {
    %c0_i32 = arith.constant 0 : i32
    %c0_i32_0 = arith.constant 0 : i32
    %c0_i32_1 = arith.constant 0 : i32
    return %c0_i32, %c0_i32_0 : i32, i32
  }
  func.func @transform_8(%arg0: i32) -> (i32, i32) {
    %c0_i32 = arith.constant 0 : i32
    %c0_i32_0 = arith.constant 0 : i32
    %c0_i32_1 = arith.constant 0 : i32
    return %c0_i32, %c0_i32_0 : i32, i32
  }
}

</mosaic_0001>

<bundles_post_ra>
// kernel: tpu_custom_call.1
= control target key start
LH: loop header
LB: loop body
LE: loop exit
PB: predicated region body
PF: predicated region fallthrough
CT: control target
= control target key end

     0   :  { %vm72_vm0 = vcmask 261120   ;;  %vm441_vm1 = vcmask 523264   ;;  %vm6266_vm3 = vcmask 64512   ;;  %s6237_s1 = inlined_call_operand.vmem [shape: f32[32,64], index: 1, kind: input, shape index: {}]   ;;  %s6238_s0 = inlined_call_operand.vmem [shape: f32[256,32], index: 0, kind: input, shape index: {}]   ;;  %s6239_s3 = inlined_call_operand.vmem [shape: f32[64,64], index: 3, kind: input, shape index: {}]   ;;  %s6240_s5 = inlined_call_operand.vmem [shape: f32[64,8], index: 5, kind: input, shape index: {}]   ;;  %s6241_s2 = inlined_call_operand.vmem [shape: f32[1,64], index: 2, kind: input, shape index: {}]   ;;  %s6242_s4 = inlined_call_operand.vmem [shape: f32[1,64], index: 4, kind: input, shape index: {}]   ;;  %s6243_s6 = inlined_call_operand.vmem [shape: f32[1,8], index: 6, kind: input, shape index: {}]   ;;  %s6244_s7 = inlined_call_operand.vmem [shape: f32[256,8], index: 7, kind: input, shape index: {}]   ;;  %s6245_s8 = inlined_call_operand.vmem [shape: f32[256,16], index: 8, kind: output, shape index: {}]  }
   0x1   :  { %v61_v0 = vld [vmem:[%s6237_s1] sm:$0xff]  ;;  %v62_v1 = vld [vmem:[%s6237_s1 + $0x8] sm:$0xff]  ;;  %v63_v2 = vld [vmem:[%s6237_s1 + $0x10] sm:$0xff] }
   0x2   :  { %v3020_v3 = vpack.c.bf16 %v62_v1, %v61_v0  ;;  %v64_v4 = vld [vmem:[%s6237_s1 + $0x18] sm:$0xff]  ;;  %v29_v5 = vld [vmem:[%s6238_s0] sm:$0xff]  ;;  %v30_v8 = vld [vmem:[%s6238_s0 + $0x8] sm:$0xff] }
   0x3   :  { %v3024_v6 = vpack.c.bf16 %v64_v4, %v63_v2  ;;  %2844 = vmatprep.mubr.msk.f32.mxu0 %vm72_vm0, %v29_v5  ;;  %v45_v7 = vld [vmem:[%s6238_s0 + $0x80] sm:$0xff]  ;;  %v46_v9 = vld [vmem:[%s6238_s0 + $0x88] sm:$0xff]  ;;  %v31_v10 = vld [vmem:[%s6238_s0 + $0x10] sm:$0xff] }
   0x4   :  { %3021 = vmatprep.subr.bf16.mxu0 %v3020_v3  ;;  %3060 = vmatprep.subr.bf16.mxu1 %v3020_v3  ;;  %v47_v11 = vld [vmem:[%s6238_s0 + $0x90] sm:$0xff]  ;;  %v32_v12 = vld [vmem:[%s6238_s0 + $0x18] sm:$0xff]  ;;  %v426_v14 = vld [vmem:[%s6239_s3] sm:$0xff] }
   0x5   :  { %3023 = vmatpush3.bf16.msra.mxu0 %v3020_v3  ;;  %3062 = vmatpush3.bf16.msra.mxu1 %v3020_v3  ;;  %v48_v13 = vld [vmem:[%s6238_s0 + $0x98] sm:$0xff]  ;;  %v427_v15 = vld [vmem:[%s6239_s3 + $0x8] sm:$0xff]  ;;  %v33_v16 = vld [vmem:[%s6238_s0 + $0x20] sm:$0xff] }
   0x6   :  { %3025 = vmatprep.subr.bf16.mxu0 %v3024_v6  ;;  %3061 = vmatprep.subr.bf16.mxu1 %v3024_v6  ;;  %v49_v17 = vld [vmem:[%s6238_s0 + $0xa0] sm:$0xff]  ;;  %v3028_v18 = vpack.c.bf16 %v427_v15, %v426_v14  ;;  %v428_v19 = vld [vmem:[%s6239_s3 + $0x10] sm:$0xff]  ;;  %v429_v20 = vld [vmem:[%s6239_s3 + $0x18] sm:$0xff] }
   0x7   :  { %2868 = vmatprep.mubr.msk.f32.mxu1 %vm72_vm0, %v45_v7  ;;  %v34_v21 = vld [vmem:[%s6238_s0 + $0x28] sm:$0xff]  ;;  %v35_v23 = vld [vmem:[%s6238_s0 + $0x30] sm:$0xff]  ;;  %v3032_v25 = vpack.c.bf16 %v429_v20, %v428_v19  ;;  %v430_v26 = vld [vmem:[%s6239_s3 + $0x20] sm:$0xff] }
   0x8   :  { %v50_v22 = vld [vmem:[%s6238_s0 + $0xa8] sm:$0xff]  ;;  %v51_v24 = vld [vmem:[%s6238_s0 + $0xb0] sm:$0xff]  ;;  %v36_v28 = vld [vmem:[%s6238_s0 + $0x38] sm:$0xff] }
   0x9   :  { %3027 = vmatpush3.bf16.msra.mxu0 %v3024_v6  ;;  %3063 = vmatpush3.bf16.msra.mxu1 %v3024_v6  ;;  %v431_v27 = vld [vmem:[%s6239_s3 + $0x28] sm:$0xff]  ;;  %v52_v29 = vld [vmem:[%s6238_s0 + $0xb8] sm:$0xff]  ;;  %v37_v30 = vld [vmem:[%s6238_s0 + $0x40] sm:$0xff] }
   0xa   :  { %3029 = vmatprep.subr.bf16.mxu1 %v3028_v18  ;;  %v53_v31 = vld [vmem:[%s6238_s0 + $0xc0] sm:$0xff]  ;;  %v3036_v32 = vpack.c.bf16 %v431_v27, %v430_v26  ;;  %v432_v33 = vld [vmem:[%s6239_s3 + $0x30] sm:$0xff]  ;;  %v433_v34 = vld [vmem:[%s6239_s3 + $0x38] sm:$0xff] }
   0xb   :  { %v38_v35 = vld [vmem:[%s6238_s0 + $0x48] sm:$0xff]  ;;  %v39_v37 = vld [vmem:[%s6238_s0 + $0x50] sm:$0xff]  ;;  %v3040_v39 = vpack.c.bf16 %v433_v34, %v432_v33  ;;  %v40_v40 = vld [vmem:[%s6238_s0 + $0x58] sm:$0xff] }
   0xc   :  { %2845 = vmatmul.mubr.msk.f32.vlgmr.msra.gmra.mrb[0].mxu0 %vm72_vm0, %v30_v8  ;;  %2869 = vmatmul.mubr.msk.f32.vlgmr.msra.gmra.mrb[0].mxu1 %vm72_vm0, %v46_v9  ;;  %v54_v36 = vld [vmem:[%s6238_s0 + $0xc8] sm:$0xff]  ;;  %v55_v38 = vld [vmem:[%s6238_s0 + $0xd0] sm:$0xff]  ;;  %v56_v41 = vld [vmem:[%s6238_s0 + $0xd8] sm:$0xff] }
   0xd   :  { %2847 = vmatprep.mubr.msk.f32.mxu0 %vm72_vm0, %v31_v10  ;;  %2871 = vmatprep.mubr.msk.f32.mxu1 %vm72_vm0, %v47_v11  ;;  %v41_v42 = vld [vmem:[%s6238_s0 + $0x60] sm:$0xff]  ;;  %v42_v44 = vld [vmem:[%s6238_s0 + $0x68] sm:$0xff]  ;;  %v43_v46 = vld [vmem:[%s6238_s0 + $0x70] sm:$0xff] }
   0xe   :  { %3031 = vmatpush3.bf16.msra.mxu1 %v3028_v18  ;;  %v57_v43 = vld [vmem:[%s6238_s0 + $0xe0] sm:$0xff]  ;;  %v58_v45 = vld [vmem:[%s6238_s0 + $0xe8] sm:$0xff]  ;;  %v59_v47 = vld [vmem:[%s6238_s0 + $0xf0] sm:$0xff] }
   0xf   :  { %3033 = vmatprep.subr.bf16.mxu1 %v3032_v25  ;;  %v44_v48 = vld [vmem:[%s6238_s0 + $0x78] sm:$0xff]  ;;  %v795_v50 = vld [vmem:[%s6240_s5] sm:$0xff]  ;;  %v796_v51 = vld [vmem:[%s6240_s5 + $0x8] sm:$0xff] }
  0x10   :  { %2848 = vmatmul.mubr.msk.f32.gmra.mrb[2].mxu0 %vm72_vm0, %v32_v12  ;;  %2872 = vmatmul.mubr.msk.f32.gmra.mrb[2].mxu1 %vm72_vm0, %v48_v13  ;;  %v60_v49 = vld [vmem:[%s6238_s0 + $0xf8] sm:$0xff]  ;;  %v797_v52 = vld [vmem:[%s6240_s5 + $0x10] sm:$0xff]  ;;  %v3044_v53 = vpack.c.bf16 %v796_v51, %v795_v50  ;;  %v799_v56 = vld [vmem:[%s6240_s5 + $0x20] sm:$0xff] }
  0x11   :  { %2850 = vmatprep.mubr.msk.f32.mxu0 %vm72_vm0, %v33_v16  ;;  %2874 = vmatprep.mubr.msk.f32.mxu1 %vm72_vm0, %v49_v17  ;;  %v798_v54 = vld [vmem:[%s6240_s5 + $0x18] sm:$0xff]  ;;  %v800_v57 = vld [vmem:[%s6240_s5 + $0x28] sm:$0xff]  ;;  %v801_v59 = vld [vmem:[%s6240_s5 + $0x30] sm:$0xff] }
  0x12   :  { %3035 = vmatpush3.bf16.msra.mxu1 %v3032_v25  ;;  %v3048_v55 = vpack.c.bf16 %v798_v54, %v797_v52  ;;  %3045 = vmatprep.subr.bf16.mxu0 %v3044_v53  ;;  %v3052_v58 = vpack.c.bf16 %v800_v57, %v799_v56  ;;  %v802_v60 = vld [vmem:[%s6240_s5 + $0x38] sm:$0xff]  ;;  %v3561_v62 = vld [vmem:[%s6241_s2] ss:$0 sm:$0xff] }
  0x13   :  { %3037 = vmatprep.subr.bf16.mxu1 %v3036_v32  ;;  %3047 = vmatpush3.bf16.msra.mxu0 %v3044_v53  ;;  %v3056_v61 = vpack.c.bf16 %v802_v60, %v801_v59 }
  0x14   :  { %2851 = vmatmul.mubr.msk.f32.gmra.mrb[4].mxu0 %vm72_vm0, %v34_v21  ;;  %2875 = vmatmul.mubr.msk.f32.gmra.mrb[4].mxu1 %vm72_vm0, %v50_v22 }
  0x15   :  { %2853 = vmatprep.mubr.msk.f32.mxu0 %vm72_vm0, %v35_v23  ;;  %2877 = vmatprep.mubr.msk.f32.mxu1 %vm72_vm0, %v51_v24 }
  0x16   :  { %3039 = vmatpush3.bf16.msra.mxu1 %v3036_v32  ;;  %3049 = vmatprep.subr.bf16.mxu0 %v3048_v55 }
  0x17   :  { %3041 = vmatprep.subr.bf16.mxu1 %v3040_v39  ;;  %3051 = vmatpush3.bf16.msra.mxu0 %v3048_v55 }
  0x18   :  { %2854 = vmatmul.mubr.msk.f32.gmra.mrb[6].mxu0 %vm72_vm0, %v36_v28  ;;  %2878 = vmatmul.mubr.msk.f32.gmra.mrb[6].mxu1 %vm72_vm0, %v52_v29 }
  0x19   :  { %2856 = vmatprep.mubr.msk.f32.mxu0 %vm72_vm0, %v37_v30  ;;  %2880 = vmatprep.mubr.msk.f32.mxu1 %vm72_vm0, %v53_v31 }
  0x1a   :  { %3043 = vmatpush3.bf16.msra.mxu1 %v3040_v39  ;;  %3053 = vmatprep.subr.bf16.mxu0 %v3052_v58 }
  0x1b   :  { %3055 = vmatpush3.bf16.msra.mxu0 %v3052_v58 }
  0x1c   :  { %2857 = vmatmul.mubr.msk.f32.gmra.mrb[8].mxu0 %vm72_vm0, %v38_v35  ;;  %2881 = vmatmul.mubr.msk.f32.gmra.mrb[8].mxu1 %vm72_vm0, %v54_v36 }
  0x1d   :  { %2859 = vmatprep.mubr.msk.f32.mxu0 %vm72_vm0, %v39_v37  ;;  %2883 = vmatprep.mubr.msk.f32.mxu1 %vm72_vm0, %v55_v38 }
  0x1e   :  { %3057 = vmatprep.subr.bf16.mxu0 %v3056_v61 }
  0x1f   :  { %3059 = vmatpush3.bf16.msra.mxu0 %v3056_v61 }
  0x20   :  { %2860 = vmatmul.mubr.msk.f32.gmra.mrb[10].mxu0 %vm72_vm0, %v40_v40  ;;  %2884 = vmatmul.mubr.msk.f32.gmra.mrb[10].mxu1 %vm72_vm0, %v56_v41 }
  0x21   :  { %2862 = vmatprep.mubr.msk.f32.mxu0 %vm72_vm0, %v41_v42  ;;  %2886 = vmatprep.mubr.msk.f32.mxu1 %vm72_vm0, %v57_v43 }
  0x24   :  { %2863 = vmatmul.mubr.msk.f32.gmra.mrb[12].mxu0 %vm72_vm0, %v42_v44  ;;  %2887 = vmatmul.mubr.msk.f32.gmra.mrb[12].mxu1 %vm72_vm0, %v58_v45 }
  0x25   :  { %2865 = vmatprep.mubr.msk.f32.mxu0 %vm72_vm0, %v43_v46  ;;  %2889 = vmatprep.mubr.msk.f32.mxu1 %vm72_vm0, %v59_v47 }
  0x28   :  { %2866 = vmatmul.mubr.msk.f32.gmra.mrb[14].mxu0 %vm72_vm0, %v44_v48  ;;  %2890 = vmatmul.mubr.msk.f32.gmra.mrb[14].mxu1 %vm72_vm0, %v60_v49 }
  0xdf   :  { %v2846_v63 = vpop.f32.mrb[0].mxu0  ;;  %v3563_v0 = vpop.f32.mrb[0].mxu1 }
  0xe0   :  { %v241_v1 = vadd.f32 %v2846_v63, %v3561_v62  ;;  %v235_v2 = vpop.f32.mrb[1].mxu0  ;;  %v3566_v3 = vpop.f32.mrb[1].mxu1 }
  0xe1   :  { %v236_v4 = vadd.f32 %v3561_v62, %v235_v2  ;;  %v316_v55 = vadd.f32 %v3561_v62, %v3566_v3  ;;  %v321_v3 = vadd.f32 %v3563_v0, %v3561_v62 }
  0xe2   :  { %v395_v8 = vmax.f32 %v241_v1, 0.0 }
  0xe3   :  { %v394_v5 = vmax.f32 %v236_v4, 0.0  ;;  %v2849_v6 = vpop.f32.mrb[2].mxu0  ;;  %v3569_v7 = vpop.f32.mrb[2].mxu1  ;;  %v410_v1 = vmax.f32 %v316_v55, 0.0 }
  0xe4   :  { %v251_v9 = vadd.f32 %v2849_v6, %v3561_v62  ;;  %v245_v10 = vpop.f32.mrb[3].mxu0  ;;  %v3572_v11 = vpop.f32.mrb[3].mxu1 }
  0xe5   :  { %v246_v12 = vadd.f32 %v3561_v62, %v245_v10  ;;  %2908 = vmatprep.mubr.msk.f32.mxu1 %vm441_vm1, %v394_v5  ;;  %v326_v2 = vadd.f32 %v3561_v62, %v3572_v11 }
  0xe6   :  { %2909 = vmatmul.mubr.msk.f32.vlgmr.msra.gmra.mrb[16].mxu1 %vm441_vm1, %v395_v8  ;;  %v397_v16 = vmax.f32 %v251_v9, 0.0  ;;  %v411_v8 = vmax.f32 %v321_v3, 0.0  ;;  %v331_v9 = vadd.f32 %v3569_v7, %v3561_v62 }
  0xe7   :  { %v396_v13 = vmax.f32 %v246_v12, 0.0  ;;  %v2852_v14 = vpop.f32.mrb[4].mxu0  ;;  %v3577_v15 = vpop.f32.mrb[4].mxu1  ;;  %v412_v5 = vmax.f32 %v326_v2, 0.0 }
  0xe8   :  { %v261_v17 = vadd.f32 %v2852_v14, %v3561_v62  ;;  %v255_v18 = vpop.f32.mrb[5].mxu0  ;;  %v3580_v19 = vpop.f32.mrb[5].mxu1  ;;  %v413_v11 = vmax.f32 %v331_v9, 0.0  ;;  %v341_v12 = vadd.f32 %v3577_v15, %v3561_v62 }
  0xe9   :  { %v256_v20 = vadd.f32 %v3561_v62, %v255_v18  ;;  %2911 = vmatprep.mubr.msk.f32.mxu1 %vm441_vm1, %v396_v13  ;;  %v336_v6 = vadd.f32 %v3561_v62, %v3580_v19 }
  0xea   :  { %2912 = vmatmul.mubr.msk.f32.gmra.mrb[18].mxu1 %vm441_vm1, %v397_v16  ;;  %v399_v24 = vmax.f32 %v261_v17, 0.0  ;;  %v415_v16 = vmax.f32 %v341_v12, 0.0 }
  0xeb   :  { %v398_v21 = vmax.f32 %v256_v20, 0.0  ;;  %v2855_v22 = vpop.f32.mrb[6].mxu0  ;;  %v3585_v23 = vpop.f32.mrb[6].mxu1  ;;  %v414_v10 = vmax.f32 %v336_v6, 0.0 }
  0xec   :  { %v271_v25 = vadd.f32 %v2855_v22, %v3561_v62  ;;  %v265_v26 = vpop.f32.mrb[7].mxu0  ;;  %v345_v27 = vpop.f32.mrb[7].mxu1  ;;  %v351_v7 = vadd.f32 %v3585_v23, %v3561_v62 }
  0xed   :  { %v266_v28 = vadd.f32 %v3561_v62, %v265_v26  ;;  %2914 = vmatprep.mubr.msk.f32.mxu1 %vm441_vm1, %v398_v21  ;;  %v346_v0 = vadd.f32 %v3561_v62, %v345_v27 }
  0xee   :  { %2915 = vmatmul.mubr.msk.f32.gmra.mrb[20].mxu1 %vm441_vm1, %v399_v24  ;;  %v401_v32 = vmax.f32 %v271_v25, 0.0  ;;  %v417_v19 = vmax.f32 %v351_v7, 0.0 }
  0xef   :  { %v400_v29 = vmax.f32 %v266_v28, 0.0  ;;  %v2858_v30 = vpop.f32.mrb[8].mxu0  ;;  %v3591_v31 = vpop.f32.mrb[8].mxu1  ;;  %v416_v13 = vmax.f32 %v346_v0, 0.0 }
  0xf0   :  { %v281_v33 = vadd.f32 %v2858_v30, %v3561_v62  ;;  %v275_v34 = vpop.f32.mrb[9].mxu0  ;;  %v355_v35 = vpop.f32.mrb[9].mxu1  ;;  %v361_v15 = vadd.f32 %v3591_v31, %v3561_v62 }
  0xf1   :  { %v276_v36 = vadd.f32 %v3561_v62, %v275_v34  ;;  %2917 = vmatprep.mubr.msk.f32.mxu1 %vm441_vm1, %v400_v29  ;;  %v356_v14 = vadd.f32 %v3561_v62, %v355_v35 }
  0xf2   :  { %2918 = vmatmul.mubr.msk.f32.gmra.mrb[22].mxu1 %vm441_vm1, %v401_v32  ;;  %v403_v40 = vmax.f32 %v281_v33, 0.0  ;;  %v419_v22 = vmax.f32 %v361_v15, 0.0  ;;  %v3657_v32 = vld [vmem:[%s6242_s4] ss:$0 sm:$0xff] }
  0xf3   :  { %v402_v37 = vmax.f32 %v276_v36, 0.0  ;;  %v2861_v38 = vpop.f32.mrb[10].mxu0  ;;  %v3597_v39 = vpop.f32.mrb[10].mxu1  ;;  %v418_v17 = vmax.f32 %v356_v14, 0.0 }
  0xf4   :  { %v291_v41 = vadd.f32 %v2861_v38, %v3561_v62  ;;  %v285_v42 = vpop.f32.mrb[11].mxu0  ;;  %v365_v43 = vpop.f32.mrb[11].mxu1  ;;  %v371_v23 = vadd.f32 %v3597_v39, %v3561_v62 }
  0xf5   :  { %v286_v44 = vadd.f32 %v3561_v62, %v285_v42  ;;  %2920 = vmatprep.mubr.msk.f32.mxu1 %vm441_vm1, %v402_v37  ;;  %v366_v18 = vadd.f32 %v3561_v62, %v365_v43 }
  0xf6   :  { %2921 = vmatmul.mubr.msk.f32.gmra.mrb[24].mxu1 %vm441_vm1, %v403_v40  ;;  %v405_v48 = vmax.f32 %v291_v41, 0.0  ;;  %v421_v26 = vmax.f32 %v371_v23, 0.0 }
  0xf7   :  { %v404_v45 = vmax.f32 %v286_v44, 0.0  ;;  %v2864_v46 = vpop.f32.mrb[12].mxu0  ;;  %v2888_v47 = vpop.f32.mrb[12].mxu1  ;;  %v420_v20 = vmax.f32 %v366_v18, 0.0 }
  0xf8   :  { %v301_v49 = vadd.f32 %v2864_v46, %v3561_v62  ;;  %v295_v50 = vpop.f32.mrb[13].mxu0  ;;  %v375_v51 = vpop.f32.mrb[13].mxu1  ;;  %v381_v27 = vadd.f32 %v2888_v47, %v3561_v62 }
  0xf9   :  { %v296_v52 = vadd.f32 %v3561_v62, %v295_v50  ;;  %2923 = vmatprep.mubr.msk.f32.mxu1 %vm441_vm1, %v404_v45  ;;  %v376_v21 = vadd.f32 %v3561_v62, %v375_v51 }
  0xfa   :  { %2924 = vmatmul.mubr.msk.f32.gmra.mrb[26].mxu1 %vm441_vm1, %v405_v48  ;;  %v407_v57 = vmax.f32 %v301_v49, 0.0  ;;  %v423_v29 = vmax.f32 %v381_v27, 0.0 }
  0xfb   :  { %v406_v53 = vmax.f32 %v296_v52, 0.0  ;;  %v2867_v54 = vpop.f32.mrb[14].mxu0  ;;  %v2891_v56 = vpop.f32.mrb[14].mxu1  ;;  %v422_v24 = vmax.f32 %v376_v21, 0.0 }
  0xfc   :  { %v311_v58 = vadd.f32 %v2867_v54, %v3561_v62  ;;  %v305_v59 = vpop.f32.mrb[15].mxu0  ;;  %v385_v60 = vpop.f32.mrb[15].mxu1  ;;  %v391_v30 = vadd.f32 %v2891_v56, %v3561_v62 }
  0xfd   :  { %v306_v61 = vadd.f32 %v3561_v62, %v305_v59  ;;  %2926 = vmatprep.mubr.msk.f32.mxu1 %vm441_vm1, %v406_v53  ;;  %v386_v25 = vadd.f32 %v3561_v62, %v385_v60 }
  0xfe   :  { %2927 = vmatmul.mubr.msk.f32.gmra.mrb[28].mxu1 %vm441_vm1, %v407_v57  ;;  %v409_v4 = vmax.f32 %v311_v58, 0.0  ;;  %v425_v31 = vmax.f32 %v391_v30, 0.0 }
  0xff   :  { %v408_v63 = vmax.f32 %v306_v61, 0.0  ;;  %v424_v28 = vmax.f32 %v386_v25, 0.0 }
 0x101   :  { %2929 = vmatprep.mubr.msk.f32.mxu1 %vm441_vm1, %v408_v63 }
 0x102   :  { %2930 = vmatmul.mubr.msk.f32.gmra.mrb[30].mxu1 %vm441_vm1, %v409_v4 }
 0x103   :  { %2932 = vmatprep.mubr.msk.f32.mxu1 %vm441_vm1, %v410_v1 }
 0x106   :  { %2933 = vmatmul.mubr.msk.f32.gmra.mrb[32].mxu1 %vm441_vm1, %v411_v8 }
 0x107   :  { %2935 = vmatprep.mubr.msk.f32.mxu1 %vm441_vm1, %v412_v5 }
 0x10a   :  { %2936 = vmatmul.mubr.msk.f32.gmra.mrb[34].mxu1 %vm441_vm1, %v413_v11 }
 0x10b   :  { %2938 = vmatprep.mubr.msk.f32.mxu1 %vm441_vm1, %v414_v10 }
 0x10e   :  { %2939 = vmatmul.mubr.msk.f32.gmra.mrb[36].mxu1 %vm441_vm1, %v415_v16 }
 0x10f   :  { %2941 = vmatprep.mubr.msk.f32.mxu1 %vm441_vm1, %v416_v13 }
 0x112   :  { %2942 = vmatmul.mubr.msk.f32.gmra.mrb[38].mxu1 %vm441_vm1, %v417_v19 }
 0x113   :  { %2944 = vmatprep.mubr.msk.f32.mxu1 %vm441_vm1, %v418_v17 }
 0x116   :  { %2945 = vmatmul.mubr.msk.f32.gmra.mrb[40].mxu1 %vm441_vm1, %v419_v22 }
 0x117   :  { %2947 = vmatprep.mubr.msk.f32.mxu1 %vm441_vm1, %v420_v20 }
 0x11a   :  { %2948 = vmatmul.mubr.msk.f32.gmra.mrb[42].mxu1 %vm441_vm1, %v421_v26 }
 0x11b   :  { %2950 = vmatprep.mubr.msk.f32.mxu1 %vm441_vm1, %v422_v24 }
 0x11e   :  { %2951 = vmatmul.mubr.msk.f32.gmra.mrb[44].mxu1 %vm441_vm1, %v423_v29 }
 0x11f   :  { %2953 = vmatprep.mubr.msk.f32.mxu1 %vm441_vm1, %v424_v28 }
 0x122   :  { %2954 = vmatmul.mubr.msk.f32.gmra.mrb[46].mxu1 %vm441_vm1, %v425_v31 }
 0x1b9   :  { %v2910_v33 = vpop.f32.mrb[16].mxu1 }
 0x1ba   :  { %v610_v34 = vadd.f32 %v2910_v33, %v3657_v32  ;;  %v604_v35 = vpop.f32.mrb[17].mxu1 }
 0x1bb   :  { %v605_v36 = vadd.f32 %v3657_v32, %v604_v35 }
 0x1bc   :  { %v764_v38 = vmax.f32 %v610_v34, 0.0 }
 0x1bd   :  { %v763_v37 = vmax.f32 %v605_v36, 0.0  ;;  %v2913_v62 = vpop.f32.mrb[18].mxu1 }
 0x1be   :  { %v620_v39 = vadd.f32 %v2913_v62, %v3657_v32  ;;  %v614_v40 = vpop.f32.mrb[19].mxu1 }
 0x1bf   :  { %v615_v41 = vadd.f32 %v3657_v32, %v614_v40  ;;  %2972 = vmatprep.mubr.msk.f32.mxu0 %vm441_vm1, %v763_v37 }
 0x1c0   :  { %2973 = vmatmul.mubr.msk.f32.vlgmr.msra.gmra.mrb[16].mxu0 %vm441_vm1, %v764_v38  ;;  %v766_v44 = vmax.f32 %v620_v39, 0.0 }
 0x1c1   :  { %v765_v42 = vmax.f32 %v615_v41, 0.0  ;;  %v2916_v43 = vpop.f32.mrb[20].mxu1 }
 0x1c2   :  { %v630_v45 = vadd.f32 %v2916_v43, %v3657_v32  ;;  %v624_v46 = vpop.f32.mrb[21].mxu1 }
 0x1c3   :  { %v625_v47 = vadd.f32 %v3657_v32, %v624_v46  ;;  %2975 = vmatprep.mubr.msk.f32.mxu0 %vm441_vm1, %v765_v42 }
 0x1c4   :  { %2976 = vmatmul.mubr.msk.f32.gmra.mrb[18].mxu0 %vm441_vm1, %v766_v44  ;;  %v768_v50 = vmax.f32 %v630_v45, 0.0 }
 0x1c5   :  { %v767_v48 = vmax.f32 %v625_v47, 0.0  ;;  %v2919_v49 = vpop.f32.mrb[22].mxu1 }
 0x1c6   :  { %v640_v51 = vadd.f32 %v2919_v49, %v3657_v32  ;;  %v634_v52 = vpop.f32.mrb[23].mxu1 }
 0x1c7   :  { %v635_v53 = vadd.f32 %v3657_v32, %v634_v52  ;;  %2978 = vmatprep.mubr.msk.f32.mxu0 %vm441_vm1, %v767_v48 }
 0x1c8   :  { %2979 = vmatmul.mubr.msk.f32.gmra.mrb[20].mxu0 %vm441_vm1, %v768_v50  ;;  %v770_v56 = vmax.f32 %v640_v51, 0.0 }
 0x1c9   :  { %v769_v54 = vmax.f32 %v635_v53, 0.0  ;;  %v2922_v55 = vpop.f32.mrb[24].mxu1 }
 0x1ca   :  { %v650_v57 = vadd.f32 %v2922_v55, %v3657_v32  ;;  %v644_v58 = vpop.f32.mrb[25].mxu1 }
 0x1cb   :  { %v645_v59 = vadd.f32 %v3657_v32, %v644_v58  ;;  %2981 = vmatprep.mubr.msk.f32.mxu0 %vm441_vm1, %v769_v54 }
 0x1cc   :  { %2982 = vmatmul.mubr.msk.f32.gmra.mrb[22].mxu0 %vm441_vm1, %v770_v56  ;;  %v772_v63 = vmax.f32 %v650_v57, 0.0 }
 0x1cd   :  { %v771_v60 = vmax.f32 %v645_v59, 0.0  ;;  %v2925_v61 = vpop.f32.mrb[26].mxu1 }
 0x1ce   :  { %v660_v1 = vadd.f32 %v2925_v61, %v3657_v32  ;;  %v654_v2 = vpop.f32.mrb[27].mxu1 }
 0x1cf   :  { %v655_v4 = vadd.f32 %v3657_v32, %v654_v2  ;;  %2984 = vmatprep.mubr.msk.f32.mxu0 %vm441_vm1, %v771_v60 }
 0x1d0   :  { %2985 = vmatmul.mubr.msk.f32.gmra.mrb[24].mxu0 %vm441_vm1, %v772_v63  ;;  %v774_v6 = vmax.f32 %v660_v1, 0.0 }
 0x1d1   :  { %v773_v3 = vmax.f32 %v655_v4, 0.0  ;;  %v2928_v5 = vpop.f32.mrb[28].mxu1 }
 0x1d2   :  { %v670_v8 = vadd.f32 %v2928_v5, %v3657_v32  ;;  %v664_v9 = vpop.f32.mrb[29].mxu1 }
 0x1d3   :  { %v665_v10 = vadd.f32 %v3657_v32, %v664_v9  ;;  %2987 = vmatprep.mubr.msk.f32.mxu0 %vm441_vm1, %v773_v3 }
 0x1d4   :  { %2988 = vmatmul.mubr.msk.f32.gmra.mrb[26].mxu0 %vm441_vm1, %v774_v6  ;;  %v776_v12 = vmax.f32 %v670_v8, 0.0 }
 0x1d5   :  { %v775_v0 = vmax.f32 %v665_v10, 0.0  ;;  %v2931_v11 = vpop.f32.mrb[30].mxu1 }
 0x1d6   :  { %v680_v13 = vadd.f32 %v2931_v11, %v3657_v32  ;;  %v674_v14 = vpop.f32.mrb[31].mxu1 }
 0x1d7   :  { %v675_v16 = vadd.f32 %v3657_v32, %v674_v14  ;;  %2990 = vmatprep.mubr.msk.f32.mxu0 %vm441_vm1, %v775_v0 }
 0x1d8   :  { %2991 = vmatmul.mubr.msk.f32.gmra.mrb[28].mxu0 %vm441_vm1, %v776_v12  ;;  %v778_v18 = vmax.f32 %v680_v13, 0.0 }
 0x1d9   :  { %v777_v7 = vmax.f32 %v675_v16, 0.0  ;;  %v2934_v17 = vpop.f32.mrb[32].mxu1 }
 0x1da   :  { %v690_v19 = vadd.f32 %v2934_v17, %v3657_v32  ;;  %v684_v15 = vpop.f32.mrb[33].mxu1 }
 0x1db   :  { %v685_v20 = vadd.f32 %v3657_v32, %v684_v15  ;;  %2993 = vmatprep.mubr.msk.f32.mxu0 %vm441_vm1, %v777_v7 }
 0x1dc   :  { %2994 = vmatmul.mubr.msk.f32.gmra.mrb[30].mxu0 %vm441_vm1, %v778_v18  ;;  %v780_v23 = vmax.f32 %v690_v19, 0.0 }
 0x1dd   :  { %v779_v21 = vmax.f32 %v685_v20, 0.0  ;;  %v2937_v22 = vpop.f32.mrb[34].mxu1 }
 0x1de   :  { %v700_v24 = vadd.f32 %v2937_v22, %v3657_v32  ;;  %v694_v25 = vpop.f32.mrb[35].mxu1 }
 0x1df   :  { %v695_v26 = vadd.f32 %v3657_v32, %v694_v25  ;;  %2996 = vmatprep.mubr.msk.f32.mxu0 %vm441_vm1, %v779_v21 }
 0x1e0   :  { %2997 = vmatmul.mubr.msk.f32.gmra.mrb[32].mxu0 %vm441_vm1, %v780_v23  ;;  %v782_v29 = vmax.f32 %v700_v24, 0.0 }
 0x1e1   :  { %v781_v27 = vmax.f32 %v695_v26, 0.0  ;;  %v2940_v28 = vpop.f32.mrb[36].mxu1 }
 0x1e2   :  { %v710_v30 = vadd.f32 %v2940_v28, %v3657_v32  ;;  %v704_v31 = vpop.f32.mrb[37].mxu1 }
 0x1e3   :  { %v705_v33 = vadd.f32 %v3657_v32, %v704_v31  ;;  %2999 = vmatprep.mubr.msk.f32.mxu0 %vm441_vm1, %v781_v27 }
 0x1e4   :  { %3000 = vmatmul.mubr.msk.f32.gmra.mrb[34].mxu0 %vm441_vm1, %v782_v29  ;;  %v784_v36 = vmax.f32 %v710_v30, 0.0 }
 0x1e5   :  { %v783_v34 = vmax.f32 %v705_v33, 0.0  ;;  %v2943_v35 = vpop.f32.mrb[38].mxu1 }
 0x1e6   :  { %v720_v37 = vadd.f32 %v2943_v35, %v3657_v32  ;;  %v714_v62 = vpop.f32.mrb[39].mxu1 }
 0x1e7   :  { %v715_v38 = vadd.f32 %v3657_v32, %v714_v62  ;;  %3002 = vmatprep.mubr.msk.f32.mxu0 %vm441_vm1, %v783_v34  ;;  %v3758_v34 = vld [vmem:[%s6243_s6] ss:$0 sm:$0xff] }
 0x1e8   :  { %3003 = vmatmul.mubr.msk.f32.gmra.mrb[36].mxu0 %vm441_vm1, %v784_v36  ;;  %v786_v41 = vmax.f32 %v720_v37, 0.0 }
 0x1e9   :  { %v785_v39 = vmax.f32 %v715_v38, 0.0  ;;  %v2946_v40 = vpop.f32.mrb[40].mxu1 }
 0x1ea   :  { %v730_v42 = vadd.f32 %v2946_v40, %v3657_v32  ;;  %v724_v43 = vpop.f32.mrb[41].mxu1  ;;  %v3324_v40 = vmov 0.0  }
 0x1eb   :  { %v725_v44 = vadd.f32 %v3657_v32, %v724_v43  ;;  %3005 = vmatprep.mubr.msk.f32.mxu0 %vm441_vm1, %v785_v39 }
 0x1ec   :  { %3006 = vmatmul.mubr.msk.f32.gmra.mrb[38].mxu0 %vm441_vm1, %v786_v41  ;;  %v788_v47 = vmax.f32 %v730_v42, 0.0 }
 0x1ed   :  { %v787_v45 = vmax.f32 %v725_v44, 0.0  ;;  %v2949_v46 = vpop.f32.mrb[42].mxu1 }
 0x1ee   :  { %v740_v48 = vadd.f32 %v2949_v46, %v3657_v32  ;;  %v734_v49 = vpop.f32.mrb[43].mxu1 }
 0x1ef   :  { %v735_v50 = vadd.f32 %v3657_v32, %v734_v49  ;;  %3008 = vmatprep.mubr.msk.f32.mxu0 %vm441_vm1, %v787_v45 }
 0x1f0   :  { %3009 = vmatmul.mubr.msk.f32.gmra.mrb[40].mxu0 %vm441_vm1, %v788_v47  ;;  %v790_v53 = vmax.f32 %v740_v48, 0.0 }
 0x1f1   :  { %v789_v51 = vmax.f32 %v735_v50, 0.0  ;;  %v2952_v52 = vpop.f32.mrb[44].mxu1 }
 0x1f2   :  { %v750_v54 = vadd.f32 %v2952_v52, %v3657_v32  ;;  %v744_v55 = vpop.f32.mrb[45].mxu1 }
 0x1f3   :  { %v745_v56 = vadd.f32 %v3657_v32, %v744_v55  ;;  %3011 = vmatprep.mubr.msk.f32.mxu0 %vm441_vm1, %v789_v51 }
 0x1f4   :  { %3012 = vmatmul.mubr.msk.f32.gmra.mrb[42].mxu0 %vm441_vm1, %v790_v53  ;;  %v792_v59 = vmax.f32 %v750_v54, 0.0 }
 0x1f5   :  { %v791_v57 = vmax.f32 %v745_v56, 0.0  ;;  %v2955_v58 = vpop.f32.mrb[46].mxu1 }
 0x1f6   :  { %v760_v60 = vadd.f32 %v2955_v58, %v3657_v32  ;;  %v754_v61 = vpop.f32.mrb[47].mxu1 }
 0x1f7   :  { %v755_v63 = vadd.f32 %v3657_v32, %v754_v61  ;;  %3014 = vmatprep.mubr.msk.f32.mxu0 %vm441_vm1, %v791_v57 }
 0x1f8   :  { %3015 = vmatmul.mubr.msk.f32.gmra.mrb[44].mxu0 %vm441_vm1, %v792_v59  ;;  %v794_v2 = vmax.f32 %v760_v60, 0.0 }
 0x1f9   :  { %v793_v1 = vmax.f32 %v755_v63, 0.0 }
 0x1fb   :  { %3017 = vmatprep.mubr.msk.f32.mxu0 %vm441_vm1, %v793_v1 }
 0x1fc   :  { %3018 = vmatmul.mubr.msk.f32.gmra.mrb[46].mxu0 %vm441_vm1, %v794_v2 }
 0x293   :  { %v2974_v4 = vpop.f32.mrb[16].mxu0 }
 0x294   :  { %v972_v3 = vpop.f32.mrb[17].mxu0  ;;  %v3761_v35 = vadd.f32 %v2974_v4, %v3758_v34 }
 0x295   :  { %v3764_v36 = vadd.f32 %v3758_v34, %v972_v3 }
 0x296   :  { %vm1292_vm2 = vcmp.ne.f32.partialorder %v3761_v35, %v3761_v35 }
 0x297   :  { %v2977_v5 = vpop.f32.mrb[18].mxu0  ;;  %v1324_v41 = vsel %vm1292_vm2, 1.0, %v3324_v40  ;;  %vm1291_vm4 = vcmp.ne.f32.partialorder %v3764_v36, %v3764_v36 }
 0x298   :  { %v982_v6 = vpop.f32.mrb[19].mxu0  ;;  %v3767_v37 = vadd.f32 %v2977_v5, %v3758_v34  ;;  %v1357_v46 = vsel %vm6266_vm3, %v1324_v41, -inf  ;;  %v1323_v47 = vsel %vm1291_vm4, 1.0, %v3324_v40 }
 0x299   :  { %v3789_v42 = vadd.f32 %v3758_v34, %v982_v6  ;;  %v1356_v57 = vsel %vm6266_vm3, %v1323_v47, -inf }
 0x29a   :  { %vm1294_vm5 = vcmp.ne.f32.partialorder %v3767_v37, %v3767_v37 }
 0x29b   :  { %v2980_v8 = vpop.f32.mrb[20].mxu0  ;;  %v1326_v49 = vsel %vm1294_vm5, 1.0, %v3324_v40  ;;  %vm1293_vm9 = vcmp.ne.f32.partialorder %v3789_v42, %v3789_v42 }
 0x29c   :  { %v992_v9 = vpop.f32.mrb[21].mxu0  ;;  %v3772_v62 = vadd.f32 %v2980_v8, %v3758_v34  ;;  %v1359_v58 = vsel %vm6266_vm3, %v1326_v49, -inf  ;;  %v1325_v60 = vsel %vm1293_vm9, 1.0, %v3324_v40 }
 0x29d   :  { %v3775_v38 = vadd.f32 %v3758_v34, %v992_v9  ;;  %v1358_v47 = vsel %vm6266_vm3, %v1325_v60, -inf }
 0x29e   :  { %vm6261_vm6 = vcmp.ne.f32.partialorder %v3772_v62, %v3772_v62 }
 0x29f   :  { %v2983_v10 = vpop.f32.mrb[22].mxu0  ;;  %vm6260_vm7 = vcmp.ne.f32.partialorder %v3775_v38, %v3775_v38  ;;  %v1328_v50 = vsel %vm6261_vm6, 1.0, %v3324_v40 }
 0x2a0   :  { %v1002_v0 = vpop.f32.mrb[23].mxu0  ;;  %v3778_v39 = vadd.f32 %v2983_v10, %v3758_v34  ;;  %v1327_v51 = vsel %vm6260_vm7, 1.0, %v3324_v40  ;;  %v1362_v61 = vsel %vm6266_vm3, %v1328_v50, -inf }
 0x2a1   :  { %v3796_v43 = vadd.f32 %v3758_v34, %v1002_v0  ;;  %v1360_v63 = vsel %vm6266_vm3, %v1327_v51, -inf  ;;  %v1363_v6 = vmax.f32 %v1357_v46, %v1362_v61 }
 0x2a2   :  { %vm6259_vm8 = vcmp.ne.f32.partialorder %v3778_v39, %v3778_v39  ;;  %v1361_v8 = vmax.f32 %v1356_v57, %v1360_v63 }
 0x2a3   :  { %v2986_v11 = vpop.f32.mrb[24].mxu0  ;;  %v1330_v52 = vsel %vm6259_vm8, 1.0, %v3324_v40  ;;  %vm6258_vm10 = vcmp.ne.f32.partialorder %v3796_v43, %v3796_v43 }
 0x2a4   :  { %v1012_v32 = vpop.f32.mrb[25].mxu0  ;;  %v3799_v44 = vadd.f32 %v2986_v11, %v3758_v34  ;;  %v1366_v1 = vsel %vm6266_vm3, %v1330_v52, -inf  ;;  %v1329_v2 = vsel %vm6258_vm10, 1.0, %v3324_v40 }
 0x2a5   :  { %v3804_v45 = vadd.f32 %v3758_v34, %v1012_v32  ;;  %v1367_v9 = vmax.f32 %v1359_v58, %v1366_v1  ;;  %v1364_v10 = vsel %vm6266_vm3, %v1329_v2, -inf }
 0x2a6   :  { %6358 = vst [vmem:[#allocation2_spill] sm:$0xff] %v3799_v44  ;;  %vm6257_vm11 = vcmp.ne.f32.partialorder %v3799_v44, %v3799_v44  ;;  %v1365_v51 = vmax.f32 %v1358_v47, %v1364_v10 }
 0x2a7   :  { %v2989_v12 = vpop.f32.mrb[26].mxu0  ;;  %vm6246_vm12 = vcmp.ne.f32.partialorder %v3804_v45, %v3804_v45  ;;  %v1332_v4 = vsel %vm6257_vm11, 1.0, %v3324_v40 }
 0x2a8   :  { %v1022_v13 = vpop.f32.mrb[27].mxu0  ;;  %v3812_v48 = vadd.f32 %v2989_v12, %v3758_v34  ;;  %v1331_v3 = vsel %vm6246_vm12, 1.0, %v3324_v40  ;;  %v1370_v0 = vsel %vm6266_vm3, %v1332_v4, -inf }
 0x2a9   :  { %v3837_v53 = vadd.f32 %v3758_v34, %v1022_v13  ;;  %v1368_v11 = vsel %vm6266_vm3, %v1331_v3, -inf  ;;  %v1371_v52 = vmax.f32 %v1363_v6, %v1370_v0 }
 0x2aa   :  { %6359 = vst [vmem:[#allocation3_spill] sm:$0xff] %v3812_v48  ;;  %vm6256_vm13 = vcmp.ne.f32.partialorder %v3812_v48, %v3812_v48 }
 0x2ab   :  { %v2992_v14 = vpop.f32.mrb[28].mxu0  ;;  %6360 = vst [vmem:[#allocation4_spill] sm:$0xff] %v3837_v53  ;;  %vm6255_vm14 = vcmp.ne.f32.partialorder %v3837_v53, %v3837_v53  ;;  %v1334_v5 = vsel %vm6256_vm13, 1.0, %v3324_v40 }
 0x2ac   :  { %v1032_v16 = vpop.f32.mrb[29].mxu0  ;;  %v3842_v54 = vadd.f32 %v2992_v14, %v3758_v34  ;;  %v1333_v32 = vsel %vm6255_vm14, 1.0, %v3324_v40  ;;  %v1374_v12 = vsel %vm6266_vm3, %v1334_v5, -inf }
 0x2ad   :  { %v3845_v55 = vadd.f32 %v3758_v34, %v1032_v16  ;;  %v1372_v49 = vsel %vm6266_vm3, %v1333_v32, -inf  ;;  %v3932_v57 = vmax.f32 %v1367_v9, %v1374_v12 }
 0x2ae   :  { %6361 = vst [vmem:[#allocation5_spill] sm:$0xff] %v3842_v54  ;;  %vm6250_vm15 = vcmp.ne.f32.partialorder %v3842_v54, %v3842_v54  ;;  %v1373_v60 = vmax.f32 %v1365_v51, %v1372_v49 }
 0x2af   :  { %v2995_v7 = vpop.f32.mrb[30].mxu0  ;;  %vm6249_vm0 = vcmp.ne.f32.partialorder %v3845_v55, %v3845_v55  ;;  %v1336_v13 = vsel %vm6250_vm15, 1.0, %v3324_v40 }
 0x2b0   :  { %v1042_v17 = vpop.f32.mrb[31].mxu0  ;;  %v3848_v56 = vadd.f32 %v2995_v7, %v3758_v34  ;;  %v1335_v14 = vsel %vm6249_vm0, 1.0, %v3324_v40 }
 0x2b1   :  { %v3855_v59 = vadd.f32 %v3758_v34, %v1042_v17  ;;  %v1376_v58 = vsel %vm6266_vm3, %v1335_v14, -inf }
 0x2b2   :  { %6362 = vst [vmem:[#allocation6_spill] sm:$0xff] %v3848_v56  ;;  %vm6248_vm1 = vcmp.ne.f32.partialorder %v3848_v56, %v3848_v56 }
 0x2b3   :  { %v3723_v18 = vpop.f32.mrb[32].mxu0  ;;  %vm6247_vm12 = vcmp.ne.f32.partialorder %v3855_v59, %v3855_v59  ;;  %v1338_v16 = vsel %vm6248_vm1, 1.0, %v3324_v40 }
 0x2b4   :  { %v3725_v19 = vpop.f32.mrb[33].mxu0  ;;  %v1337_v7 = vsel %vm6247_vm12, 1.0, %v3324_v40  ;;  %v3916_v17 = vadd.f32 %v3723_v18, %v3758_v34  ;;  %v1369_v18 = vmax.f32 %v1361_v8, %v1368_v11 }
 0x2b5   :  { %v3920_v41 = vadd.f32 %v3758_v34, %v3725_v19  ;;  %v1378_v19 = vsel %vm6266_vm3, %v1336_v13, -inf  ;;  %v1380_v61 = vsel %vm6266_vm3, %v1337_v7, -inf }
 0x2b6   :  { %6363 = vst [vmem:[#allocation7_spill] sm:$0xff] %v3916_v17  ;;  %vm6254_vm12 = vcmp.ne.f32.partialorder %v3916_v17, %v3916_v17  ;;  %v1377_v63 = vmax.f32 %v1369_v18, %v1376_v58  ;;  %v1381_v2 = vmax.f32 %v1373_v60, %v1380_v61 }
 0x2b7   :  { %v3727_v15 = vpop.f32.mrb[34].mxu0  ;;  %vm6253_vm1 = vcmp.ne.f32.partialorder %v3920_v41, %v3920_v41  ;;  %v1340_v4 = vsel %vm6254_vm12, 1.0, %v3324_v40 }
 0x2b8   :  { %v3729_v20 = vpop.f32.mrb[35].mxu0  ;;  %v3924_v46 = vadd.f32 %v3727_v15, %v3758_v34  ;;  %v1382_v15 = vsel %vm6266_vm3, %v1338_v16, -inf  ;;  %v1339_v3 = vsel %vm6253_vm1, 1.0, %v3324_v40  ;;  %v1386_v32 = vsel %vm6266_vm3, %v1340_v4, -inf }
 0x2b9   :  { %v3930_v50 = vadd.f32 %v3758_v34, %v3729_v20  ;;  %v1379_v20 = vmax.f32 %v1371_v52, %v1378_v19  ;;  %v1383_v1 = vmax.f32 %v3932_v57, %v1382_v15 }
 0x2ba   :  { %6364 = vst [vmem:[#allocation8_spill] sm:$0xff] %v3924_v46  ;;  %vm6252_vm0 = vcmp.ne.f32.partialorder %v3924_v46, %v3924_v46 }
 0x2bb   :  { %v3731_v21 = vpop.f32.mrb[36].mxu0  ;;  %6365 = vst [vmem:[#allocation9_spill] sm:$0xff] %v3930_v50  ;;  %vm6251_vm15 = vcmp.ne.f32.partialorder %v3930_v50, %v3930_v50  ;;  %v1342_v5 = vsel %vm6252_vm0, 1.0, %v3324_v40  ;;  %v1387_v57 = vmax.f32 %v1379_v20, %v1386_v32 }
 0x2bc   :  { %v3733_v22 = vpop.f32.mrb[37].mxu0  ;;  %v3961_v6 = vadd.f32 %v3731_v21, %v3758_v34  ;;  %v1341_v8 = vsel %vm6251_vm15, 1.0, %v3324_v40  ;;  %v1390_v12 = vsel %vm6266_vm3, %v1342_v5, -inf }
 0x2bd   :  { %v3969_v9 = vadd.f32 %v3758_v34, %v3733_v22  ;;  %v1391_v15 = vmax.f32 %v1383_v1, %v1390_v12 }
 0x2be   :  { %6366 = vst [vmem:[#allocation10_spill] sm:$0xff] %v3961_v6  ;;  %vm6262_vm15 = vcmp.ne.f32.partialorder %v3961_v6, %v3961_v6 }
 0x2bf   :  { %v3735_v23 = vpop.f32.mrb[38].mxu0  ;;  %6367 = vst [vmem:[#allocation11_spill] sm:$0xff] %v3969_v9  ;;  %vm1311_vm0 = vcmp.ne.f32.partialorder %v3969_v9, %v3969_v9 }
 0x2c0   :  { %v3737_v24 = vpop.f32.mrb[39].mxu0  ;;  %v3973_v10 = vadd.f32 %v3735_v23, %v3758_v34 }
 0x2c1   :  { %v3977_v0 = vadd.f32 %v3758_v34, %v3737_v24 }
 0x2c2   :  { %6368 = vst [vmem:[#allocation12_spill] sm:$0xff] %v3973_v10  ;;  %vm1314_vm1 = vcmp.ne.f32.partialorder %v3973_v10, %v3973_v10 }
 0x2c3   :  { %v3739_v25 = vpop.f32.mrb[40].mxu0  ;;  %6369 = vst [vmem:[#allocation13_spill] sm:$0xff] %v3977_v0  ;;  %vm1313_vm12 = vcmp.ne.f32.partialorder %v3977_v0, %v3977_v0 }
 0x2c4   :  { %v3741_v26 = vpop.f32.mrb[41].mxu0  ;;  %v3981_v21 = vadd.f32 %v3739_v25, %v3758_v34 }
 0x2c5   :  { %v3985_v11 = vadd.f32 %v3758_v34, %v3741_v26 }
 0x2c6   :  { %6370 = vst [vmem:[#allocation14_spill] sm:$0xff] %v3981_v21  ;;  %vm1316_vm14 = vcmp.ne.f32.partialorder %v3981_v21, %v3981_v21 }
 0x2c7   :  { %v3743_v27 = vpop.f32.mrb[42].mxu0  ;;  %vm1315_vm13 = vcmp.ne.f32.partialorder %v3985_v11, %v3985_v11  ;;  %v1348_v14 = vsel %vm1316_vm14, 1.0, %v3324_v40 }
 0x2c8   :  { %v3745_v28 = vpop.f32.mrb[43].mxu0  ;;  %v3989_v22 = vadd.f32 %v3743_v27, %v3758_v34  ;;  %v1384_v27 = vsel %vm6266_vm3, %v1339_v3, -inf  ;;  %v1347_v13 = vsel %vm1315_vm13, 1.0, %v3324_v40 }
 0x2c9   :  { %v3993_v23 = vadd.f32 %v3758_v34, %v3745_v28  ;;  %v1385_v52 = vmax.f32 %v1377_v63, %v1384_v27  ;;  %v1400_v63 = vsel %vm6266_vm3, %v1347_v13, -inf }
 0x2ca   :  { %6371 = vst [vmem:[#allocation15_spill] sm:$0xff] %v3989_v22  ;;  %vm1318_vm11 = vcmp.ne.f32.partialorder %v3989_v22, %v3989_v22 }
 0x2cb   :  { %v3747_v29 = vpop.f32.mrb[44].mxu0  ;;  %6372 = vst [vmem:[#allocation16_spill] sm:$0xff] %v3993_v23  ;;  %vm1317_vm10 = vcmp.ne.f32.partialorder %v3993_v23, %v3993_v23  ;;  %v1350_v7 = vsel %vm1318_vm11, 1.0, %v3324_v40 }
 0x2cc   :  { %v3749_v30 = vpop.f32.mrb[45].mxu0  ;;  %v3998_v24 = vadd.f32 %v3747_v29, %v3758_v34  ;;  %v1388_v29 = vsel %vm6266_vm3, %v1341_v8, -inf  ;;  %v1349_v16 = vsel %vm1317_vm10, 1.0, %v3324_v40  ;;  %v1406_v1 = vsel %vm6266_vm3, %v1350_v7, -inf }
 0x2cd   :  { %v4002_v25 = vadd.f32 %v3758_v34, %v3749_v30  ;;  %v1344_v30 = vsel %vm6262_vm15, 1.0, %v3324_v40  ;;  %v1389_v19 = vmax.f32 %v1381_v2, %v1388_v29  ;;  %v1404_v20 = vsel %vm6266_vm3, %v1349_v16, -inf }
 0x2ce   :  { %6373 = vst [vmem:[#allocation17_spill] sm:$0xff] %v3998_v24  ;;  %vm6268_vm7 = vcmp.ne.f32.partialorder %v3998_v24, %v3998_v24  ;;  %v1394_v60 = vsel %vm6266_vm3, %v1344_v30, -inf  ;;  %v1430_v7 = vsel %vm1292_vm2, 0.001, %v3761_v35 }
 0x2cf   :  { %v3751_v31 = vpop.f32.mrb[46].mxu0  ;;  %6374 = vst [vmem:[#allocation18_spill] sm:$0xff] %v4002_v25  ;;  %vm1319_vm8 = vcmp.ne.f32.partialorder %v4002_v25, %v4002_v25  ;;  %v1352_v49 = vsel %vm6268_vm7, 1.0, %v3324_v40  ;;  %v1395_v3 = vmax.f32 %v1387_v57, %v1394_v60  ;;  %v1133_v60 = vmax.f32 %v3789_v42, -20.0 }
 0x2d0   :  { %v3753_v33 = vpop.f32.mrb[47].mxu0  ;;  %v4014_v28 = vadd.f32 %v3751_v31, %v3758_v34  ;;  %v1343_v31 = vsel %vm1311_vm0, 1.0, %v3324_v40  ;;  %v1351_v47 = vsel %vm1319_vm8, 1.0, %v3324_v40  ;;  %vm6384_vm7 = vcmp.ne.f32.partialorder %v3796_v43, %v3796_v43 }
 0x2d1   :  { %v4006_v26 = vadd.f32 %v3758_v34, %v3753_v33  ;;  %v1346_v33 = vsel %vm1314_vm1, 1.0, %v3324_v40  ;;  %v1345_v34 = vsel %vm1313_vm12, 1.0, %v3324_v40  ;;  %v1392_v58 = vsel %vm6266_vm3, %v1343_v31, -inf }
 0x2d2   :  { %6376 = vst [vmem:[#allocation20_spill] sm:$0xff] %v4014_v28  ;;  %vm6265_vm15 = vcmp.ne.f32.partialorder %v4014_v28, %v4014_v28  ;;  %v1393_v61 = vmax.f32 %v1385_v52, %v1392_v58  ;;  %v1396_v4 = vsel %vm6266_vm3, %v1345_v34, -inf  ;;  %v1398_v8 = vsel %vm6266_vm3, %v1346_v33, -inf }
 0x2d3   :  { %6375 = vst [vmem:[#allocation19_spill] sm:$0xff] %v4006_v26  ;;  %vm6267_vm6 = vcmp.ne.f32.partialorder %v4006_v26, %v4006_v26  ;;  %v1354_v18 = vsel %vm6265_vm15, 1.0, %v3324_v40  ;;  %v1397_v5 = vmax.f32 %v1389_v19, %v1396_v4  ;;  %v1399_v27 = vmax.f32 %v1391_v15, %v1398_v8 }
 0x2d4   :  { %v1353_v51 = vsel %vm6267_vm6, 1.0, %v3324_v40  ;;  %v1401_v26 = vmax.f32 %v1393_v61, %v1400_v63  ;;  %v1402_v40 = vsel %vm6266_vm3, %v1348_v14, -inf  ;;  %v1408_v12 = vsel %vm6266_vm3, %v1351_v47, -inf }
 0x2d5   :  { %v1403_v2 = vmax.f32 %v1395_v3, %v1402_v40  ;;  %v1405_v32 = vmax.f32 %v1397_v5, %v1404_v20  ;;  %v1407_v29 = vmax.f32 %v1399_v27, %v1406_v1  ;;  %v1410_v31 = vsel %vm6266_vm3, %v1352_v49, -inf }
 0x2d6   :  { %v1409_v30 = vmax.f32 %v1401_v26, %v1408_v12  ;;  %v1412_v33 = vsel %vm6266_vm3, %v1353_v51, -inf  ;;  %v1414_v52 = vsel %vm6266_vm3, %v1354_v18, -inf  ;;  %v1132_v26 = vmax.f32 %v3761_v35, -20.0 }
 0x2d7   :  { %v1411_v34 = vmax.f32 %v1403_v2, %v1410_v31  ;;  %v1413_v13 = vmax.f32 %v1405_v32, %v1412_v33  ;;  %v1415_v57 = vmax.f32 %v1407_v29, %v1414_v52  ;;  %v1131_v47 = vmax.f32 %v3764_v36, -20.0 }
 0x2d8   :  { %vm1462_vm15 = vcmp.eq.f32.partialorder %v1430_v7, inf  ;;  %v1429_v49 = vsel %vm1291_vm4, 0.001, %v3764_v36  ;;  %v1164_v51 = vmin.f32 %v1132_v26, 2.0  ;;  %v1134_v18 = vmax.f32 %v3767_v37, -20.0 }
 0x2d9   :  { %v1416_v14 = vmax.f32 %v1409_v30, %v1411_v34  ;;  %v1417_v19 = vmax.f32 %v1413_v13, %v1415_v57  ;;  %v1494_v58 = vsel %vm1462_vm15, 3.4028235e+38, %v1430_v7  ;;  %v1163_v15 = vmin.f32 %v1131_v47, 2.0 }
 0x2da   :  { %v1432_v61 = vsel %vm1294_vm5, 0.001, %v3767_v37  ;;  %vm1461_vm2 = vcmp.eq.f32.partialorder %v1429_v49, inf  ;;  %v4115_v4 = vadd.f32 1e-06, %v1164_v51  ;;  %vm1526_vm3 = vcmp.eq.f32.partialorder %v1494_v58, -inf }
 0x2db   :  { %v1418_v16 = vmax.f32 %v1416_v14, %v1417_v19  ;;  %v1166_v3 = vmin.f32 %v1134_v18, 2.0  ;;  %vm1464_vm6 = vcmp.eq.f32.partialorder %v1432_v61, inf  ;;  %v4117_v5 = vadd.f32 1e-06, %v1163_v15 }
 0x2dc   :  { %6377 = vst [vmem:[#allocation21_spill] sm:$0xff] %v4115_v4  ;;  %v1493_v8 = vsel %vm1461_vm2, 3.4028235e+38, %v1429_v49  ;;  %v1431_v63 = vsel %vm1293_vm9, 0.001, %v3789_v42  ;;  %v1165_v27 = vmin.f32 %v1133_v60, 2.0  ;;  %vm6379_vm4 = vcmp.ne.f32.partialorder %v3772_v62, %v3772_v62 }
 0x2dd   :  { %1419 = vmax.xlane.f32.xlu0 %v1418_v16  ;;  %6378 = vst [vmem:[#allocation22_spill] sm:$0xff] %v4117_v5  ;;  %v1136_v40 = vmax.f32 %v3772_v62, -20.0  ;;  %v1434_v20 = vsel %vm6379_vm4, 0.001, %v3772_v62  ;;  %v4128_v2 = vsel %vm1526_vm3, -3.4028235e+38, %v1494_v58  ;;  %vm6381_vm2 = vcmp.ne.f32.partialorder %v3775_v38, %v3775_v38 }
 0x2de   :  { %v1496_v32 = vsel %vm1464_vm6, 3.4028235e+38, %v1432_v61  ;;  %v1135_v1 = vmax.f32 %v3775_v38, -20.0  ;;  %v4132_v12 = vmul.f32 1.442695, %v4115_v4  ;;  %vm1525_vm5 = vcmp.eq.f32.partialorder %v1493_v8, -inf }
 0x2df   :  { %v4134_v29 = vadd.f32 1e-06, %v1166_v3  ;;  %vm1463_vm9 = vcmp.eq.f32.partialorder %v1431_v63, inf  ;;  %v4137_v30 = vmul.f32 1.442695, %v4117_v5  ;;  %vm1466_vm15 = vcmp.eq.f32.partialorder %v1434_v20, inf }
 0x2e0   :  { %v1433_v31 = vsel %vm6381_vm2, 0.001, %v3775_v38  ;;  %v1138_v33 = vmax.f32 %v3778_v39, -20.0  ;;  %vm1528_vm3 = vcmp.eq.f32.partialorder %v1496_v32, -inf  ;;  %v4144_v34 = vadd.f32 1e-06, %v1165_v27 }
 0x2e1   :  { %6380 = vst [vmem:[#allocation23_spill] sm:$0xff] %v4134_v29  ;;  %v1168_v13 = vmin.f32 %v1136_v40, 2.0  ;;  %vm6383_vm6 = vcmp.ne.f32.partialorder %v3778_v39, %v3778_v39  ;;  %v4150_v57 = vsel %vm1525_vm5, -3.4028235e+38, %v1493_v8  ;;  %v1495_v14 = vsel %vm1463_vm9, 3.4028235e+38, %v1431_v63 }
 0x2e2   :  { %6382 = vst [vmem:[#allocation24_spill] sm:$0xff] %v4144_v34  ;;  %v1436_v52 = vsel %vm6383_vm6, 0.001, %v3778_v39  ;;  %v1167_v19 = vmin.f32 %v1135_v1, 2.0  ;;  %v4153_v16 = vmul.f32 1.442695, %v4134_v29  ;;  %3067 = vpow2.f32 %v4132_v12 }
 0x2e3   :  { %v1498_v7 = vsel %vm1466_vm15, 3.4028235e+38, %v1434_v20  ;;  %vm1465_vm4 = vcmp.eq.f32.partialorder %v1433_v31, inf  ;;  %v1137_v26 = vmax.f32 %v3796_v43, -20.0  ;;  %v4156_v47 = vsel %vm1528_vm3, -3.4028235e+38, %v1496_v32 }
 0x2e4   :  { %v1170_v49 = vmin.f32 %v1138_v33, 2.0  ;;  %vm1468_vm2 = vcmp.eq.f32.partialorder %v1436_v52, inf  ;;  %v1435_v51 = vsel %vm6384_vm7, 0.001, %v3796_v43  ;;  %v4163_v18 = vmul.f32 1.442695, %v4144_v34 }
 0x2e5   :  { %vm1527_vm5 = vcmp.eq.f32.partialorder %v1495_v14, -inf  ;;  %v4165_v58 = vadd.f32 1e-06, %v1168_v13  ;;  %vm1530_vm9 = vcmp.eq.f32.partialorder %v1498_v7, -inf  ;;  %v4167_v15 = vadd.f32 1e-06, %v1167_v19 }
 0x2e6   :  { %v1497_v61 = vsel %vm1465_vm4, 3.4028235e+38, %v1433_v31  ;;  %v1500_v60 = vsel %vm1468_vm2, 3.4028235e+38, %v1436_v52  ;;  %v1169_v3 = vmin.f32 %v1137_v26, 2.0  ;;  %vm1467_vm15 = vcmp.eq.f32.partialorder %v1435_v51, inf }
 0x2e7   :  { %6385 = vst [vmem:[#allocation25_spill] sm:$0xff] %v4165_v58  ;;  %6386 = vst [vmem:[#allocation26_spill] sm:$0xff] %v4167_v15  ;;  %v1140_v8 = vmax.f32 %v3799_v44, -20.0  ;;  %v4170_v63 = vsel %vm1527_vm5, -3.4028235e+38, %v1495_v14  ;;  %vm6388_vm7 = vcmp.ne.f32.partialorder %v3799_v44, %v3799_v44  ;;  %vm1529_vm3 = vcmp.eq.f32.partialorder %v1497_v61, -inf }
 0x2e8   :  { %v4172_v27 = vadd.f32 1e-06, %v1170_v49  ;;  %v1438_v40 = vsel %vm6388_vm7, 0.001, %v3799_v44  ;;  %v4179_v20 = vmul.f32 1.442695, %v4165_v58  ;;  %vm6390_vm2 = vcmp.ne.f32.partialorder %v3804_v45, %v3804_v45 }
 0x2e9   :  { %v4181_v32 = vsel %vm1530_vm9, -3.4028235e+38, %v1498_v7  ;;  %v1139_v1 = vmax.f32 %v3804_v45, -20.0  ;;  %v4185_v33 = vmul.f32 1.442695, %v4167_v15  ;;  %vm1532_vm6 = vcmp.eq.f32.partialorder %v1500_v60, -inf }
 0x2ea   :  { %6387 = vst [vmem:[#allocation27_spill] sm:$0xff] %v4172_v27  ;;  %v1499_v13 = vsel %vm1467_vm15, 3.4028235e+38, %v1435_v51  ;;  %v4187_v14 = vadd.f32 1e-06, %v1169_v3  ;;  %v1172_v19 = vmin.f32 %v1140_v8, 2.0  ;;  %vm6391_vm9 = vcmp.ne.f32.partialorder %v3812_v48, %v3812_v48 }
 0x2eb   :  { %vm1470_vm4 = vcmp.eq.f32.partialorder %v1438_v40, inf  ;;  %v1437_v7 = vsel %vm6390_vm2, 0.001, %v3804_v45  ;;  %v4193_v26 = vsel %vm1529_vm3, -3.4028235e+38, %v1497_v61  ;;  %v1142_v58 = vmax.f32 %v3812_v48, -20.0 }
 0x2ec   :  { %6389 = vst [vmem:[#allocation28_spill] sm:$0xff] %v4187_v14  ;;  %v4196_v49 = vmul.f32 1.442695, %v4172_v27  ;;  %v4199_v29 = vsel %vm1532_vm6, -3.4028235e+38, %v1500_v60  ;;  %vm1531_vm5 = vcmp.eq.f32.partialorder %v1499_v13, -inf  ;;  %vm6393_vm7 = vcmp.ne.f32.partialorder %v3837_v53, %v3837_v53 }
 0x2ed   :  { %v1171_v51 = vmin.f32 %v1139_v1, 2.0  ;;  %v1440_v3 = vsel %vm6391_vm9, 0.001, %v3812_v48  ;;  %v1502_v8 = vsel %vm1470_vm4, 3.4028235e+38, %v1438_v40  ;;  %vm1469_vm15 = vcmp.eq.f32.partialorder %v1437_v7, inf }
 0x2ee   :  { %v1141_v61 = vmax.f32 %v3837_v53, -20.0  ;;  %v4207_v27 = vmul.f32 1.442695, %v4187_v14  ;;  %v4209_v5 = vadd.f32 1e-06, %v1172_v19  ;;  %vm1472_vm3 = vcmp.eq.f32.partialorder %v1440_v3, inf }
 0x2ef   :  { %v1439_v60 = vsel %vm6393_vm7, 0.001, %v3837_v53  ;;  %v4215_v1 = vsel %vm1531_vm5, -3.4028235e+38, %v1499_v13  ;;  %vm1534_vm6 = vcmp.eq.f32.partialorder %v1502_v8, -inf  ;;  %v1144_v48 = vmax.f32 %v3842_v54, -20.0 }
 0x2f0   :  { %6392 = vst [vmem:[#allocation29_spill] sm:$0xff] %v4209_v5  ;;  %v4217_v40 = vadd.f32 1e-06, %v1171_v51  ;;  %v1501_v4 = vsel %vm1469_vm15, 3.4028235e+38, %v1437_v7  ;;  %v1173_v14 = vmin.f32 %v1141_v61, 2.0  ;;  %vm6395_vm2 = vcmp.ne.f32.partialorder %v3842_v54, %v3842_v54 }
 0x2f1   :  { %vm1471_vm4 = vcmp.eq.f32.partialorder %v1439_v60, inf  ;;  %v1442_v19 = vsel %vm6395_vm2, 0.001, %v3842_v54  ;;  %v4229_v13 = vsel %vm1534_vm6, -3.4028235e+38, %v1502_v8  ;;  %vm1533_vm5 = vcmp.eq.f32.partialorder %v1501_v4, -inf }
 0x2f2   :  { %6394 = vst [vmem:[#allocation30_spill] sm:$0xff] %v4217_v40  ;;  %v4234_v61 = vmul.f32 1.442695, %v4217_v40  ;;  %v1503_v53 = vsel %vm1471_vm4, 3.4028235e+38, %v1439_v60  ;;  %v1176_v54 = vmin.f32 %v1144_v48, 2.0  ;;  %vm6398_vm7 = vcmp.ne.f32.partialorder %v3845_v55, %v3845_v55 }
 0x2f3   :  { %vm1474_vm9 = vcmp.eq.f32.partialorder %v1442_v19, inf  ;;  %v4236_v12 = vadd.f32 1e-06, %v1173_v14  ;;  %v1146_v8 = vmax.f32 %v3848_v56, -20.0  ;;  %3069 = vpow2.f32 %v4137_v30 }
 0x2f4   :  { %vm1535_vm6 = vcmp.eq.f32.partialorder %v1503_v53, -inf  ;;  %v1506_v60 = vsel %vm1474_vm9, 3.4028235e+38, %v1442_v19  ;;  %3071 = vpow2.f32 %v4153_v16  ;;  %v4257_v30 = vadd.f32 1e-06, %v1176_v54 }
 0x2f5   :  { %6397 = vst [vmem:[#allocation32_spill] sm:$0xff] %v4236_v12  ;;  %v4266_v19 = vsel %vm1535_vm6, -3.4028235e+38, %v1503_v53  ;;  %vm1538_vm9 = vcmp.eq.f32.partialorder %v1506_v60, -inf  ;;  %v1148_v16 = vmax.f32 %v3916_v17, -20.0  ;;  %3073 = vpow2.f32 %v4163_v18 }
 0x2f6   :  { %6400 = vst [vmem:[#allocation33_spill] sm:$0xff] %v4257_v30  ;;  %v4279_v40 = vmul.f32 1.442695, %v4257_v30  ;;  %3075 = vpow2.f32 %v4179_v20 }
 0x2f7   :  { %v1180_v30 = vmin.f32 %v1148_v16, 2.0  ;;  %3077 = vpow2.f32 %v4185_v33 }
 0x2f8   :  { %3079 = vpow2.f32 %v4196_v49 }
 0x2f9   :  { %3081 = vpow2.f32 %v4207_v27  ;;  %v1152_v27 = vmax.f32 %v3961_v6, -20.0 }
 0x36a   :  { %v1420_v31 = vpop.xlane.xlu0 %1419 }
 0x36b   :  { %v1421_v52 = vrot.slane %v1420_v31, 4 }
 0x36d   :  { %v1422_v15 = vmax.f32 %v1420_v31, %v1421_v52  ;;  %v1174_v31 = vmin.f32 %v1142_v58, 2.0  ;;  %v4226_v58 = vmul.f32 1.442695, %v4209_v5 }
 0x36f   :  { %v1423_v34 = vrot.slane %v1422_v15, 2  ;;  %v4231_v7 = vadd.f32 1e-06, %v1174_v31  ;;  %3083 = vpow2.f32 %v4226_v58 }
 0x370   :  { %3085 = vpow2.f32 %v4234_v61  ;;  %v1452_v61 = vsel %vm1314_vm1, 0.001, %v3973_v10 }
 0x371   :  { %v1424_v52 = vmax.f32 %v1422_v15, %v1423_v34  ;;  %v1504_v34 = vsel %vm1472_vm3, 3.4028235e+38, %v1440_v3  ;;  %v1143_v15 = vmax.f32 %v3845_v55, -20.0  ;;  %6396 = vst [vmem:[#allocation31_spill] sm:$0xff] %v4231_v7  ;;  %v1441_v3 = vsel %vm6398_vm7, 0.001, %v3845_v55 }
 0x372   :  { %vm1536_vm15 = vcmp.eq.f32.partialorder %v1504_v34, -inf  ;;  %vm6399_vm3 = vcmp.ne.f32.partialorder %v3848_v56, %v3848_v56  ;;  %v4251_v14 = vmul.f32 1.442695, %v4231_v7  ;;  %vm1473_vm4 = vcmp.eq.f32.partialorder %v1441_v3, inf }
 0x373   :  { %v1425_v44 = vrot.slane %v1424_v52, 1  ;;  %v1175_v31 = vmin.f32 %v1143_v15, 2.0  ;;  %v1444_v48 = vsel %vm6399_vm3, 0.001, %v3848_v56  ;;  %v1178_v15 = vmin.f32 %v1146_v8, 2.0 }
 0x374   :  { %vm1476_vm2 = vcmp.eq.f32.partialorder %v1444_v48, inf  ;;  %v1505_v54 = vsel %vm1473_vm4, 3.4028235e+38, %v1441_v3  ;;  %v4283_v56 = vsel %vm1538_vm9, -3.4028235e+38, %v1506_v60  ;;  %vm6406_vm3 = vcmp.ne.f32.partialorder %v3920_v41, %v3920_v41 }
 0x375   :  { %v1426_v51 = vmax.f32 %v1424_v52, %v1425_v44  ;;  %v4244_v44 = vsel %vm1533_vm5, -3.4028235e+38, %v1501_v4  ;;  %v1145_v52 = vmax.f32 %v3855_v59, -20.0  ;;  %v4260_v4 = vmul.f32 1.442695, %v4236_v12  ;;  %v4276_v12 = vpop.eup %3067 }
 0x376   :  { %vm6401_vm5 = vcmp.ne.f32.partialorder %v3855_v59, %v3855_v59  ;;  %v4268_v5 = vadd.f32 1e-06, %v1175_v31  ;;  %6404 = vst [vmem:[#allocation35_spill] sm:$0xff] %v4276_v12  ;;  %v1508_v53 = vsel %vm1476_vm2, 3.4028235e+38, %v1444_v48  ;;  %v1147_v31 = vmax.f32 %v3920_v41, -20.0  ;;  %v4297_v60 = vpop.eup %3069 }
 0x377   :  { %3064 = vpush %v1426_v51  ;;  %v4255_v51 = vsel %vm1536_vm15, -3.4028235e+38, %v1504_v34  ;;  %v1443_v7 = vsel %vm6401_vm5, 0.001, %v3855_v59  ;;  %v1177_v34 = vmin.f32 %v1145_v52, 2.0  ;;  %vm6403_vm15 = vcmp.ne.f32.partialorder %v3916_v17, %v3916_v17  ;;  %6408 = vst [vmem:[#allocation38_spill] sm:$0xff] %v4297_v60 }
 0x378   :  { %6402 = vst [vmem:[#allocation34_spill] sm:$0xff] %v4268_v5  ;;  %v1446_v8 = vsel %vm6403_vm15, 0.001, %v3916_v17  ;;  %vm1475_vm7 = vcmp.eq.f32.partialorder %v1443_v7, inf  ;;  %v4285_v18 = vadd.f32 1e-06, %v1178_v15  ;;  %vm6409_vm9 = vcmp.ne.f32.partialorder %v3924_v46, %v3924_v46 }
 0x379   :  { %v1445_v3 = vsel %vm6406_vm3, 0.001, %v3920_v41  ;;  %v4292_v52 = vmul.f32 1.442695, %v4268_v5  ;;  %vm1537_vm6 = vcmp.eq.f32.partialorder %v1505_v54, -inf  ;;  %vm1478_vm4 = vcmp.eq.f32.partialorder %v1446_v8, inf }
 0x37a   :  { %6405 = vst [vmem:[#allocation36_spill] sm:$0xff] %v4285_v18  ;;  %vm1540_vm2 = vcmp.eq.f32.partialorder %v1508_v53, -inf  ;;  %v4295_v48 = vadd.f32 1e-06, %v1177_v34  ;;  %v1507_v20 = vsel %vm1475_vm7, 3.4028235e+38, %v1443_v7  ;;  %v4310_v7 = vpop.eup %3071  ;;  %3087 = vpow2.f32 %v4251_v14 }
 0x37b   :  { %v1179_v15 = vmin.f32 %v1147_v31, 2.0  ;;  %vm1477_vm5 = vcmp.eq.f32.partialorder %v1445_v3, inf  ;;  %v1150_v12 = vmax.f32 %v3924_v46, -20.0  ;;  %v1448_v5 = vsel %vm6409_vm9, 0.001, %v3924_v46  ;;  %6410 = vst [vmem:[#allocation39_spill] sm:$0xff] %v4310_v7 }
 0x37c   :  { %6407 = vst [vmem:[#allocation37_spill] sm:$0xff] %v4295_v48  ;;  %v4305_v16 = vsel %vm1537_vm6, -3.4028235e+38, %v1505_v54  ;;  %v4308_v33 = vmul.f32 1.442695, %v4285_v18  ;;  %vm1539_vm15 = vcmp.eq.f32.partialorder %v1507_v20, -inf  ;;  %vm6413_vm6 = vcmp.ne.f32.partialorder %v3930_v50, %v3930_v50 }
 0x37d   :  { %v1510_v34 = vsel %vm1478_vm4, 3.4028235e+38, %v1446_v8  ;;  %v4312_v60 = vsel %vm1540_vm2, -3.4028235e+38, %v1508_v53  ;;  %v4314_v31 = vadd.f32 1e-06, %v1180_v30  ;;  %v4327_v30 = vpop.eup %3073  ;;  %vm6415_vm4 = vcmp.ne.f32.partialorder %v3961_v6, %v3961_v6 }
 0x37e   :  { %v1149_v17 = vmax.f32 %v3930_v50, -20.0  ;;  %v4319_v46 = vmul.f32 1.442695, %v4295_v48  ;;  %v1509_v49 = vsel %vm1477_vm5, 3.4028235e+38, %v1445_v3  ;;  %vm1480_vm7 = vcmp.eq.f32.partialorder %v1448_v5, inf  ;;  %v4341_v7 = vpop.eup %3075 }
 0x37f   :  { %6411 = vst [vmem:[#allocation40_spill] sm:$0xff] %v4314_v31  ;;  %vm1542_vm3 = vcmp.eq.f32.partialorder %v1510_v34, -inf  ;;  %v4321_v54 = vadd.f32 1e-06, %v1179_v15  ;;  %v1182_v8 = vmin.f32 %v1150_v12, 2.0  ;;  %6414 = vst [vmem:[#allocation42_spill] sm:$0xff] %v4327_v30  ;;  %3089 = vpow2.f32 %v4260_v4 }
 0x380   :  { %v1447_v53 = vsel %vm6413_vm6, 0.001, %v3930_v50  ;;  %v4330_v18 = vsel %vm1539_vm15, -3.4028235e+38, %v1507_v20  ;;  %v1450_v3 = vsel %vm6415_vm4, 0.001, %v3961_v6  ;;  %3091 = vpow2.f32 %v4279_v40 }
 0x381   :  { %6412 = vst [vmem:[#allocation41_spill] sm:$0xff] %v4321_v54  ;;  %vm1541_vm2 = vcmp.eq.f32.partialorder %v1509_v49, -inf  ;;  %v1512_v12 = vsel %vm1480_vm7, 3.4028235e+38, %v1448_v5  ;;  %v1181_v15 = vmin.f32 %v1149_v17, 2.0  ;;  %6416 = vst [vmem:[#allocation43_spill] sm:$0xff] %v4341_v7  ;;  %v4351_v17 = vpop.eup %3077  ;;  %3093 = vpow2.f32 %v4292_v52 }
 0x382   :  { %v1449_v48 = vsel %vm1311_vm0, 0.001, %v3969_v9  ;;  %v1261_v58 = vmul.f32 1.442695, %v4314_v31  ;;  %v4344_v20 = vsel %vm1542_vm3, -3.4028235e+38, %v1510_v34  ;;  %3095 = vpow2.f32 %v4308_v33 }
 0x383   :  { %6417 = vst [vmem:[#allocation44_spill] sm:$0xff] %v4344_v20  ;;  %vm1479_vm5 = vcmp.eq.f32.partialorder %v1447_v53, inf  ;;  %v1151_v30 = vmax.f32 %v3969_v9, -20.0  ;;  %v1259_v6 = vmul.f32 1.442695, %v4321_v54  ;;  %vm1482_vm9 = vcmp.eq.f32.partialorder %v1450_v3, inf }
 0x384   :  { %v4349_v5 = vadd.f32 1e-06, %v1182_v8  ;;  %6419 = vst [vmem:[#allocation46_spill] sm:$0xff] %v4351_v17  ;;  %v4353_v50 = vsel %vm1541_vm2, -3.4028235e+38, %v1509_v49  ;;  %vm1544_vm0 = vcmp.eq.f32.partialorder %v1512_v12, -inf  ;;  %v4362_v8 = vpop.eup %3079  ;;  %3097 = vpow2.f32 %v4319_v46 }
 0x385   :  { %v1184_v7 = vmin.f32 %v1152_v27, 2.0  ;;  %vm1481_vm15 = vcmp.eq.f32.partialorder %v1449_v48, inf  ;;  %v4356_v34 = vadd.f32 1e-06, %v1181_v15  ;;  %v1511_v31 = vsel %vm1479_vm5, 3.4028235e+38, %v1447_v53  ;;  %v4372_v17 = vpop.eup %3081 }
 0x386   :  { %6418 = vst [vmem:[#allocation45_spill] sm:$0xff] %v4349_v5  ;;  %6421 = vst [vmem:[#allocation48_spill] sm:$0xff] %v4362_v8  ;;  %v1514_v54 = vsel %vm1482_vm9, 3.4028235e+38, %v1450_v3  ;;  %v1183_v9 = vmin.f32 %v1151_v30, 2.0  ;;  %v1154_v49 = vmax.f32 %v3973_v10, -20.0  ;;  %v4381_v10 = vpop.eup %3083  ;;  %3099 = vpow2.f32 %v1261_v58 }
 0x387   :  { %6420 = vst [vmem:[#allocation47_spill] sm:$0xff] %v4356_v34  ;;  %v1451_v27 = vsel %vm1313_vm12, 0.001, %v3977_v0  ;;  %v1265_v14 = vmul.f32 1.442695, %v4349_v5  ;;  %v1153_v15 = vmax.f32 %v3977_v0, -20.0  ;;  %3101 = vpow2.f32 %v1259_v6 }
 0x388   :  { %v1513_v53 = vsel %vm1481_vm15, 3.4028235e+38, %v1449_v48  ;;  %6422 = vst [vmem:[#allocation49_spill] sm:$0xff] %v4372_v17  ;;  %v4375_v8 = vsel %vm1544_vm0, -3.4028235e+38, %v1512_v12  ;;  %vm1543_vm1 = vcmp.eq.f32.partialorder %v1511_v31, -inf  ;;  %vm6438_vm0 = vcmp.ne.f32.partialorder %v3998_v24, %v3998_v24 }
 0x389   :  { %6423 = vst [vmem:[#allocation50_spill] sm:$0xff] %v4375_v8  ;;  %v4377_v30 = vadd.f32 1e-06, %v1184_v7  ;;  %vm1484_vm7 = vcmp.eq.f32.partialorder %v1452_v61, inf  ;;  %v1263_v3 = vmul.f32 1.442695, %v4356_v34  ;;  %v4395_v8 = vpop.eup %3085  ;;  %3103 = vpow2.f32 %v1265_v14 }
 0x38a   :  { %vm1546_vm3 = vcmp.eq.f32.partialorder %v1514_v54, -inf  ;;  %vm1483_vm12 = vcmp.eq.f32.partialorder %v1451_v27, inf  ;;  %v1156_v4 = vmax.f32 %v3981_v21, -20.0  ;;  %6425 = vst [vmem:[#allocation52_spill] sm:$0xff] %v4381_v10  ;;  %v4383_v48 = vadd.f32 1e-06, %v1183_v9 }
 0x38b   :  { %6424 = vst [vmem:[#allocation51_spill] sm:$0xff] %v4377_v30  ;;  %vm1545_vm6 = vcmp.eq.f32.partialorder %v1513_v53, -inf  ;;  %v1186_v5 = vmin.f32 %v1154_v49, 2.0  ;;  %v1454_v12 = vsel %vm1316_vm14, 0.001, %v3981_v21  ;;  %v1185_v17 = vmin.f32 %v1153_v15, 2.0 }
 0x38c   :  { %6426 = vst [vmem:[#allocation53_spill] sm:$0xff] %v4383_v48  ;;  %v4390_v7 = vsel %vm1543_vm1, -3.4028235e+38, %v1511_v31  ;;  %v1516_v34 = vsel %vm1484_vm7, 3.4028235e+38, %v1452_v61  ;;  %v1155_v9 = vmax.f32 %v3985_v11, -20.0  ;;  %v4408_v31 = vpop.eup %3087  ;;  %3105 = vpow2.f32 %v1263_v3 }
 0x38d   :  { %v1269_v0 = vmul.f32 1.442695, %v4377_v30  ;;  %v1515_v10 = vsel %vm1483_vm12, 3.4028235e+38, %v1451_v27  ;;  %6427 = vst [vmem:[#allocation54_spill] sm:$0xff] %v4395_v8  ;;  %v1188_v21 = vmin.f32 %v1156_v4, 2.0  ;;  %vm6443_vm1 = vcmp.ne.f32.partialorder %v4014_v28, %v4014_v28 }
 0x38e   :  { %v4398_v49 = vsel %vm1546_vm3, -3.4028235e+38, %v1514_v54  ;;  %v4400_v20 = vsel %vm1545_vm6, -3.4028235e+38, %v1513_v53  ;;  %vm1486_vm14 = vcmp.eq.f32.partialorder %v1454_v12, inf  ;;  %vm1548_vm4 = vcmp.eq.f32.partialorder %v1516_v34, -inf  ;;  %v4421_v53 = vpop.eup %3089 }
 0x38f   :  { %v4404_v40 = vmul.f32 1.442695, %v4383_v48  ;;  %v4406_v52 = vadd.f32 1e-06, %v1186_v5  ;;  %6429 = vst [vmem:[#allocation56_spill] sm:$0xff] %v4408_v31  ;;  %vm1547_vm2 = vcmp.eq.f32.partialorder %v1515_v10, -inf  ;;  %v4440_v14 = vpop.eup %3091  ;;  %3107 = vpow2.f32 %v1269_v0 }
 0x390   :  { %v4411_v61 = vadd.f32 1e-06, %v1185_v17  ;;  %v1453_v54 = vsel %vm1315_vm13, 0.001, %v3985_v11  ;;  %v1518_v33 = vsel %vm1486_vm14, 3.4028235e+38, %v1454_v12  ;;  %v4444_v48 = vpop.eup %3093 }
 0x391   :  { %6428 = vst [vmem:[#allocation55_spill] sm:$0xff] %v4406_v52  ;;  %v1187_v27 = vmin.f32 %v1155_v9, 2.0  ;;  %v1456_v5 = vsel %vm1318_vm11, 0.001, %v3989_v22  ;;  %6431 = vst [vmem:[#allocation58_spill] sm:$0xff] %v4421_v53  ;;  %v1158_v15 = vmax.f32 %v3989_v22, -20.0  ;;  %3109 = vpow2.f32 %v4404_v40 }
 0x392   :  { %6430 = vst [vmem:[#allocation57_spill] sm:$0xff] %v4411_v61  ;;  %v4423_v46 = vsel %vm1548_vm4, -3.4028235e+38, %v1516_v34  ;;  %v4425_v17 = vadd.f32 1e-06, %v1188_v21  ;;  %vm1485_vm13 = vcmp.eq.f32.partialorder %v1453_v54, inf }
 0x393   :  { %v1273_v4 = vmul.f32 1.442695, %v4406_v52  ;;  %v4429_v58 = vsel %vm1547_vm2, -3.4028235e+38, %v1515_v10  ;;  %v1271_v12 = vmul.f32 1.442695, %v4411_v61 }
 0x394   :  { %6432 = vst [vmem:[#allocation59_spill] sm:$0xff] %v4425_v17  ;;  %vm1550_vm5 = vcmp.eq.f32.partialorder %v1518_v33, -inf  ;;  %vm1488_vm9 = vcmp.eq.f32.partialorder %v1456_v5, inf  ;;  %v1157_v9 = vmax.f32 %v3993_v23, -20.0  ;;  %v4433_v6 = vadd.f32 1e-06, %v1187_v27 }
 0x395   :  { %v1455_v21 = vsel %vm1317_vm10, 0.001, %v3993_v23  ;;  %v1160_v34 = vmax.f32 %v3998_v24, -20.0  ;;  %6434 = vst [vmem:[#allocation61_spill] sm:$0xff] %v4440_v14  ;;  %v1277_v10 = vmul.f32 1.442695, %v4425_v17  ;;  %3111 = vpow2.f32 %v1273_v4 }
 0x396   :  { %6433 = vst [vmem:[#allocation60_spill] sm:$0xff] %v4433_v6  ;;  %v1517_v52 = vsel %vm1485_vm13, 3.4028235e+38, %v1453_v54  ;;  %v1190_v61 = vmin.f32 %v1158_v15, 2.0  ;;  %v1159_v30 = vmax.f32 %v4002_v25, -20.0  ;;  %6435 = vst [vmem:[#allocation62_spill] sm:$0xff] %v4444_v48  ;;  %v4454_v15 = vpop.eup %3095  ;;  %3113 = vpow2.f32 %v1271_v12 }
 0x397   :  { %v4446_v3 = vsel %vm1550_vm5, -3.4028235e+38, %v1518_v33  ;;  %v1520_v27 = vsel %vm1488_vm9, 3.4028235e+38, %v1456_v5  ;;  %v1162_v31 = vmax.f32 %v4014_v28, -20.0  ;;  %v1189_v53 = vmin.f32 %v1157_v9, 2.0  ;;  %v4461_v5 = vpop.eup %3097 }
 0x398   :  { %vm1487_vm10 = vcmp.eq.f32.partialorder %v1455_v21, inf  ;;  %v6436_v8 = vld [vmem:[#allocation19_spill] sm:$0xff]  ;;  %v1457_v54 = vsel %vm1319_vm8, 0.001, %v4002_v25  ;;  %6437 = vst [vmem:[#allocation63_spill] sm:$0xff] %v4454_v15  ;;  %vm1549_vm11 = vcmp.eq.f32.partialorder %v1517_v52, -inf  ;;  %v4469_v48 = vpop.eup %3099  ;;  %3115 = vpow2.f32 %v1277_v10 }
 0x399   :  { %v1161_v22 = vmax.f32 %v6436_v8, -20.0  ;;  %v1275_v17 = vmul.f32 1.442695, %v4433_v6  ;;  %v1192_v0 = vmin.f32 %v1160_v34, 2.0  ;;  %v1458_v33 = vsel %vm6438_vm0, 0.001, %v3998_v24 }
 0x39a   :  { %6439 = vst [vmem:[#allocation64_spill] sm:$0xff] %v4461_v5  ;;  %v4463_v9 = vadd.f32 1e-06, %v1190_v61  ;;  %vm1552_vm15 = vcmp.eq.f32.partialorder %v1520_v27, -inf  ;;  %v1191_v14 = vmin.f32 %v1159_v30, 2.0  ;;  %vm6441_vm8 = vcmp.ne.f32.partialorder %v6436_v8, %v6436_v8  ;;  %6442 = vst [vmem:[#allocation66_spill] sm:$0xff] %v4469_v48  ;;  %v4475_v5 = vpop.eup %3101 }
 0x39b   :  { %v1459_v15 = vsel %vm6441_vm8, 0.001, %v6436_v8  ;;  %v1519_v6 = vsel %vm1487_vm10, 3.4028235e+38, %v1455_v21  ;;  %v1194_v34 = vmin.f32 %v1162_v31, 2.0  ;;  %vm1489_vm7 = vcmp.eq.f32.partialorder %v1457_v54, inf  ;;  %v4481_v23 = vpop.eup %3103 }
 0x39c   :  { %6440 = vst [vmem:[#allocation65_spill] sm:$0xff] %v4463_v9  ;;  %v1460_v24 = vsel %vm6443_vm1, 0.001, %v4014_v28  ;;  %6444 = vst [vmem:[#allocation67_spill] sm:$0xff] %v4475_v5  ;;  %v4477_v61 = vsel %vm1549_vm11, -3.4028235e+38, %v1517_v52  ;;  %v4490_v52 = vpop.eup %3105  ;;  %3117 = vpow2.f32 %v1275_v17 }
 0x39d   :  { %v4479_v30 = vadd.f32 1e-06, %v1189_v53  ;;  %v1193_v25 = vmin.f32 %v1161_v22, 2.0  ;;  %vm1490_vm3 = vcmp.eq.f32.partialorder %v1458_v33, inf  ;;  %6446 = vst [vmem:[#allocation69_spill] sm:$0xff] %v4481_v23  ;;  %vm1491_vm12 = vcmp.eq.f32.partialorder %v1459_v15, inf  ;;  %v4498_v28 = vpop.eup %3107 }
 0x39e   :  { %v4484_v21 = vsel %vm1552_vm15, -3.4028235e+38, %v1520_v27  ;;  %v4486_v31 = vadd.f32 1e-06, %v1192_v0  ;;  %vm1551_vm6 = vcmp.eq.f32.partialorder %v1519_v6, -inf  ;;  %vm1492_vm14 = vcmp.eq.f32.partialorder %v1460_v24, inf }
 0x39f   :  { %6445 = vst [vmem:[#allocation68_spill] sm:$0xff] %v4479_v30  ;;  %v4488_v48 = vadd.f32 1e-06, %v1191_v14  ;;  %v1521_v5 = vsel %vm1489_vm7, 3.4028235e+38, %v1457_v54  ;;  %6449 = vst [vmem:[#allocation72_spill] sm:$0xff] %v4490_v52 }
 0x3a0   :  { %6447 = vst [vmem:[#allocation70_spill] sm:$0xff] %v4486_v31  ;;  %v1281_v22 = vmul.f32 1.442695, %v4463_v9  ;;  %v4493_v53 = vadd.f32 1e-06, %v1194_v34  ;;  %6452 = vst [vmem:[#allocation75_spill] sm:$0xff] %v4498_v28 }
 0x3a1   :  { %6448 = vst [vmem:[#allocation71_spill] sm:$0xff] %v4488_v48  ;;  %v1522_v23 = vsel %vm1490_vm3, 3.4028235e+38, %v1458_v33  ;;  %v1279_v40 = vmul.f32 1.442695, %v4479_v30  ;;  %vm1553_vm4 = vcmp.eq.f32.partialorder %v1521_v5, -inf }
 0x3a2   :  { %6450 = vst [vmem:[#allocation73_spill] sm:$0xff] %v4493_v53  ;;  %v4496_v27 = vadd.f32 1e-06, %v1193_v25  ;;  %v1523_v0 = vsel %vm1491_vm12, 3.4028235e+38, %v1459_v15  ;;  %vm1554_vm2 = vcmp.eq.f32.partialorder %v1522_v23, -inf  ;;  %3119 = vpow2.f32 %v1281_v22 }
 0x3a3   :  { %v1285_v14 = vmul.f32 1.442695, %v4486_v31  ;;  %v1524_v54 = vsel %vm1492_vm14, 3.4028235e+38, %v1460_v24  ;;  %v4502_v4 = vsel %vm1551_vm6, -3.4028235e+38, %v1519_v6  ;;  %3121 = vpow2.f32 %v1279_v40 }
 0x3a4   :  { %6451 = vst [vmem:[#allocation74_spill] sm:$0xff] %v4496_v27  ;;  %v1283_v34 = vmul.f32 1.442695, %v4488_v48  ;;  %v4508_v25 = vld [vmem:[%s6244_s7 + $0x8] sm:$0xff]  ;;  %v4511_v12 = vmul.f32 1.442695, %v4493_v53 }
 0x3a5   :  { %6453 = vst [vmem:[#allocation76_spill] sm:$0xff] %v4508_v25  ;;  %vm1555_vm13 = vcmp.eq.f32.partialorder %v1523_v0, -inf  ;;  %v2105_v24 = vmul.f32 %v4508_v25, %v4508_v25  ;;  %v4516_v17 = vmul.f32 1.442695, %v4496_v27  ;;  %vm1556_vm5 = vcmp.eq.f32.partialorder %v1524_v54, -inf  ;;  %v4527_v15 = vld [vmem:[%s6244_s7] sm:$0xff] }
 0x3a6   :  { %6454 = vst [vmem:[#allocation77_spill] sm:$0xff] %v4511_v12  ;;  %v4518_v6 = vsel %vm1553_vm4, -3.4028235e+38, %v1521_v5  ;;  %3123 = vpow2.f32 %v1285_v14  ;;  %v4520_v10 = vsel %vm1554_vm2, -3.4028235e+38, %v1522_v23  ;;  %6458 = vst [vmem:[#allocation81_spill] sm:$0xff] %v4527_v15  ;;  %v2104_v22 = vmul.f32 %v4527_v15, %v4527_v15 }
 0x3a7   :  { %6455 = vst [vmem:[#allocation78_spill] sm:$0xff] %v4516_v17  ;;  %6456 = vst [vmem:[#allocation79_spill] sm:$0xff] %v4518_v6  ;;  %3125 = vpow2.f32 %v1283_v34  ;;  %v4529_v33 = vsel %vm1555_vm13, -3.4028235e+38, %v1523_v0  ;;  %v4536_v5 = vld [vmem:[%s6244_s7 + $0x10] sm:$0xff]  ;;  %v4541_v23 = vld [vmem:[%s6244_s7 + $0x18] sm:$0xff]  ;;  %v4548_v0 = vpop.eup %3109 }
 0x3a8   :  { %s3065_s6 = spop %3064  ;;  %6457 = vst [vmem:[#allocation80_spill] sm:$0xff] %v4520_v10  ;;  %6459 = vst [vmem:[#allocation82_spill] sm:$0xff] %v4529_v33  ;;  %v4546_v40 = vld [vmem:[%s6244_s7 + $0x20] sm:$0xff]  ;;  %v4550_v14 = vsel %vm1556_vm5, -3.4028235e+38, %v1524_v54  ;;  %v4552_v34 = vmul.f32 -0.5, %v2105_v24  ;;  %v2106_v53 = vmul.f32 %v4536_v5, %v4536_v5  ;;  %v2107_v27 = vmul.f32 %v4541_v23, %v4541_v23  ;;  %v4595_v17 = vpop.eup %3111 }
 0x3a9   :  { %p1428_p0 = scmp.gt.f32.partialorder %s3065_s6, 0.0  ;;  %6460 = vst [vmem:[#allocation83_spill] sm:$0xff] %v4536_v5  ;;  %6461 = vst [vmem:[#allocation84_spill] sm:$0xff] %v4541_v23  ;;  %v4561_v31 = vld [vmem:[%s6244_s7 + $0x28] sm:$0xff]  ;;  %v4566_v48 = vld [vmem:[%s6244_s7 + $0x30] sm:$0xff]  ;;  %v2108_v9 = vmul.f32 %v4546_v40, %v4546_v40 }
 0x3aa   :  { %6462 = vst [vmem:[#allocation85_spill] sm:$0xff] %v4546_v40  ;;  %6463 = vst [vmem:[#allocation86_spill] sm:$0xff] %v4548_v0  ;;  %v4571_v54 = vld [vmem:[%s6244_s7 + $0x38] sm:$0xff]  ;;  %v2109_v30 = vmul.f32 %v4561_v31, %v4561_v31  ;;  %v2110_v28 = vmul.f32 %v4566_v48, %v4566_v48  ;;  %v4583_v0 = vld [vmem:[%s6244_s7 + $0x40] sm:$0xff]  ;;  %v4650_v33 = vmul.f32 -0.5, %v2107_v27 }
 0x3ab   :  { %s4522_s18 = scalar_select %p1428_p0, 1, 0  ;;  %6464 = vst [vmem:[#allocation87_spill] sm:$0xff] %v4550_v14  ;;  %6465 = vst [vmem:[#allocation88_spill] sm:$0xff] %v4552_v34  ;;  %v4588_v52 = vld [vmem:[%s6244_s7 + $0x48] sm:$0xff]  ;;  %v4593_v40 = vld [vmem:[%s6244_s7 + $0x50] sm:$0xff] }
 0x3ac   :  { %6466 = vst [vmem:[#allocation89_spill] sm:$0xff] %v4561_v31  ;;  %6467 = vst [vmem:[#allocation90_spill] sm:$0xff] %v4566_v48  ;;  %v2111_v48 = vmul.f32 %v4571_v54, %v4571_v54  ;;  %v2112_v31 = vmul.f32 %v4583_v0, %v4583_v0  ;;  %v2113_v12 = vmul.f32 %v4588_v52, %v4588_v52  ;;  %v4608_v5 = vld [vmem:[%s6244_s7 + $0x58] sm:$0xff]  ;;  %v4633_v25 = vld [vmem:[%s6244_s7 + $0x70] sm:$0xff]  ;;  %v4652_v8 = vmul.f32 -0.5, %v2108_v9 }
 0x3ad   :  { %6468 = vst [vmem:[#allocation91_spill] sm:$0xff] %v4571_v54  ;;  %v1590_v24 = vstv %s4522_s18  ;;  %6469 = vst [vmem:[#allocation92_spill] sm:$0xff] %v4583_v0  ;;  %v2114_v23 = vmul.f32 %v4593_v40, %v4593_v40  ;;  %v4618_v0 = vld [vmem:[%s6244_s7 + $0x68] sm:$0xff]  ;;  %v4620_v54 = vpop.eup %3113  ;;  %v4654_v10 = vmul.f32 -0.5, %v2109_v30  ;;  %v4656_v6 = vmul.f32 -0.5, %v2110_v28 }
 0x3ae   :  { %6470 = vst [vmem:[#allocation93_spill] sm:$0xff] %v4588_v52  ;;  %6471 = vst [vmem:[#allocation94_spill] sm:$0xff] %v4593_v40  ;;  %v4622_v52 = vmul.f32 -0.5, %v2104_v22  ;;  %v2115_v40 = vmul.f32 %v4608_v5, %v4608_v5  ;;  %v2117_v15 = vmul.f32 %v4618_v0, %v4618_v0  ;;  %v4638_v22 = vpop.eup %3115  ;;  %vm4640_vm9 = vcmp.eq.s32.totalorder %v1590_v24, 1 }
 0x3af   :  { %6472 = vst [vmem:[#allocation95_spill] sm:$0xff] %v4595_v17  ;;  %6473 = vst [vmem:[#allocation96_spill] sm:$0xff] %v4608_v5  ;;  %v4613_v17 = vld [vmem:[%s6244_s7 + $0x60] sm:$0xff]  ;;  %v4644_v5 = vmul.f32 -0.5, %v2106_v53  ;;  %v4648_v14 = vpop.eup %3117  ;;  %v4662_v53 = vmul.f32 -0.5, %v2112_v31  ;;  %v1593_v9 = vsel %vm4640_vm9, %v4128_v2, %v3761_v35  ;;  %v4686_v31 = vsel %vm4640_vm9, %v4150_v57, %v3764_v36 }
 0x3b0   :  { %6474 = vst [vmem:[#allocation97_spill] sm:$0xff] %v4613_v17  ;;  %6475 = vst [vmem:[#allocation98_spill] sm:$0xff] %v4618_v0  ;;  %v2116_v34 = vmul.f32 %v4613_v17, %v4613_v17  ;;  %v2118_v0 = vmul.f32 %v4633_v25, %v4633_v25  ;;  %v4658_v24 = vpop.eup %3119  ;;  %v4674_v30 = vmul.f32 -0.5, %v2115_v40  ;;  %v4678_v27 = vmul.f32 -0.5, %v2117_v15  ;;  %v6509_v40 = vld [vmem:[#allocation50_spill] sm:$0xff] }
 0x3b1   :  { %6476 = vst [vmem:[#allocation99_spill] sm:$0xff] %v4620_v54  ;;  %6477 = vst [vmem:[#allocation100_spill] sm:$0xff] %v4622_v52  ;;  %v1991_v54 = vld [vmem:[%s6244_s7 + $0x78] sm:$0xff]  ;;  %v4710_v36 = vsel %vm4640_vm9, %v4193_v26, %v3775_v38  ;;  %v4722_v57 = vsel %vm4640_vm9, %v4215_v1, %v3796_v43  ;;  %v4734_v38 = vsel %vm4640_vm9, %v4244_v44, %v3804_v45  ;;  %v6497_v43 = vld [vmem:[#allocation4_spill] sm:$0xff] }
 0x3b2   :  { %6478 = vst [vmem:[#allocation101_spill] sm:$0xff] %v4633_v25  ;;  %6479 = vst [vmem:[#allocation102_spill] sm:$0xff] %v4638_v22  ;;  %v2119_v17 = vmul.f32 %v1991_v54, %v1991_v54  ;;  %v4660_v22 = vmul.f32 -0.5, %v2111_v48  ;;  %v4666_v25 = vmul.f32 -0.5, %v2114_v23  ;;  %v4668_v54 = vpop.eup %3121  ;;  %v4676_v28 = vmul.f32 -0.5, %v2116_v34  ;;  %v6499_v26 = vld [vmem:[#allocation5_spill] sm:$0xff] }
 0x3b3   :  { %6482 = vst [vmem:[#allocation103_spill] sm:$0xff] %v4644_v5  ;;  %6483 = vst [vmem:[#allocation104_spill] sm:$0xff] %v4648_v14  ;;  %v4664_v5 = vmul.f32 -0.5, %v2113_v12  ;;  %v4680_v48 = vpop.eup %3123  ;;  %v4692_v12 = vsel %vm4640_vm9, %v4170_v63, %v3789_v42  ;;  %v4694_v35 = vmul.f32 -0.5, %v2118_v0  ;;  %v4704_v23 = vsel %vm4640_vm9, %v4156_v47, %v3767_v37  ;;  %v6500_v44 = vld [vmem:[#allocation6_spill] sm:$0xff] }
 0x3b4   :  { %6484 = vst [vmem:[#allocation105_spill] sm:$0xff] %v4658_v24  ;;  %6485 = vst [vmem:[#allocation106_spill] sm:$0xff] %v4662_v53  ;;  %v4696_v2 = vmul.f32 -0.5, %v2119_v17  ;;  %v4698_v15 = vpop.eup %3125  ;;  %v4716_v42 = vsel %vm4640_vm9, %v4181_v32, %v3772_v62  ;;  %v4728_v37 = vsel %vm4640_vm9, %v4199_v29, %v3778_v39  ;;  %v6496_v62 = vld [vmem:[#allocation2_spill] sm:$0xff]  ;;  %vm1625_vm10 = vcmp.ne.f32.partialorder %v1593_v9, %v1593_v9  ;;  %v6498_v39 = vld [vmem:[#allocation3_spill] sm:$0xff] }
 0x3b5   :  { %6486 = vst [vmem:[#allocation107_spill] sm:$0xff] %v4664_v5  ;;  %6487 = vst [vmem:[#allocation108_spill] sm:$0xff] %v4666_v25  ;;  %v4740_v47 = vsel %vm4640_vm9, %v4229_v13, %v6496_v62  ;;  %v4746_v63 = vsel %vm4640_vm9, %v4266_v19, %v6497_v43  ;;  %v4752_v29 = vsel %vm4640_vm9, %v4255_v51, %v6498_v39  ;;  %v1657_v32 = vsel %vm1625_vm10, 1.0, %v1593_v9  ;;  %v6504_v19 = vld [vmem:[#allocation44_spill] sm:$0xff]  ;;  %v6513_v34 = vld [vmem:[#allocation10_spill] sm:$0xff] }
 0x3b6   :  { %6488 = vst [vmem:[#allocation109_spill] sm:$0xff] %v4668_v54  ;;  %6489 = vst [vmem:[#allocation110_spill] sm:$0xff] %v4674_v30  ;;  %v4758_v45 = vsel %vm4640_vm9, %v4305_v16, %v3845_v55  ;;  %v4764_v1 = vsel %vm4640_vm9, %v4283_v56, %v6499_v26  ;;  %v4770_v13 = vsel %vm4640_vm9, %v4330_v18, %v3855_v59  ;;  %vm1689_vm11 = vcmp.eq.f32.partialorder %v1657_v32, inf  ;;  %v6503_v56 = vld [vmem:[#allocation7_spill] sm:$0xff]  ;;  %v6506_v59 = vld [vmem:[#allocation9_spill] sm:$0xff] }
 0x3b7   :  { %6490 = vst [vmem:[#allocation111_spill] sm:$0xff] %v4676_v28  ;;  %6491 = vst [vmem:[#allocation112_spill] sm:$0xff] %v4678_v27  ;;  %v4776_v51 = vsel %vm4640_vm9, %v4312_v60, %v6500_v44  ;;  %v4782_v55 = vsel %vm4640_vm9, %v4353_v50, %v3920_v41  ;;  %v4788_v16 = vsel %vm4640_vm9, %v6504_v19, %v6503_v56  ;;  %v1721_v60 = vsel %vm1689_vm11, 3.4028235e+38, %v1657_v32  ;;  %v6508_v17 = vld [vmem:[#allocation8_spill] sm:$0xff]  ;;  %v6511_v41 = vld [vmem:[#allocation11_spill] sm:$0xff] }
 0x3b8   :  { %6492 = vst [vmem:[#allocation113_spill] sm:$0xff] %v4680_v48  ;;  %6493 = vst [vmem:[#allocation114_spill] sm:$0xff] %v4694_v35  ;;  %v4794_v18 = vsel %vm4640_vm9, %v4390_v7, %v6506_v59  ;;  %v4800_v0 = vsel %vm4640_vm9, %v6509_v40, %v6508_v17  ;;  %v4806_v50 = vsel %vm4640_vm9, %v4400_v20, %v6511_v41  ;;  %vm1753_vm0 = vcmp.eq.f32.partialorder %v1721_v60, -inf  ;;  %v6515_v7 = vld [vmem:[#allocation13_spill] sm:$0xff]  ;;  %v6517_v39 = vld [vmem:[#allocation12_spill] sm:$0xff] }
 0x3b9   :  { %6494 = vst [vmem:[#allocation115_spill] sm:$0xff] %v4696_v2  ;;  %6495 = vst [vmem:[#allocation116_spill] sm:$0xff] %v4698_v15  ;;  %v4812_v62 = vsel %vm4640_vm9, %v4398_v49, %v6513_v34  ;;  %v4818_v43 = vsel %vm4640_vm9, %v4429_v58, %v6515_v7  ;;  %v4824_v32 = vsel %vm4640_vm9, %v4423_v46, %v6517_v39  ;;  %v1785_v49 = vsel %vm1753_vm0, -3.4028235e+38, %v1721_v60  ;;  %v6520_v26 = vld [vmem:[#allocation14_spill] sm:$0xff]  ;;  %v6522_v58 = vld [vmem:[#allocation16_spill] sm:$0xff] }
 0x3ba   :  { %6501 = vst [vmem:[#allocation2_spill] sm:$0xff] %v4776_v51  ;;  %6502 = vst [vmem:[#allocation4_spill] sm:$0xff] %v4782_v55  ;;  %v4830_v20 = vsel %vm4640_vm9, %v4477_v61, %v3985_v11  ;;  %v4836_v44 = vsel %vm4640_vm9, %v4446_v3, %v6520_v26  ;;  %v4842_v56 = vsel %vm4640_vm9, %v4502_v4, %v6522_v58  ;;  %v6524_v46 = vld [vmem:[#allocation15_spill] sm:$0xff]  ;;  %v1817_v11 = vadd.f32 1e-06, %v1785_v49  ;;  %v6526_v61 = vld [vmem:[#allocation18_spill] sm:$0xff] }
 0x3bb   :  { %6505 = vst [vmem:[#allocation3_spill] sm:$0xff] %v4788_v16  ;;  %6507 = vst [vmem:[#allocation5_spill] sm:$0xff] %v4794_v18  ;;  %v4848_v19 = vsel %vm4640_vm9, %v4484_v21, %v6524_v46  ;;  %v6527_v59 = vld [vmem:[#allocation79_spill] sm:$0xff]  ;;  %v6529_v3 = vld [vmem:[#allocation17_spill] sm:$0xff]  ;;  %vm1624_vm15 = vcmp.ne.f32.partialorder %v4686_v31, %v4686_v31  ;;  %vm1626_vm8 = vcmp.ne.f32.partialorder %v4692_v12, %v4692_v12 }
 0x3bc   :  { %6510 = vst [vmem:[#allocation6_spill] sm:$0xff] %v4800_v0  ;;  %6512 = vst [vmem:[#allocation7_spill] sm:$0xff] %v4806_v50  ;;  %v4854_v60 = vsel %vm4640_vm9, %v6527_v59, %v6526_v61  ;;  %v6530_v17 = vld [vmem:[#allocation80_spill] sm:$0xff]  ;;  %v6532_v4 = vld [vmem:[#allocation19_spill] sm:$0xff]  ;;  %3127 = vlog2.f32 %v1817_v11  ;;  %vm1627_vm1 = vcmp.ne.f32.partialorder %v4704_v23, %v4704_v23  ;;  %vm1628_vm7 = vcmp.ne.f32.partialorder %v4710_v36, %v4710_v36 }
 0x3bd   :  { %6514 = vst [vmem:[#allocation44_spill] sm:$0xff] %v4812_v62  ;;  %6516 = vst [vmem:[#allocation9_spill] sm:$0xff] %v4818_v43  ;;  %v4860_v40 = vsel %vm4640_vm9, %v6530_v17, %v6529_v3  ;;  %v6533_v41 = vld [vmem:[#allocation82_spill] sm:$0xff]  ;;  %v6535_v21 = vld [vmem:[#allocation20_spill] sm:$0xff]  ;;  %vm1629_vm3 = vcmp.ne.f32.partialorder %v4716_v42, %v4716_v42  ;;  %vm1630_vm12 = vcmp.ne.f32.partialorder %v4722_v57, %v4722_v57 }
 0x3be   :  { %6518 = vst [vmem:[#allocation8_spill] sm:$0xff] %v4824_v32  ;;  %6519 = vst [vmem:[#allocation50_spill] sm:$0xff] %v4830_v20  ;;  %v4866_v34 = vsel %vm4640_vm9, %v6533_v41, %v6532_v4  ;;  %v6536_v7 = vld [vmem:[#allocation87_spill] sm:$0xff]  ;;  %v6539_v58 = vld [vmem:[#allocation76_spill] sm:$0xff]  ;;  %vm1631_vm6 = vcmp.ne.f32.partialorder %v4728_v37, %v4728_v37  ;;  %vm1632_vm14 = vcmp.ne.f32.partialorder %v4734_v38, %v4734_v38 }
 0x3bf   :  { %6521 = vst [vmem:[#allocation11_spill] sm:$0xff] %v4836_v44  ;;  %6523 = vst [vmem:[#allocation10_spill] sm:$0xff] %v4842_v56  ;;  %v4874_v39 = vsel %vm4640_vm9, %v6536_v7, %v6535_v21  ;;  %v6538_v49 = vld [vmem:[#allocation35_spill] sm:$0xff]  ;;  %vm1637_vm11 = vcmp.ne.f32.partialorder %v4764_v1, %v4764_v1  ;;  %vm1646_vm2 = vcmp.ne.f32.partialorder %v4818_v43, %v4818_v43  ;;  %v6540_v17 = vld [vmem:[#allocation38_spill] sm:$0xff] }
 0x3c0   :  { %6525 = vst [vmem:[#allocation13_spill] sm:$0xff] %v4848_v19  ;;  %6528 = vst [vmem:[#allocation12_spill] sm:$0xff] %v4854_v60  ;;  %v1849_v26 = vsel %vm4640_vm9, %v1817_v11, %v6538_v49  ;;  %v1656_v11 = vsel %vm1624_vm15, 1.0, %v4686_v31  ;;  %vm1645_vm15 = vcmp.ne.f32.partialorder %v4812_v62, %v4812_v62  ;;  %vm1651_vm0 = vcmp.ne.f32.partialorder %v4848_v19, %v4848_v19  ;;  %v6541_v21 = vld [vmem:[#allocation81_spill] sm:$0xff]  ;;  %v6560_v25 = vld [vmem:[#allocation83_spill] sm:$0xff] }
 0x3c1   :  { %6531 = vst [vmem:[#allocation14_spill] sm:$0xff] %v4860_v40  ;;  %6534 = vst [vmem:[#allocation16_spill] sm:$0xff] %v4866_v34  ;;  %v2009_v46 = vmul.f32 %v6539_v58, %v1849_v26  ;;  %vm1688_vm13 = vcmp.eq.f32.partialorder %v1656_v11, inf  ;;  %vm1652_vm5 = vcmp.ne.f32.partialorder %v4854_v60, %v4854_v60  ;;  %vm1653_vm10 = vcmp.ne.f32.partialorder %v4860_v40, %v4860_v40  ;;  %v6553_v27 = vld [vmem:[#allocation21_spill] sm:$0xff] }
 0x3c2   :  { %6537 = vst [vmem:[#allocation15_spill] sm:$0xff] %v4874_v39  ;;  %v1720_v59 = vsel %vm1688_vm13, 3.4028235e+38, %v1656_v11  ;;  %vm1655_vm13 = vcmp.ne.f32.partialorder %v4874_v39, %v4874_v39  ;;  %v1658_v49 = vsel %vm1626_vm8, 1.0, %v4692_v12  ;;  %v4953_v26 = vsel %vm1627_vm1, 1.0, %v4704_v23 }
 0x3c3   :  { %v2041_v61 = vadd.f32 %v2009_v46, %v1593_v9  ;;  %vm1752_vm4 = vcmp.eq.f32.partialorder %v1720_v59, -inf  ;;  %v4959_v58 = vsel %vm1628_vm7, 1.0, %v4710_v36  ;;  %v4965_v46 = vsel %vm1629_vm3, 1.0, %v4716_v42 }
 0x3c4   :  { %v1784_v9 = vsel %vm1752_vm4, -3.4028235e+38, %v1720_v59  ;;  %vm1654_vm4 = vcmp.ne.f32.partialorder %v4866_v34, %v4866_v34  ;;  %v4971_v11 = vsel %vm1630_vm12, 1.0, %v4722_v57  ;;  %v4983_v59 = vsel %vm1632_vm14, 1.0, %v4734_v38 }
 0x3c5   :  { %3129 = vtanh.f32 %v2041_v61  ;;  %v1816_v3 = vadd.f32 1e-06, %v1784_v9  ;;  %v4977_v61 = vsel %vm1631_vm6, 1.0, %v4728_v37  ;;  %vm6542_vm8 = vcmp.ne.f32.partialorder %v4740_v47, %v4740_v47 }
 0x3c6   :  { %v3128_v41 = vpop.eup %3127  ;;  %vm6543_vm1 = vcmp.ne.f32.partialorder %v4746_v63, %v4746_v63  ;;  %vm6544_vm7 = vcmp.ne.f32.partialorder %v4752_v29, %v4752_v29  ;;  %vm6545_vm3 = vcmp.ne.f32.partialorder %v4758_v45, %v4758_v45  ;;  %vm1690_vm12 = vcmp.eq.f32.partialorder %v1658_v49, inf }
 0x3c7   :  { %v1848_v4 = vsel %vm4640_vm9, %v1816_v3, %v6540_v17  ;;  %3131 = vlog2.f32 %v1816_v3  ;;  %v4990_v3 = vsel %vm6542_vm8, 1.0, %v4740_v47  ;;  %v4996_v17 = vsel %vm6543_vm1, 1.0, %v4746_v63 }
 0x3c8   :  { %v2008_v7 = vmul.f32 %v6541_v21, %v1848_v4  ;;  %v5002_v4 = vsel %vm6544_vm7, 1.0, %v4752_v29  ;;  %v1883_v21 = vmul.f32 0.6931472, %v3128_v41  ;;  %vm6546_vm6 = vcmp.ne.f32.partialorder %v4770_v13, %v4770_v13 }
 0x3c9   :  { %v5020_v48 = vsel %vm6546_vm6, 1.0, %v4770_v13  ;;  %vm6547_vm14 = vcmp.ne.f32.partialorder %v4776_v51, %v4776_v51  ;;  %v1722_v15 = vsel %vm1690_vm12, 3.4028235e+38, %v1658_v49  ;;  %vm6549_vm8 = vcmp.ne.f32.partialorder %v4788_v16, %v4788_v16 }
 0x3ca   :  { %v2040_v9 = vadd.f32 %v2008_v7, %v4686_v31  ;;  %v5008_v31 = vsel %vm6545_vm3, 1.0, %v4758_v45  ;;  %v5014_v7 = vsel %vm1637_vm11, 1.0, %v4764_v1  ;;  %v5026_v41 = vsel %vm6547_vm14, 1.0, %v4776_v51 }
 0x3cb   :  { %vm6548_vm11 = vcmp.ne.f32.partialorder %v4782_v55, %v4782_v55  ;;  %v5040_v54 = vsel %vm6549_vm8, 1.0, %v4788_v16  ;;  %vm6550_vm1 = vcmp.ne.f32.partialorder %v4794_v18, %v4794_v18  ;;  %vm1754_vm7 = vcmp.eq.f32.partialorder %v1722_v15, -inf }
 0x3cc   :  { %3133 = vtanh.f32 %v2040_v9  ;;  %v5034_v9 = vsel %vm6548_vm11, 1.0, %v4782_v55  ;;  %v5046_v14 = vsel %vm6550_vm1, 1.0, %v4794_v18  ;;  %vm6551_vm3 = vcmp.ne.f32.partialorder %v4800_v0, %v4800_v0 }
 0x3cd   :  { %v5054_v2 = vsel %vm6551_vm3, 1.0, %v4800_v0  ;;  %vm6552_vm12 = vcmp.ne.f32.partialorder %v4806_v50, %v4806_v50  ;;  %v1786_v16 = vsel %vm1754_vm7, -3.4028235e+38, %v1722_v15  ;;  %v1945_v18 = vsel %vm4640_vm9, %v1883_v21, %v6553_v27 }
 0x3ce   :  { %v5060_v35 = vsel %vm6552_vm12, 1.0, %v4806_v50  ;;  %v5069_v55 = vsel %vm1645_vm15, 1.0, %v4812_v62  ;;  %v5075_v0 = vsel %vm1646_vm2, 1.0, %v4818_v43  ;;  %v1818_v28 = vadd.f32 1e-06, %v1786_v16 }
 0x3cf   :  { %v5028_v24 = vpop.eup %3129  ;;  %vm6554_vm6 = vcmp.ne.f32.partialorder %v4824_v32, %v4824_v32  ;;  %vm6555_vm14 = vcmp.ne.f32.partialorder %v4830_v20, %v4830_v20  ;;  %vm6556_vm15 = vcmp.ne.f32.partialorder %v4836_v44, %v4836_v44  ;;  %vm6557_vm2 = vcmp.ne.f32.partialorder %v4842_v56, %v4842_v56 }
 0x3d0   :  { %v2233_v49 = vmul.f32 %v5028_v24, %v5028_v24  ;;  %v5081_v15 = vsel %vm6554_vm6, 1.0, %v4824_v32  ;;  %v5087_v27 = vsel %vm6555_vm14, 1.0, %v4830_v20  ;;  %v5093_v21 = vsel %vm6556_vm15, 1.0, %v4836_v44  ;;  %v6558_v20 = vld [vmem:[#allocation42_spill] sm:$0xff]  ;;  %v6559_v44 = vld [vmem:[#allocation88_spill] sm:$0xff] }
 0x3d1   :  { %v3132_v16 = vpop.eup %3131  ;;  %v5105_v32 = vsel %vm1651_vm0, 1.0, %v4848_v19  ;;  %v1850_v43 = vsel %vm4640_vm9, %v1818_v28, %v6558_v20  ;;  %3135 = vlog2.f32 %v1818_v28  ;;  %v2169_v62 = vsub.f32 %v6559_v44, %v1945_v18  ;;  %v6561_v20 = vld [vmem:[#allocation22_spill] sm:$0xff] }
 0x3d2   :  { %v2265_v50 = vsub.f32 1.0, %v2233_v49  ;;  %v5099_v49 = vsel %vm6557_vm2, 1.0, %v4842_v56  ;;  %v1881_v51 = vmul.f32 0.6931472, %v3132_v16  ;;  %v2010_v5 = vmul.f32 %v6560_v25, %v1850_v43 }
 0x3d3   :  { %v5116_v56 = vsel %vm1652_vm5, 1.0, %v4854_v60  ;;  %v5122_v19 = vsel %vm1653_vm10, 1.0, %v4860_v40  ;;  %v5128_v28 = vsel %vm1654_vm4, 1.0, %v4866_v34  ;;  %v5134_v25 = vsel %vm1655_vm13, 1.0, %v4874_v39  ;;  %v6566_v34 = vld [vmem:[#allocation77_spill] sm:$0xff] }
 0x3d4   :  { %v2297_v30 = vadd.f32 1e-07, %v2265_v50  ;;  %v2042_v18 = vadd.f32 %v2010_v5, %v4692_v12  ;;  %vm1691_vm5 = vcmp.eq.f32.partialorder %v4953_v26, inf  ;;  %vm1692_vm10 = vcmp.eq.f32.partialorder %v4959_v58, inf }
 0x3d5   :  { %vm1693_vm0 = vcmp.eq.f32.partialorder %v4965_v46, inf  ;;  %vm1694_vm11 = vcmp.eq.f32.partialorder %v4971_v11, inf  ;;  %vm1695_vm4 = vcmp.eq.f32.partialorder %v4977_v61, inf  ;;  %vm1696_vm8 = vcmp.eq.f32.partialorder %v4983_v59, inf }
 0x3d6   :  { %3137 = vlog2.f32 %v2297_v30  ;;  %v5143_v50 = vpop.eup %3133  ;;  %v5145_v43 = vadd.f32 -0.9189385, %v2169_v62  ;;  %v1944_v5 = vsel %vm4640_vm9, %v1881_v51, %v6561_v20  ;;  %vm1697_vm13 = vcmp.eq.f32.partialorder %v4990_v3, inf  ;;  %v6562_v51 = vld [vmem:[#allocation100_spill] sm:$0xff] }
 0x3d7   :  { %3139 = vtanh.f32 %v2042_v18  ;;  %v2232_v30 = vmul.f32 %v5143_v50, %v5143_v50  ;;  %v1723_v12 = vsel %vm1691_vm5, 3.4028235e+38, %v4953_v26  ;;  %v2168_v62 = vsub.f32 %v6562_v51, %v1944_v5 }
 0x3d8   :  { %vm1755_vm2 = vcmp.eq.f32.partialorder %v1723_v12, -inf  ;;  %vm1705_vm7 = vcmp.eq.f32.partialorder %v5040_v54, inf  ;;  %vm1706_vm3 = vcmp.eq.f32.partialorder %v5046_v14, inf  ;;  %vm1708_vm14 = vcmp.eq.f32.partialorder %v5060_v35, inf }
 0x3d9   :  { %v2264_v44 = vsub.f32 1.0, %v2232_v30  ;;  %v1787_v16 = vsel %vm1755_vm2, -3.4028235e+38, %v1723_v12  ;;  %vm1709_vm6 = vcmp.eq.f32.partialorder %v5069_v55, inf  ;;  %vm1710_vm5 = vcmp.eq.f32.partialorder %v5075_v0, inf  ;;  %v6563_v30 = vld [vmem:[#allocation39_spill] sm:$0xff] }
 0x3da   :  { %v1819_v26 = vadd.f32 1e-06, %v1787_v16  ;;  %vm1711_vm15 = vcmp.eq.f32.partialorder %v5081_v15, inf  ;;  %v5172_v5 = vadd.f32 -0.9189385, %v2168_v62  ;;  %vm1713_vm12 = vcmp.eq.f32.partialorder %v5093_v21, inf }
 0x3db   :  { %v3136_v18 = vpop.eup %3135  ;;  %v2296_v20 = vadd.f32 1e-07, %v2264_v44  ;;  %v1724_v51 = vsel %vm1692_vm10, 3.4028235e+38, %v4959_v58  ;;  %v6564_v16 = vld [vmem:[#allocation24_spill] sm:$0xff]  ;;  %vm1716_vm10 = vcmp.eq.f32.partialorder %v5116_v56, inf }
 0x3dc   :  { %v1885_v39 = vmul.f32 0.6931472, %v3136_v18  ;;  %v1851_v12 = vsel %vm4640_vm9, %v1819_v26, %v6563_v30  ;;  %v6565_v62 = vld [vmem:[#allocation84_spill] sm:$0xff]  ;;  %v5190_v30 = vsel %vm1693_vm0, 3.4028235e+38, %v4965_v46  ;;  %vm1717_vm0 = vcmp.eq.f32.partialorder %v5122_v19, inf }
 0x3dd   :  { %3141 = vlog2.f32 %v2296_v20  ;;  %v2011_v20 = vmul.f32 %v6565_v62, %v1851_v12  ;;  %vm1718_vm1 = vcmp.eq.f32.partialorder %v5128_v28, inf  ;;  %vm1719_vm2 = vcmp.eq.f32.partialorder %v5134_v25, inf }
 0x3de   :  { %v1946_v18 = vsel %vm4640_vm9, %v1885_v39, %v6564_v16  ;;  %3143 = vlog2.f32 %v1819_v26  ;;  %v5197_v39 = vsel %vm1694_vm11, 3.4028235e+38, %v4971_v11  ;;  %v5202_v26 = vsel %vm1695_vm4, 3.4028235e+38, %v4977_v61  ;;  %v6568_v16 = vld [vmem:[#allocation103_spill] sm:$0xff] }
 0x3df   :  { %3145 = vpow2.f32 %v6566_v34  ;;  %v2043_v34 = vadd.f32 %v2011_v20, %v4704_v23  ;;  %v5213_v46 = vsel %vm1696_vm8, 3.4028235e+38, %v4983_v59  ;;  %v5218_v11 = vsel %vm1697_vm13, 3.4028235e+38, %v4990_v3 }
 0x3e0   :  { %v3138_v44 = vpop.eup %3137  ;;  %vm6567_vm11 = vcmp.eq.f32.partialorder %v4996_v17, inf  ;;  %v2170_v62 = vsub.f32 %v6568_v16, %v1946_v18  ;;  %vm6569_vm4 = vcmp.eq.f32.partialorder %v5002_v4, inf  ;;  %vm6570_vm8 = vcmp.eq.f32.partialorder %v5008_v31, inf }
 0x3e1   :  { %v2331_v58 = vmul.f32 0.6931472, %v3138_v44  ;;  %v5204_v12 = vpop.eup %3139  ;;  %v5223_v61 = vsel %vm6567_vm11, 3.4028235e+38, %v4996_v17  ;;  %v5232_v59 = vsel %vm6569_vm4, 3.4028235e+38, %v5002_v4  ;;  %3147 = vtanh.f32 %v2043_v34 }
 0x3e2   :  { %v2234_v23 = vmul.f32 %v5204_v12, %v5204_v12  ;;  %v5237_v3 = vsel %vm6570_vm8, 3.4028235e+38, %v5008_v31  ;;  %vm6571_vm13 = vcmp.eq.f32.partialorder %v5014_v7, inf  ;;  %vm6572_vm11 = vcmp.eq.f32.partialorder %v5020_v48, inf  ;;  %v5252_v4 = vld [vmem:[%s6244_s7 + $0x80] sm:$0xff] }
 0x3e3   :  { %v2393_v44 = vsub.f32 %v5145_v43, %v2331_v58  ;;  %v5242_v17 = vsel %vm6571_vm13, 3.4028235e+38, %v5014_v7  ;;  %v5247_v43 = vsel %vm6572_vm11, 3.4028235e+38, %v5020_v48  ;;  %6573 = vst [vmem:[#allocation18_spill] sm:$0xff] %v5252_v4  ;;  %vm6574_vm4 = vcmask 64512  }
 0x3e4   :  { %v2266_v20 = vsub.f32 1.0, %v2234_v23  ;;  %vm6575_vm8 = vcmp.eq.f32.partialorder %v5026_v41, inf  ;;  %vm6576_vm13 = vcmp.eq.f32.partialorder %v5034_v9, inf  ;;  %v5268_v48 = vld [vmem:[%s6244_s7 + $0x88] sm:$0xff]  ;;  %v6578_v58 = vld [vmem:[#allocation78_spill] sm:$0xff]  ;;  %vm6579_vm11 = vcmp.eq.f32.partialorder %v5054_v2, inf }
 0x3e5   :  { %v2427_v18 = vsel %vm6574_vm4, %v2393_v44, 0.0  ;;  %v5258_v31 = vsel %vm6575_vm8, 3.4028235e+38, %v5026_v41  ;;  %v5263_v7 = vsel %vm6576_vm13, 3.4028235e+38, %v5034_v9  ;;  %6577 = vst [vmem:[#allocation79_spill] sm:$0xff] %v5268_v48  ;;  %3149 = vpow2.f32 %v6578_v58 }
 0x3e6   :  { %2428 = vadd.xlane.f32.xlu1 %v2427_v18  ;;  %v5274_v34 = vsel %vm1705_vm7, 3.4028235e+38, %v5040_v54  ;;  %v5279_v41 = vsel %vm1706_vm3, 3.4028235e+38, %v5046_v14  ;;  %v5284_v9 = vsel %vm6579_vm11, 3.4028235e+38, %v5054_v2  ;;  %v5295_v54 = vmul.f32 %v5252_v4, %v5252_v4 }
 0x3e7   :  { %v5286_v44 = vadd.f32 -0.9189385, %v2170_v62  ;;  %v2298_v16 = vadd.f32 1e-07, %v2266_v20  ;;  %v5291_v23 = vsel %vm1708_vm14, 3.4028235e+38, %v5060_v35  ;;  %v5314_v35 = vmul.f32 %v5268_v48, %v5268_v48  ;;  %v3142_v20 = vpop.eup %3141 }
 0x3e8   :  { %v5300_v14 = vld [vmem:[%s6244_s7 + $0x90] sm:$0xff]  ;;  %v5305_v2 = vsel %vm1709_vm6, 3.4028235e+38, %v5069_v55  ;;  %v5310_v62 = vsel %vm1710_vm5, 3.4028235e+38, %v5075_v0  ;;  %vm1756_vm7 = vcmp.eq.f32.partialorder %v1724_v51, -inf  ;;  %v3144_v40 = vpop.eup %3143 }
 0x3e9   :  { %v5319_v18 = vld [vmem:[%s6244_s7 + $0x98] sm:$0xff]  ;;  %3151 = vlog2.f32 %v2298_v16  ;;  %v5324_v55 = vsel %vm1711_vm15, 3.4028235e+38, %v5081_v15  ;;  %vm6580_vm3 = vcmp.eq.f32.partialorder %v5087_v27, inf  ;;  %v1788_v58 = vsel %vm1756_vm7, -3.4028235e+38, %v1724_v51  ;;  %v5340_v15 = vpop.eup %3145 }
 0x3ea   :  { %v5329_v0 = vsel %vm6580_vm3, 3.4028235e+38, %v5087_v27  ;;  %v2329_v60 = vmul.f32 0.6931472, %v3142_v20  ;;  %v5334_v48 = vsel %vm1713_vm12, 3.4028235e+38, %v5093_v21  ;;  %v5338_v16 = vmul.f32 %v5300_v14, %v5300_v14  ;;  %vm6590_vm12 = vmmov %vm6574_vm4 }
 0x3eb   :  { %v1820_v4 = vadd.f32 1e-06, %v1788_v58  ;;  %6581 = vst [vmem:[#allocation17_spill] sm:$0xff] %v5340_v15  ;;  %v1887_v53 = vmul.f32 0.6931472, %v3144_v40  ;;  %vm6582_vm6 = vcmp.eq.f32.partialorder %v5099_v49, inf  ;;  %v5354_v21 = vmul.f32 %v5319_v18, %v5319_v18 }
 0x3ec   :  { %v5345_v27 = vsel %vm6582_vm6, 3.4028235e+38, %v5099_v49  ;;  %vm6583_vm14 = vcmp.eq.f32.partialorder %v5105_v32, inf  ;;  %v2392_v20 = vsub.f32 %v5172_v5, %v2329_v60  ;;  %v5360_v40 = vsel %vm1716_vm10, 3.4028235e+38, %v5116_v56  ;;  %v6585_v58 = vld [vmem:[#allocation46_spill] sm:$0xff] }
 0x3ed   :  { %v5350_v51 = vsel %vm6583_vm14, 3.4028235e+38, %v5105_v32  ;;  %6584 = vst [vmem:[#allocation80_spill] sm:$0xff] %v5360_v40  ;;  %v1852_v49 = vsel %vm4640_vm9, %v1820_v4, %v6585_v58  ;;  %3153 = vlog2.f32 %v1820_v4  ;;  %v5368_v32 = vsel %vm1717_vm0, 3.4028235e+38, %v5122_v19  ;;  %v6589_v60 = vld [vmem:[#allocation85_spill] sm:$0xff]  ;;  %v3148_v40 = vpop.eup %3147 }
 0x3ee   :  { %6586 = vst [vmem:[#allocation19_spill] sm:$0xff] %v5368_v32  ;;  %v5373_v15 = vsel %vm1718_vm1, 3.4028235e+38, %v5128_v28  ;;  %v5378_v56 = vsel %vm1719_vm2, 3.4028235e+38, %v5134_v25  ;;  %v2012_v5 = vmul.f32 %v6589_v60, %v1852_v49  ;;  %v2424_v4 = vsel %vm6590_vm12, %v2392_v20, 0.0 }
 0x3ef   :  { %6587 = vst [vmem:[#allocation82_spill] sm:$0xff] %v5373_v15  ;;  %6588 = vst [vmem:[#allocation20_spill] sm:$0xff] %v5378_v56  ;;  %v6591_v58 = vld [vmem:[#allocation23_spill] sm:$0xff]  ;;  %vm1757_vm15 = vcmp.eq.f32.partialorder %v5190_v30, -inf  ;;  %vm1758_vm5 = vcmp.eq.f32.partialorder %v5197_v39, -inf  ;;  %2425 = vadd.xlane.f32.xlu0 %v2424_v4  ;;  %v2235_v28 = vmul.f32 %v3148_v40, %v3148_v40  ;;  %vm1759_vm1 = vcmp.eq.f32.partialorder %v5202_v26, -inf  ;;  %v5390_v25 = vpop.eup %3149 }
 0x3f0   :  { %v1947_v19 = vsel %vm4640_vm9, %v1887_v53, %v6591_v58  ;;  %v2044_v15 = vadd.f32 %v2012_v5, %v4710_v36  ;;  %vm1760_vm2 = vcmp.eq.f32.partialorder %v5213_v46, -inf  ;;  %6592 = vst [vmem:[#allocation87_spill] sm:$0xff] %v5390_v25  ;;  %vm1761_vm10 = vcmp.eq.f32.partialorder %v5218_v11, -inf  ;;  %v6618_v56 = vld [vmem:[#allocation54_spill] sm:$0xff] }
 0x3f1   :  { %vm1762_vm0 = vcmp.eq.f32.partialorder %v5223_v61, -inf  ;;  %vm1763_vm4 = vcmp.eq.f32.partialorder %v5232_v59, -inf  ;;  %vm1764_vm8 = vcmp.eq.f32.partialorder %v5237_v3, -inf  ;;  %v2171_v53 = vsub.f32 %v4650_v33, %v1947_v19 }
 0x3f2   :  { %v2267_v20 = vsub.f32 1.0, %v2235_v28  ;;  %3155 = vtanh.f32 %v2044_v15  ;;  %vm1765_vm13 = vcmp.eq.f32.partialorder %v5242_v17, -inf  ;;  %v1789_v36 = vsel %vm1757_vm15, -3.4028235e+38, %v5190_v30  ;;  %v6593_v30 = vld [vmem:[#allocation43_spill] sm:$0xff]  ;;  %v6594_v28 = vld [vmem:[#allocation89_spill] sm:$0xff] }
 0x3f3   :  { %v3152_v49 = vpop.eup %3151  ;;  %vm1769_vm6 = vcmp.eq.f32.partialorder %v5274_v34, -inf  ;;  %v1821_v33 = vadd.f32 1e-06, %v1789_v36  ;;  %v5409_v5 = vadd.f32 -0.9189385, %v2171_v53  ;;  %vm1775_vm15 = vcmp.eq.f32.partialorder %v5324_v55, -inf }
 0x3f4   :  { %v2299_v60 = vadd.f32 1e-07, %v2267_v20  ;;  %v2333_v15 = vmul.f32 0.6931472, %v3152_v49  ;;  %vm1776_vm7 = vcmp.eq.f32.partialorder %v5329_v0, -inf  ;;  %vm1777_vm11 = vcmp.eq.f32.partialorder %v5334_v48, -inf }
 0x3f5   :  { %v1853_v4 = vsel %vm4640_vm9, %v1821_v33, %v6593_v30  ;;  %vm1778_vm12 = vcmp.eq.f32.partialorder %v5345_v27, -inf  ;;  %vm6595_vm3 = vcmask 64512   ;;  %vm1779_vm14 = vcmp.eq.f32.partialorder %v5350_v51, -inf }
 0x3f6   :  { %3157 = vlog2.f32 %v2299_v60  ;;  %v2394_v19 = vsub.f32 %v5286_v44, %v2333_v15  ;;  %v2013_v20 = vmul.f32 %v6594_v28, %v1853_v4  ;;  %v1790_v44 = vsel %vm1758_vm5, -3.4028235e+38, %v5197_v39  ;;  %v5430_v60 = vld [vmem:[%s6244_s7 + $0xa0] sm:$0xff]  ;;  %vm6596_vm5 = vmmov %vm6595_vm3 }
 0x3f7   :  { %v3154_v58 = vpop.eup %3153  ;;  %3159 = vlog2.f32 %v1821_v33  ;;  %v1791_v33 = vsel %vm1759_vm1, -3.4028235e+38, %v5202_v26  ;;  %v1792_v15 = vsel %vm1760_vm2, -3.4028235e+38, %v5213_v46  ;;  %v5443_v39 = vmul.f32 %v5430_v60, %v5430_v60  ;;  %2521 = vst.msk [vmem:[%s6245_s8 + $0x8] sm:$0xff] %vm6596_vm5, %v5028_v24  ;;  %vm6597_vm1 = vmmov %vm6595_vm3  ;;  %v6600_v26 = vld [vmem:[#allocation26_spill] sm:$0xff] }
 0x3f8   :  { %v1889_v36 = vmul.f32 0.6931472, %v3154_v58  ;;  %v2430_v53 = vsel %vm6595_vm3, %v2394_v19, 0.0  ;;  %v2045_v49 = vadd.f32 %v2013_v20, %v4716_v42  ;;  %v1793_v42 = vsel %vm1761_vm10, -3.4028235e+38, %v5218_v11  ;;  %2520 = vst.msk [vmem:[%s6245_s8] sm:$0xff] %vm6597_vm1, %v5143_v50  ;;  %vm6598_vm2 = vmmov %vm6597_vm1 }
 0x3f9   :  { %2431 = vadd.xlane.f32.xlu1 %v2430_v53  ;;  %2522 = vst.msk [vmem:[%s6245_s8 + $0x10] sm:$0xff] %vm6598_vm2, %v5204_v12  ;;  %vm6599_vm10 = vmmov %vm6597_vm1  ;;  %v1794_v50 = vsel %vm1762_vm0, -3.4028235e+38, %v5223_v61  ;;  %v1795_v46 = vsel %vm1763_vm4, -3.4028235e+38, %v5232_v59  ;;  %v5476_v12 = vld [vmem:[%s6244_s7 + $0xa8] sm:$0xff] }
 0x3fa   :  { %2523 = vst.msk [vmem:[%s6245_s8 + $0x18] sm:$0xff] %vm6599_vm10, %v3148_v40  ;;  %v1948_v24 = vsel %vm4640_vm9, %v1889_v36, %v6600_v26  ;;  %3161 = vtanh.f32 %v2045_v49  ;;  %v1796_v40 = vsel %vm1764_vm8, -3.4028235e+38, %v5237_v3  ;;  %v1797_v30 = vsel %vm1765_vm13, -3.4028235e+38, %v5242_v17  ;;  %vm6604_vm13 = vmmov %vm6597_vm1 }
 0x3fb   :  { %vm6601_vm0 = vcmp.eq.f32.partialorder %v5247_v43, -inf  ;;  %v5489_v59 = vmul.f32 %v5476_v12, %v5476_v12  ;;  %vm6602_vm4 = vcmp.eq.f32.partialorder %v5258_v31, -inf  ;;  %vm6603_vm8 = vcmp.eq.f32.partialorder %v5263_v7, -inf }
 0x3fc   :  { %v3156_v11 = vpop.eup %3155  ;;  %v1798_v61 = vsel %vm6601_vm0, -3.4028235e+38, %v5247_v43  ;;  %v1799_v58 = vsel %vm6602_vm4, -3.4028235e+38, %v5258_v31  ;;  %v1800_v3 = vsel %vm6603_vm8, -3.4028235e+38, %v5263_v7  ;;  %v2172_v43 = vsub.f32 %v4652_v8, %v1948_v24 }
 0x3fd   :  { %v2236_v4 = vmul.f32 %v3156_v11, %v3156_v11  ;;  %v5500_v17 = vsel %vm1769_vm6, -3.4028235e+38, %v5274_v34  ;;  %2524 = vst.msk [vmem:[%s6245_s8 + $0x20] sm:$0xff] %vm6604_vm13, %v3156_v11  ;;  %vm6605_vm3 = vcmp.eq.f32.partialorder %v5279_v41, -inf  ;;  %vm6606_vm5 = vcmp.eq.f32.partialorder %v5284_v9, -inf }
 0x3fe   :  { %v5510_v31 = vsel %vm6605_vm3, -3.4028235e+38, %v5279_v41  ;;  %v5515_v7 = vsel %vm6606_vm5, -3.4028235e+38, %v5284_v9  ;;  %v1822_v19 = vadd.f32 1e-06, %v1790_v44 }
 0x3ff   :  { %v2268_v34 = vsub.f32 1.0, %v2236_v4  ;;  %vm6607_vm6 = vcmp.eq.f32.partialorder %v5291_v23, -inf  ;;  %vm6608_vm1 = vcmp.eq.f32.partialorder %v5305_v2, -inf  ;;  %v5528_v41 = vmul.f32 -0.5, %v5295_v54  ;;  %v5546_v54 = vld [vmem:[%s6244_s7 + $0xb0] sm:$0xff] }
 0x400   :  { %v5520_v28 = vsel %vm6607_vm6, -3.4028235e+38, %v5291_v23  ;;  %v5525_v8 = vsel %vm6608_vm1, -3.4028235e+38, %v5305_v2  ;;  %v3158_v20 = vpop.eup %3157  ;;  %vm6609_vm2 = vcmp.eq.f32.partialorder %v5310_v62, -inf  ;;  %v6610_v23 = vld [vmem:[#allocation49_spill] sm:$0xff]  ;;  %3163 = vlog2.f32 %v1822_v19 }
 0x401   :  { %v5533_v9 = vsel %vm6609_vm2, -3.4028235e+38, %v5310_v62  ;;  %v5538_v36 = vsel %vm1775_vm15, -3.4028235e+38, %v5324_v55  ;;  %v1854_v53 = vsel %vm4640_vm9, %v1822_v19, %v6610_v23  ;;  %v3160_v2 = vpop.eup %3159  ;;  %v2335_v49 = vmul.f32 0.6931472, %v3158_v20 }
 0x402   :  { %v2300_v44 = vadd.f32 1e-07, %v2268_v34  ;;  %v6611_v62 = vld [vmem:[#allocation90_spill] sm:$0xff]  ;;  %v1823_v24 = vadd.f32 1e-06, %v1791_v33  ;;  %v5563_v19 = vmul.f32 %v5546_v54, %v5546_v54 }
 0x403   :  { %v2014_v26 = vmul.f32 %v6611_v62, %v1854_v53  ;;  %v5549_v11 = vadd.f32 -0.9189385, %v2172_v43  ;;  %v5554_v55 = vsel %vm1776_vm7, -3.4028235e+38, %v5329_v0  ;;  %v5559_v4 = vsel %vm1777_vm11, -3.4028235e+38, %v5334_v48  ;;  %vm6613_vm11 = vmmov %vm6599_vm10 }
 0x404   :  { %v2395_v34 = vsub.f32 %v5409_v5, %v2335_v49  ;;  %3165 = vlog2.f32 %v2300_v44  ;;  %v5569_v33 = vsel %vm1778_vm12, -3.4028235e+38, %v5345_v27  ;;  %v5575_v43 = vld [vmem:[%s6244_s7 + $0xb8] sm:$0xff]  ;;  %v5577_v48 = vmul.f32 0.6931472, %v3160_v2  ;;  %v3162_v27 = vpop.eup %3161  ;;  %v6614_v49 = vld [vmem:[#allocation48_spill] sm:$0xff]  ;;  %vm6615_vm7 = vmmov %vm6599_vm10 }
 0x405   :  { %v2046_v0 = vadd.f32 %v2014_v26, %v4722_v57  ;;  %v5582_v20 = vsel %vm1779_vm14, -3.4028235e+38, %v5350_v51  ;;  %v1824_v5 = vadd.f32 1e-06, %v1792_v15  ;;  %v5586_v23 = vmul.f32 %v5575_v43, %v5575_v43  ;;  %2525 = vst.msk [vmem:[%s6245_s8 + $0x28] sm:$0xff] %vm6615_vm7, %v3162_v27  ;;  %vm6629_vm14 = vmmov %vm6615_vm7 }
 0x406   :  { %v2433_v57 = vsel %vm6613_vm11, %v2395_v34, 0.0  ;;  %v1825_v53 = vadd.f32 1e-06, %v1793_v42  ;;  %v1855_v2 = vsel %vm4640_vm9, %v1823_v24, %v6614_v49  ;;  %v2237_v44 = vmul.f32 %v3162_v27, %v3162_v27  ;;  %v6616_v42 = vld [vmem:[#allocation25_spill] sm:$0xff]  ;;  %vm6633_vm12 = vmmov %vm6615_vm7 }
 0x407   :  { %6612 = vst [vmem:[#allocation35_spill] sm:$0xff] %v5586_v23  ;;  %3167 = vtanh.f32 %v2046_v0  ;;  %2434 = vadd.xlane.f32.xlu0 %v2433_v57  ;;  %v1826_v62 = vadd.f32 1e-06, %v1794_v50  ;;  %v1827_v26 = vadd.f32 1e-06, %v1795_v46  ;;  %v5593_v51 = vmul.f32 -0.5, %v5314_v35  ;;  %vm6636_vm15 = vmmov %vm6615_vm7 }
 0x408   :  { %v1828_v15 = vadd.f32 1e-06, %v1796_v40  ;;  %v1829_v34 = vadd.f32 1e-06, %v1797_v30  ;;  %v5599_v0 = vadd.f32 1e-06, %v1798_v61  ;;  %3169 = vlog2.f32 %v1823_v24  ;;  %vm6638_vm10 = vmmov %vm6615_vm7 }
 0x409   :  { %v1949_v57 = vsel %vm4640_vm9, %v5577_v48, %v6616_v42  ;;  %v2269_v50 = vsub.f32 1.0, %v2237_v44  ;;  %v5605_v46 = vadd.f32 1e-06, %v1799_v58  ;;  %v6617_v35 = vld [vmem:[#allocation91_spill] sm:$0xff]  ;;  %v5608_v25 = vadd.f32 1e-06, %v1800_v3  ;;  %vm6640_vm0 = vmmov %vm6615_vm7 }
 0x40a   :  { %v2015_v49 = vmul.f32 %v6617_v35, %v1855_v2  ;;  %v1856_v40 = vsel %vm4640_vm9, %v1824_v5, %v6618_v56  ;;  %3171 = vlog2.f32 %v1824_v5  ;;  %v6619_v30 = vld [vmem:[#allocation52_spill] sm:$0xff]  ;;  %v3164_v24 = vpop.eup %3163  ;;  %v6621_v2 = vld [vmem:[#allocation93_spill] sm:$0xff]  ;;  %v6622_v35 = vld [vmem:[#allocation58_spill] sm:$0xff] }
 0x40b   :  { %v1857_v61 = vsel %vm4640_vm9, %v1825_v53, %v6619_v30  ;;  %v2301_v27 = vadd.f32 1e-07, %v2269_v50  ;;  %v6620_v44 = vld [vmem:[#allocation92_spill] sm:$0xff]  ;;  %3173 = vlog2.f32 %v1825_v53  ;;  %v1893_v42 = vmul.f32 0.6931472, %v3164_v24  ;;  %v6623_v5 = vld [vmem:[#allocation94_spill] sm:$0xff]  ;;  %vm6641_vm4 = vmmov %vm6640_vm0 }
 0x40c   :  { %v2047_v48 = vadd.f32 %v2015_v49, %v4728_v37  ;;  %v2016_v58 = vmul.f32 %v6620_v44, %v1856_v40  ;;  %v2017_v3 = vmul.f32 %v6621_v2, %v1857_v61  ;;  %v1858_v32 = vsel %vm4640_vm9, %v1826_v62, %v6622_v35  ;;  %v6624_v23 = vld [vmem:[#allocation56_spill] sm:$0xff]  ;;  %v6631_v35 = vld [vmem:[#allocation98_spill] sm:$0xff]  ;;  %vm6643_vm8 = vmmov %vm6640_vm0 }
 0x40d   :  { %3175 = vlog2.f32 %v1826_v62  ;;  %v2018_v30 = vmul.f32 %v6623_v5, %v1858_v32  ;;  %v1859_v37 = vsel %vm4640_vm9, %v1827_v26, %v6624_v23  ;;  %v5628_v53 = vadd.f32 1e-06, %v5500_v17  ;;  %v6625_v40 = vld [vmem:[#allocation96_spill] sm:$0xff]  ;;  %vm6645_vm13 = vmmov %vm6640_vm0 }
 0x40e   :  { %3177 = vlog2.f32 %v2301_v27  ;;  %v2048_v56 = vadd.f32 %v2016_v58, %v4734_v38  ;;  %v3166_v50 = vpop.eup %3165  ;;  %v2049_v49 = vadd.f32 %v2017_v3, %v4740_v47  ;;  %v2019_v61 = vmul.f32 %v6625_v40, %v1859_v37  ;;  %v6626_v27 = vld [vmem:[#allocation62_spill] sm:$0xff]  ;;  %v6628_v58 = vld [vmem:[#allocation28_spill] sm:$0xff]  ;;  %vm6648_vm3 = vmmov %vm6640_vm0 }
 0x40f   :  { %3179 = vtanh.f32 %v2047_v48  ;;  %v2337_v24 = vmul.f32 0.6931472, %v3166_v50  ;;  %v5633_v62 = vadd.f32 1e-06, %v5510_v31  ;;  %v2050_v38 = vadd.f32 %v2018_v30, %v4746_v63  ;;  %v6627_v48 = vld [vmem:[#allocation61_spill] sm:$0xff]  ;;  %v6632_v5 = vld [vmem:[#allocation64_spill] sm:$0xff]  ;;  %vm6650_vm5 = vmmov %vm6640_vm0 }
 0x410   :  { %3181 = vtanh.f32 %v2048_v56  ;;  %v2051_v23 = vadd.f32 %v2019_v61, %v4752_v29  ;;  %v1860_v17 = vsel %vm4640_vm9, %v1828_v15, %v6626_v27  ;;  %v1861_v47 = vsel %vm4640_vm9, %v1829_v34, %v6627_v48  ;;  %v6630_v29 = vld [vmem:[#allocation97_spill] sm:$0xff]  ;;  %vm6653_vm6 = vmmov %vm6640_vm0 }
 0x411   :  { %v3168_v32 = vpop.eup %3167  ;;  %3183 = vtanh.f32 %v2049_v49  ;;  %v2396_v44 = vsub.f32 %v5549_v11, %v2337_v24  ;;  %v1950_v31 = vsel %vm4640_vm9, %v1893_v42, %v6628_v58  ;;  %v2020_v3 = vmul.f32 %v6630_v29, %v1860_v17  ;;  %vm6659_vm1 = vmmov %vm6640_vm0 }
 0x412   :  { %v2238_v2 = vmul.f32 %v3168_v32, %v3168_v32  ;;  %3185 = vtanh.f32 %v2050_v38  ;;  %2526 = vst.msk [vmem:[%s6245_s8 + $0x30] sm:$0xff] %vm6629_vm14, %v3168_v32  ;;  %v3170_v63 = vpop.eup %3169  ;;  %v2021_v56 = vmul.f32 %v6631_v35, %v1861_v47  ;;  %v1862_v11 = vsel %vm4640_vm9, %v5599_v0, %v6632_v5  ;;  %v6634_v32 = vld [vmem:[#allocation101_spill] sm:$0xff]  ;;  %v6637_v35 = vld [vmem:[#allocation30_spill] sm:$0xff]  ;;  %vm6667_vm2 = vmmov %vm6640_vm0 }
 0x413   :  { %3187 = vlog2.f32 %v1827_v26  ;;  %v2436_v42 = vsel %vm6633_vm12, %v2396_v44, 0.0  ;;  %v1895_v37 = vmul.f32 0.6931472, %v3170_v63  ;;  %v2173_v49 = vsub.f32 %v4654_v10, %v1949_v57  ;;  %vm6668_vm11 = vmmov %vm6640_vm0 }
 0x414   :  { %v2270_v30 = vsub.f32 1.0, %v2238_v2  ;;  %3189 = vtanh.f32 %v2051_v23  ;;  %v3172_v50 = vpop.eup %3171  ;;  %2437 = vadd.xlane.f32.xlu1 %v2436_v42  ;;  %v2174_v26 = vsub.f32 %v4656_v6, %v1950_v31  ;;  %v2052_v40 = vadd.f32 %v2020_v3, %v4758_v45  ;;  %vm6670_vm7 = vmmov %vm6640_vm0 }
 0x415   :  { %3191 = vlog2.f32 %v1828_v15  ;;  %v3174_v61 = vpop.eup %3173  ;;  %v2053_v38 = vadd.f32 %v2021_v56, %v4764_v1  ;;  %v2022_v27 = vmul.f32 %v6634_v32, %v1862_v11  ;;  %v5664_v48 = vadd.f32 1e-06, %v5515_v7  ;;  %v6635_v1 = vld [vmem:[#allocation27_spill] sm:$0xff]  ;;  %v5681_v7 = vld [vmem:[%s6244_s7 + $0xc0] sm:$0xff]  ;;  %vm6673_vm14 = vmmov %vm6640_vm0 }
 0x416   :  { %v2302_v24 = vadd.f32 1e-07, %v2270_v30  ;;  %3193 = vlog2.f32 %v1829_v34  ;;  %v5667_v23 = vadd.f32 1e-06, %v5520_v28  ;;  %v1897_v10 = vmul.f32 0.6931472, %v3172_v50  ;;  %vm6675_vm12 = vmmov %vm6640_vm0 }
 0x417   :  { %v3176_v17 = vpop.eup %3175  ;;  %3195 = vtanh.f32 %v2052_v40  ;;  %v5670_v45 = vadd.f32 1e-06, %v5525_v8  ;;  %v5673_v15 = vadd.f32 1e-06, %v5533_v9  ;;  %v1951_v34 = vsel %vm4640_vm9, %v1895_v37, %v6635_v1  ;;  %v6639_v37 = vld [vmem:[#allocation63_spill] sm:$0xff]  ;;  %v6642_v40 = vld [vmem:[#allocation29_spill] sm:$0xff] }
 0x418   :  { %v3178_v6 = vpop.eup %3177  ;;  %3197 = vlog2.f32 %v2302_v24  ;;  %v2693_v57 = vadd.f32 -0.9189385, %v2173_v49  ;;  %v1899_v44 = vmul.f32 0.6931472, %v3174_v61  ;;  %v5685_v8 = vmul.f32 %v5681_v7, %v5681_v7 }
 0x419   :  { %v3180_v28 = vpop.eup %3179  ;;  %v2339_v47 = vmul.f32 0.6931472, %v3178_v6  ;;  %v5687_v9 = vadd.f32 -0.9189385, %v2174_v26  ;;  %3199 = vtanh.f32 %v2053_v38  ;;  %v2054_v2 = vadd.f32 %v2022_v27, %v4770_v13  ;;  %v6644_v27 = vld [vmem:[#allocation106_spill] sm:$0xff] }
 0x41a   :  { %v3182_v58 = vpop.eup %3181  ;;  %v2239_v31 = vmul.f32 %v3180_v28, %v3180_v28  ;;  %2527 = vst.msk [vmem:[%s6245_s8 + $0x38] sm:$0xff] %vm6636_vm15, %v3180_v28  ;;  %v2175_v3 = vsub.f32 %v4660_v22, %v1951_v34  ;;  %v1952_v56 = vsel %vm4640_vm9, %v1897_v10, %v6637_v35  ;;  %v1901_v30 = vmul.f32 0.6931472, %v3176_v17  ;;  %vm6679_vm15 = vmmov %vm6640_vm0 }
 0x41b   :  { %v3184_v63 = vpop.eup %3183  ;;  %v2397_v29 = vsub.f32 %v2693_v57, %v2339_v47  ;;  %v2240_v5 = vmul.f32 %v3182_v58, %v3182_v58  ;;  %2528 = vst.msk [vmem:[%s6245_s8 + $0x40] sm:$0xff] %vm6638_vm10, %v3182_v58  ;;  %v1863_v50 = vsel %vm4640_vm9, %v5605_v46, %v6639_v37  ;;  %v1953_v61 = vsel %vm4640_vm9, %v1899_v44, %v6642_v40  ;;  %v6646_v44 = vld [vmem:[#allocation107_spill] sm:$0xff]  ;;  %vm6680_vm10 = vmmov %vm6640_vm0 }
 0x41c   :  { %v3186_v13 = vpop.eup %3185  ;;  %v2271_v11 = vsub.f32 1.0, %v2239_v31  ;;  %v2241_v42 = vmul.f32 %v3184_v63, %v3184_v63  ;;  %2529 = vst.msk [vmem:[%s6245_s8 + $0x48] sm:$0xff] %vm6640_vm0, %v3184_v63  ;;  %v2176_v17 = vsub.f32 %v6644_v27, %v1952_v56  ;;  %3201 = vtanh.f32 %v2054_v2  ;;  %v6647_v2 = vld [vmem:[#allocation32_spill] sm:$0xff] }
 0x41d   :  { %v3188_v22 = vpop.eup %3187  ;;  %v2439_v49 = vsel %vm6641_vm4, %v2397_v29, 0.0  ;;  %v2272_v26 = vsub.f32 1.0, %v2240_v5  ;;  %v2242_v24 = vmul.f32 %v3186_v13, %v3186_v13  ;;  %2530 = vst.msk [vmem:[%s6245_s8 + $0x50] sm:$0xff] %vm6643_vm8, %v3186_v13  ;;  %3203 = vlog2.f32 %v5599_v0  ;;  %vm6684_vm4 = vmmov %vm6640_vm0 }
 0x41e   :  { %v3190_v38 = vpop.eup %3189  ;;  %2440 = vadd.xlane.f32.xlu0 %v2439_v49  ;;  %v2303_v32 = vadd.f32 1e-07, %v2271_v11  ;;  %v2273_v10 = vsub.f32 1.0, %v2241_v42  ;;  %v5724_v47 = vadd.f32 -0.9189385, %v2175_v3  ;;  %v2177_v58 = vsub.f32 %v6646_v44, %v1953_v61  ;;  %vm6685_vm8 = vmmov %vm6640_vm0 }
 0x41f   :  { %v3192_v6 = vpop.eup %3191  ;;  %v2304_v1 = vadd.f32 1e-07, %v2272_v26  ;;  %v2274_v34 = vsub.f32 1.0, %v2242_v24  ;;  %v2243_v28 = vmul.f32 %v3190_v38, %v3190_v38  ;;  %2531 = vst.msk [vmem:[%s6245_s8 + $0x58] sm:$0xff] %vm6645_vm13, %v3190_v38  ;;  %v1954_v29 = vsel %vm4640_vm9, %v1901_v30, %v6647_v2  ;;  %v6649_v26 = vld [vmem:[#allocation108_spill] sm:$0xff]  ;;  %vm6687_vm13 = vmmov %vm6640_vm0 }
 0x420   :  { %v3194_v57 = vpop.eup %3193  ;;  %3205 = vlog2.f32 %v2303_v32  ;;  %v2305_v31 = vadd.f32 1e-07, %v2273_v10  ;;  %v5730_v5 = vadd.f32 -0.9189385, %v2176_v17  ;;  %v1903_v13 = vmul.f32 0.6931472, %v3188_v22 }
 0x421   :  { %v3196_v63 = vpop.eup %3195  ;;  %3207 = vlog2.f32 %v2304_v1  ;;  %v2306_v35 = vadd.f32 1e-07, %v2274_v34  ;;  %v2275_v0 = vsub.f32 1.0, %v2243_v28  ;;  %v1905_v37 = vmul.f32 0.6931472, %v3192_v6  ;;  %v3323_v22 = vld [vmem:[%s6244_s7 + $0x78] sm:$0xff] }
 0x422   :  { %v3198_v56 = vpop.eup %3197  ;;  %3209 = vlog2.f32 %v2305_v31  ;;  %v2244_v11 = vmul.f32 %v3196_v63, %v3196_v63  ;;  %2532 = vst.msk [vmem:[%s6245_s8 + $0x60] sm:$0xff] %vm6648_vm3, %v3196_v63  ;;  %v2178_v30 = vsub.f32 %v6649_v26, %v1954_v29  ;;  %v2023_v61 = vmul.f32 %v3323_v22, %v1863_v50  ;;  %v6651_v10 = vld [vmem:[#allocation2_spill] sm:$0xff]  ;;  %v6661_v26 = vld [vmem:[#allocation111_spill] sm:$0xff]  ;;  %vm6690_vm3 = vmmov %vm6640_vm0 }
 0x423   :  { %v2341_v3 = vmul.f32 0.6931472, %v3198_v56  ;;  %3211 = vlog2.f32 %v2306_v35  ;;  %v2307_v42 = vadd.f32 1e-07, %v2275_v0  ;;  %v3200_v49 = vpop.eup %3199  ;;  %v1907_v38 = vmul.f32 0.6931472, %v3194_v57 }
 0x424   :  { %v2276_v40 = vsub.f32 1.0, %v2244_v11  ;;  %3213 = vlog2.f32 %v5605_v46  ;;  %v2245_v32 = vmul.f32 %v3200_v49, %v3200_v49  ;;  %2533 = vst.msk [vmem:[%s6245_s8 + $0x68] sm:$0xff] %vm6650_vm5, %v3200_v49  ;;  %v2697_v27 = vadd.f32 -0.9189385, %v2177_v58  ;;  %v6652_v46 = vld [vmem:[#allocation67_spill] sm:$0xff]  ;;  %v6655_v28 = vld [vmem:[#allocation34_spill] sm:$0xff]  ;;  %vm6692_vm5 = vmmov %vm6640_vm0 }
 0x425   :  { %v2398_v24 = vsub.f32 %v5687_v9, %v2341_v3  ;;  %3215 = vlog2.f32 %v2307_v42  ;;  %v2055_v6 = vadd.f32 %v2023_v61, %v6651_v10  ;;  %v1864_v1 = vsel %vm4640_vm9, %v5608_v25, %v6652_v46  ;;  %v6654_v9 = vld [vmem:[#allocation31_spill] sm:$0xff]  ;;  %v6656_v63 = vld [vmem:[#allocation18_spill] sm:$0xff]  ;;  %v6658_v56 = vld [vmem:[#allocation33_spill] sm:$0xff] }
 0x426   :  { %v2308_v17 = vadd.f32 1e-07, %v2276_v40  ;;  %v1955_v34 = vsel %vm4640_vm9, %v1903_v13, %v6654_v9  ;;  %v1956_v57 = vsel %vm4640_vm9, %v1905_v37, %v6655_v28  ;;  %v2277_v44 = vsub.f32 1.0, %v2245_v32  ;;  %v3202_v58 = vpop.eup %3201  ;;  %v6657_v29 = vld [vmem:[#allocation66_spill] sm:$0xff]  ;;  %v6662_v40 = vld [vmem:[#allocation4_spill] sm:$0xff]  ;;  %v6663_v32 = vld [vmem:[#allocation79_spill] sm:$0xff] }
 0x427   :  { %v2442_v50 = vsel %vm6653_vm6, %v2398_v24, 0.0  ;;  %v5758_v31 = vadd.f32 -0.9189385, %v2178_v30  ;;  %v2024_v2 = vmul.f32 %v6656_v63, %v1864_v1  ;;  %v1865_v35 = vsel %vm4640_vm9, %v5628_v53, %v6657_v29  ;;  %v3204_v0 = vpop.eup %3203  ;;  %2534 = vst.msk [vmem:[%s6245_s8 + $0x70] sm:$0xff] %vm6659_vm1, %v3202_v58  ;;  %v6660_v37 = vld [vmem:[#allocation110_spill] sm:$0xff]  ;;  %v6664_v46 = vld [vmem:[#allocation112_spill] sm:$0xff]  ;;  %vm6697_vm6 = vmmov %vm6640_vm0 }
 0x428   :  { %2443 = vadd.xlane.f32.xlu1 %v2442_v50  ;;  %3217 = vlog2.f32 %v2308_v17  ;;  %v1957_v13 = vsel %vm4640_vm9, %v1907_v38, %v6658_v56  ;;  %v2309_v11 = vadd.f32 1e-07, %v2277_v44  ;;  %v2246_v3 = vmul.f32 %v3202_v58, %v3202_v58  ;;  %v6666_v29 = vld [vmem:[#allocation3_spill] sm:$0xff]  ;;  %vm6700_vm1 = vmmov %vm6640_vm0 }
 0x429   :  { %3219 = vtanh.f32 %v2055_v6  ;;  %v2179_v49 = vsub.f32 %v6660_v37, %v1955_v34  ;;  %v2180_v30 = vsub.f32 %v6661_v26, %v1956_v57  ;;  %v2056_v22 = vadd.f32 %v2024_v2, %v6662_v40  ;;  %v6669_v26 = vld [vmem:[#allocation37_spill] sm:$0xff] }
 0x42a   :  { %v3206_v42 = vpop.eup %3205  ;;  %3221 = vlog2.f32 %v5608_v25  ;;  %v2278_v38 = vsub.f32 1.0, %v2246_v3  ;;  %v2025_v17 = vmul.f32 %v6663_v32, %v1865_v35  ;;  %v2181_v1 = vsub.f32 %v6664_v46, %v1957_v13  ;;  %v6665_v25 = vld [vmem:[#allocation72_spill] sm:$0xff]  ;;  %v6672_v32 = vld [vmem:[#allocation5_spill] sm:$0xff] }
 0x42b   :  { %v3208_v61 = vpop.eup %3207  ;;  %v2343_v24 = vmul.f32 0.6931472, %v3206_v42  ;;  %3223 = vlog2.f32 %v2309_v11  ;;  %v1909_v50 = vmul.f32 0.6931472, %v3204_v0  ;;  %v1866_v44 = vsel %vm4640_vm9, %v5633_v62, %v6665_v25 }
 0x42c   :  { %v3210_v10 = vpop.eup %3209  ;;  %v2345_v6 = vmul.f32 0.6931472, %v3208_v61  ;;  %3225 = vtanh.f32 %v2056_v22  ;;  %v2310_v57 = vadd.f32 1e-07, %v2278_v38  ;;  %v2057_v35 = vadd.f32 %v2025_v17, %v6666_v29  ;;  %v6671_v61 = vld [vmem:[#allocation69_spill] sm:$0xff] }
 0x42d   :  { %v3212_v9 = vpop.eup %3211  ;;  %v2399_v34 = vsub.f32 %v5724_v47, %v2343_v24  ;;  %v2347_v28 = vmul.f32 0.6931472, %v3210_v10  ;;  %3227 = vlog2.f32 %v5628_v53  ;;  %v2699_v47 = vadd.f32 -0.9189385, %v2179_v49 }
 0x42e   :  { %v3214_v58 = vpop.eup %3213  ;;  %v2400_v63 = vsub.f32 %v5730_v5, %v2345_v6  ;;  %v2349_v2 = vmul.f32 0.6931472, %v3212_v9  ;;  %3229 = vlog2.f32 %v2310_v57  ;;  %v2700_v5 = vadd.f32 -0.9189385, %v2180_v30  ;;  %v6676_v9 = vld [vmem:[#allocation114_spill] sm:$0xff] }
 0x42f   :  { %v3216_v0 = vpop.eup %3215  ;;  %v2445_v56 = vsel %vm6667_vm2, %v2399_v34, 0.0  ;;  %v2401_v13 = vsub.f32 %v2697_v27, %v2347_v28  ;;  %3231 = vtanh.f32 %v2057_v35  ;;  %v2701_v37 = vadd.f32 -0.9189385, %v2181_v1  ;;  %v6677_v28 = vld [vmem:[#allocation6_spill] sm:$0xff]  ;;  %vm6703_vm2 = vmmov %vm6640_vm0 }
 0x430   :  { %2446 = vadd.xlane.f32.xlu0 %v2445_v56  ;;  %v2448_v11 = vsel %vm6668_vm11, %v2400_v63, 0.0  ;;  %v2402_v3 = vsub.f32 %v5758_v31, %v2349_v2  ;;  %v2351_v42 = vmul.f32 0.6931472, %v3216_v0  ;;  %v1958_v53 = vsel %vm4640_vm9, %v1909_v50, %v6669_v26  ;;  %vm6704_vm11 = vmmov %vm6640_vm0 }
 0x431   :  { %2449 = vadd.xlane.f32.xlu1 %v2448_v11  ;;  %v2026_v40 = vmul.f32 %v5300_v14, %v1866_v44  ;;  %v2451_v27 = vsel %vm6670_vm7, %v2401_v13, 0.0  ;;  %v1911_v49 = vmul.f32 0.6931472, %v3214_v58  ;;  %3233 = vlog2.f32 %v5633_v62  ;;  %v6674_v62 = vld [vmem:[#allocation86_spill] sm:$0xff]  ;;  %v6678_v44 = vld [vmem:[#allocation36_spill] sm:$0xff]  ;;  %vm6708_vm7 = vmmov %vm6640_vm0 }
 0x432   :  { %v3218_v22 = vpop.eup %3217  ;;  %v1867_v31 = vsel %vm4640_vm9, %v5664_v48, %v6671_v61  ;;  %v2403_v30 = vsub.f32 %v2699_v47, %v2351_v42  ;;  %v2454_v14 = vsel %vm6673_vm14, %v2402_v3, 0.0  ;;  %3235 = vlog2.f32 %v5664_v48  ;;  %v6681_v3 = vld [vmem:[#allocation7_spill] sm:$0xff]  ;;  %vm6709_vm14 = vmmov %vm6640_vm0 }
 0x433   :  { %v3220_v24 = vpop.eup %3219  ;;  %v2353_v38 = vmul.f32 0.6931472, %v3218_v22  ;;  %v2058_v17 = vadd.f32 %v2026_v40, %v6672_v32  ;;  %v2027_v10 = vmul.f32 %v5319_v18, %v1867_v31  ;;  %v1868_v1 = vsel %vm4640_vm9, %v5667_v23, %v6674_v62  ;;  %v6682_v40 = vld [vmem:[#allocation75_spill] sm:$0xff]  ;;  %v6686_v32 = vld [vmem:[#allocation41_spill] sm:$0xff] }
 0x434   :  { %v3222_v6 = vpop.eup %3221  ;;  %2452 = vadd.xlane.f32.xlu0 %v2451_v27  ;;  %v2247_v46 = vmul.f32 %v3220_v24, %v3220_v24  ;;  %2535 = vst.msk [vmem:[%s6245_s8 + $0x78] sm:$0xff] %vm6675_vm12, %v3220_v24  ;;  %v2182_v34 = vsub.f32 %v6676_v9, %v1958_v53  ;;  %v1959_v58 = vsel %vm4640_vm9, %v1911_v49, %v6678_v44  ;;  %v2457_v29 = vsel %vm6679_vm15, %v2403_v30, 0.0  ;;  %v6683_v61 = vld [vmem:[#allocation115_spill] sm:$0xff]  ;;  %v6688_v9 = vld [vmem:[#allocation44_spill] sm:$0xff]  ;;  %vm6713_vm12 = vmmov %vm6640_vm0 }
 0x435   :  { %v3224_v50 = vpop.eup %3223  ;;  %2455 = vadd.xlane.f32.xlu1 %v2454_v14  ;;  %v2404_v18 = vsub.f32 %v2700_v5, %v2353_v38  ;;  %3237 = vtanh.f32 %v2058_v17  ;;  %v2059_v57 = vadd.f32 %v2027_v10, %v6677_v28  ;;  %v2028_v2 = vmul.f32 %v5430_v60, %v1868_v1  ;;  %v6691_v44 = vld [vmem:[#allocation40_spill] sm:$0xff]  ;;  %vm6714_vm15 = vmmov %vm6640_vm0 }
 0x436   :  { %v3226_v25 = vpop.eup %3225  ;;  %v2355_v48 = vmul.f32 0.6931472, %v3224_v50  ;;  %v2279_v63 = vsub.f32 1.0, %v2247_v46  ;;  %v1913_v35 = vmul.f32 0.6931472, %v3222_v6  ;;  %v1869_v22 = vsel %vm4640_vm9, %v5670_v45, %v6682_v40  ;;  %v6695_v40 = vld [vmem:[#allocation47_spill] sm:$0xff] }
 0x437   :  { %v2248_v0 = vmul.f32 %v3226_v25, %v3226_v25  ;;  %3239 = vtanh.f32 %v2059_v57  ;;  %2536 = vst.msk [vmem:[%s6245_s8 + $0x80] sm:$0xff] %vm6680_vm10, %v3226_v25  ;;  %v3228_v56 = vpop.eup %3227  ;;  %v2460_v13 = vsel %vm6640_vm0, %v2404_v18, 0.0  ;;  %v2060_v42 = vadd.f32 %v2028_v2, %v6681_v3  ;;  %vm6715_vm10 = vmmov %vm6640_vm0 }
 0x438   :  { %2458 = vadd.xlane.f32.xlu0 %v2457_v29  ;;  %v2405_v47 = vsub.f32 %v2701_v37, %v2355_v48  ;;  %v2311_v11 = vadd.f32 1e-07, %v2279_v63  ;;  %v3230_v5 = vpop.eup %3229  ;;  %v5825_v60 = vadd.f32 1e-06, %v5538_v36  ;;  %v5828_v26 = vadd.f32 1e-06, %v5554_v55 }
 0x439   :  { %2461 = vadd.xlane.f32.xlu1 %v2460_v13  ;;  %v2280_v53 = vsub.f32 1.0, %v2248_v0  ;;  %v3232_v27 = vpop.eup %3231  ;;  %v2702_v49 = vadd.f32 -0.9189385, %v2182_v34  ;;  %v2357_v37 = vmul.f32 0.6931472, %v3230_v5  ;;  %v2183_v31 = vsub.f32 %v6683_v61, %v1959_v58 }
 0x43a   :  { %3241 = vlog2.f32 %v2311_v11  ;;  %v2463_v24 = vsel %vm6684_vm4, %v2405_v47, 0.0  ;;  %v2249_v30 = vmul.f32 %v3232_v27, %v3232_v27  ;;  %2537 = vst.msk [vmem:[%s6245_s8 + $0x88] sm:$0xff] %vm6685_vm8, %v3232_v27  ;;  %v1960_v17 = vsel %vm4640_vm9, %v1913_v35, %v6686_v32  ;;  %v6694_v47 = vld [vmem:[#allocation95_spill] sm:$0xff]  ;;  %vm6720_vm4 = vmmov %vm6640_vm0 }
 0x43b   :  { %v2312_v36 = vadd.f32 1e-07, %v2280_v53  ;;  %3243 = vtanh.f32 %v2060_v42  ;;  %v3234_v55 = vpop.eup %3233  ;;  %v2406_v38 = vsub.f32 %v2702_v49, %v2357_v37  ;;  %v2029_v10 = vmul.f32 %v5476_v12, %v1869_v22  ;;  %v6696_v49 = vld [vmem:[#allocation45_spill] sm:$0xff]  ;;  %vm6721_vm8 = vmmov %vm6640_vm0 }
 0x43c   :  { %2464 = vadd.xlane.f32.xlu0 %v2463_v24  ;;  %3245 = vlog2.f32 %v5667_v23  ;;  %v5846_v6 = vadd.f32 1e-06, %v5559_v4  ;;  %v1915_v14 = vmul.f32 0.6931472, %v3228_v56  ;;  %v2281_v46 = vsub.f32 1.0, %v2249_v30  ;;  %v3236_v62 = vpop.eup %3235  ;;  %v6693_v56 = vld [vmem:[#allocation9_spill] sm:$0xff] }
 0x43d   :  { %3247 = vlog2.f32 %v2312_v36  ;;  %v5849_v1 = vadd.f32 1e-06, %v5569_v33  ;;  %v5852_v50 = vadd.f32 1e-06, %v5582_v20  ;;  %v2466_v18 = vsel %vm6687_vm13, %v2406_v38, 0.0  ;;  %v6689_v33 = vld [vmem:[#allocation99_spill] sm:$0xff] }
 0x43e   :  { %v2061_v34 = vadd.f32 %v2029_v10, %v6688_v9  ;;  %2467 = vadd.xlane.f32.xlu1 %v2466_v18  ;;  %v2703_v12 = vadd.f32 -0.9189385, %v2183_v31  ;;  %v2184_v4 = vsub.f32 %v5528_v41, %v1960_v17  ;;  %v2313_v28 = vadd.f32 1e-07, %v2281_v46  ;;  %v6698_v24 = vld [vmem:[#allocation8_spill] sm:$0xff] }
 0x43f   :  { %v3238_v23 = vpop.eup %3237  ;;  %3249 = vlog2.f32 %v5670_v45  ;;  %v2154_v57 = vmul.f32 -0.5, %v5338_v16  ;;  %v1870_v20 = vsel %vm4640_vm9, %v5673_v15, %v6689_v33  ;;  %v1961_v41 = vsel %vm4640_vm9, %v1915_v14, %v6691_v44  ;;  %v6702_v33 = vld [vmem:[#allocation102_spill] sm:$0xff]  ;;  %v6705_v44 = vld [vmem:[#allocation53_spill] sm:$0xff] }
 0x440   :  { %v2250_v25 = vmul.f32 %v3238_v23, %v3238_v23  ;;  %3251 = vtanh.f32 %v2061_v34  ;;  %2538 = vst.msk [vmem:[%s6245_s8 + $0x90] sm:$0xff] %vm6690_vm3, %v3238_v23  ;;  %v1917_v45 = vmul.f32 0.6931472, %v3234_v55  ;;  %v2030_v16 = vmul.f32 %v5546_v54, %v1870_v20 }
 0x441   :  { %v3240_v48 = vpop.eup %3239  ;;  %3253 = vlog2.f32 %v2313_v28  ;;  %v1919_v63 = vmul.f32 0.6931472, %v3236_v62  ;;  %v2155_v2 = vmul.f32 -0.5, %v5354_v21  ;;  %v2704_v35 = vadd.f32 -0.9189385, %v2184_v4  ;;  %v6701_v28 = vld [vmem:[#allocation50_spill] sm:$0xff] }
 0x442   :  { %v2282_v58 = vsub.f32 1.0, %v2250_v25  ;;  %v2251_v29 = vmul.f32 %v3240_v48, %v3240_v48  ;;  %2539 = vst.msk [vmem:[%s6245_s8 + $0x98] sm:$0xff] %vm6692_vm5, %v3240_v48  ;;  %v5877_v0 = vmul.f32 -0.5, %v5443_v39  ;;  %v2062_v13 = vadd.f32 %v2030_v16, %v6693_v56  ;;  %v6706_v16 = vld [vmem:[#allocation109_spill] sm:$0xff]  ;;  %vm6725_vm5 = vmmov %vm6640_vm0 }
 0x443   :  { %v1871_v54 = vsel %vm4640_vm9, %v5825_v60, %v6694_v47  ;;  %v2185_v21 = vsub.f32 %v5593_v51, %v1961_v41  ;;  %3255 = vlog2.f32 %v5673_v15  ;;  %v1962_v39 = vsel %vm4640_vm9, %v1917_v45, %v6695_v40 }
 0x444   :  { %v3242_v11 = vpop.eup %3241  ;;  %v2314_v3 = vadd.f32 1e-07, %v2282_v58  ;;  %v2283_v42 = vsub.f32 1.0, %v2251_v29  ;;  %3257 = vtanh.f32 %v2062_v13  ;;  %v2031_v22 = vmul.f32 %v5575_v43, %v1871_v54  ;;  %v6699_v43 = vld [vmem:[#allocation104_spill] sm:$0xff] }
 0x445   :  { %v3244_v5 = vpop.eup %3243  ;;  %v2359_v53 = vmul.f32 0.6931472, %v3242_v11  ;;  %v1963_v37 = vsel %vm4640_vm9, %v1919_v63, %v6696_v49  ;;  %v1872_v30 = vsel %vm4640_vm9, %v5828_v26, %v6699_v43  ;;  %v2705_v38 = vadd.f32 -0.9189385, %v2185_v21 }
 0x446   :  { %v3246_v27 = vpop.eup %3245  ;;  %3259 = vlog2.f32 %v2314_v3  ;;  %v2315_v51 = vadd.f32 1e-07, %v2283_v42  ;;  %v2252_v61 = vmul.f32 %v3244_v5, %v3244_v5  ;;  %2540 = vst.msk [vmem:[%s6245_s8 + $0xa0] sm:$0xff] %vm6697_vm6, %v3244_v5  ;;  %v2063_v36 = vadd.f32 %v2031_v22, %v6698_v24  ;;  %v5954_v24 = vld [vmem:[%s6244_s7 + $0xd8] sm:$0xff]  ;;  %vm6726_vm6 = vmmov %vm6640_vm0 }
 0x447   :  { %v3248_v15 = vpop.eup %3247  ;;  %v2407_v31 = vsub.f32 %v2703_v12, %v2359_v53  ;;  %3261 = vlog2.f32 %v5825_v60  ;;  %v1921_v14 = vmul.f32 0.6931472, %v3246_v27  ;;  %v2032_v46 = vmul.f32 %v5681_v7, %v1872_v30  ;;  %v2001_v60 = vld [vmem:[%s6244_s7 + $0xc8] sm:$0xff] }
 0x448   :  { %v2361_v55 = vmul.f32 0.6931472, %v3248_v15  ;;  %3263 = vlog2.f32 %v2315_v51  ;;  %v2284_v32 = vsub.f32 1.0, %v2252_v61  ;;  %v2186_v9 = vsub.f32 %v2154_v57, %v1962_v39  ;;  %v6710_v27 = vld [vmem:[#allocation51_spill] sm:$0xff]  ;;  %v6711_v51 = vld [vmem:[#allocation10_spill] sm:$0xff]  ;;  %v6712_v15 = vld [vmem:[#allocation105_spill] sm:$0xff] }
 0x449   :  { %v3250_v17 = vpop.eup %3249  ;;  %v2469_v10 = vsel %vm6700_vm1, %v2407_v31, 0.0  ;;  %3265 = vtanh.f32 %v2063_v36  ;;  %v2187_v34 = vsub.f32 %v2155_v2, %v1963_v37  ;;  %v2064_v25 = vadd.f32 %v2032_v46, %v6701_v28  ;;  %v6717_v28 = vld [vmem:[#allocation13_spill] sm:$0xff] }
 0x44a   :  { %v3252_v62 = vpop.eup %3251  ;;  %2470 = vadd.xlane.f32.xlu0 %v2469_v10  ;;  %v2408_v18 = vsub.f32 %v2704_v35, %v2361_v55  ;;  %v2316_v23 = vadd.f32 1e-07, %v2284_v32  ;;  %3267 = vlog2.f32 %v5828_v26  ;;  %v1873_v7 = vsel %vm4640_vm9, %v5846_v6, %v6702_v33  ;;  %v5922_v26 = vld [vmem:[%s6244_s7 + $0xd0] sm:$0xff]  ;;  %v6707_v35 = vld [vmem:[#allocation11_spill] sm:$0xff] }
 0x44b   :  { %v3254_v12 = vpop.eup %3253  ;;  %v2253_v4 = vmul.f32 %v3252_v62, %v3252_v62  ;;  %2541 = vst.msk [vmem:[%s6245_s8 + $0xa8] sm:$0xff] %vm6703_vm2, %v3252_v62  ;;  %v2033_v48 = vmul.f32 %v2001_v60, %v1873_v7  ;;  %v1964_v41 = vsel %vm4640_vm9, %v1921_v14, %v6705_v44  ;;  %v1874_v58 = vsel %vm4640_vm9, %v5849_v1, %v6706_v16  ;;  %v6718_v7 = vld [vmem:[#allocation35_spill] sm:$0xff]  ;;  %vm6731_vm2 = vmmov %vm6640_vm0 }
 0x44c   :  { %v2472_v57 = vsel %vm6704_vm11, %v2408_v18, 0.0  ;;  %v2363_v20 = vmul.f32 0.6931472, %v3254_v12  ;;  %3269 = vlog2.f32 %v2316_v23  ;;  %v1923_v29 = vmul.f32 0.6931472, %v3250_v17  ;;  %v6716_v12 = vld [vmem:[#allocation57_spill] sm:$0xff]  ;;  %vm6732_vm11 = vmmov %vm6640_vm0 }
 0x44d   :  { %2473 = vadd.xlane.f32.xlu1 %v2472_v57  ;;  %v2285_v45 = vsub.f32 1.0, %v2253_v4  ;;  %3271 = vtanh.f32 %v2064_v25  ;;  %v3256_v63 = vpop.eup %3255  ;;  %v2065_v56 = vadd.f32 %v2033_v48, %v6707_v35  ;;  %v2157_v47 = vmul.f32 -0.5, %v5489_v59 }
 0x44e   :  { %v2409_v2 = vsub.f32 %v2705_v38, %v2363_v20  ;;  %3273 = vlog2.f32 %v5846_v6  ;;  %v3258_v13 = vpop.eup %3257  ;;  %v5934_v11 = vmul.f32 %v2001_v60, %v2001_v60  ;;  %v2034_v21 = vmul.f32 %v5922_v26, %v1874_v58 }
 0x44f   :  { %v2317_v54 = vadd.f32 1e-07, %v2285_v45  ;;  %v2706_v5 = vadd.f32 -0.9189385, %v2186_v9  ;;  %v2254_v53 = vmul.f32 %v3258_v13, %v3258_v13  ;;  %3275 = vtanh.f32 %v2065_v56  ;;  %2542 = vst.msk [vmem:[%s6245_s8 + $0xb0] sm:$0xff] %vm6709_vm14, %v3258_v13  ;;  %v6719_v45 = vld [vmem:[#allocation55_spill] sm:$0xff]  ;;  %vm6737_vm14 = vmmov %vm6640_vm0 }
 0x450   :  { %v3260_v3 = vpop.eup %3259  ;;  %v2475_v42 = vsel %vm6708_vm7, %v2409_v2, 0.0  ;;  %v2707_v59 = vadd.f32 -0.9189385, %v2187_v34  ;;  %v2188_v39 = vsub.f32 %v5877_v0, %v1964_v41  ;;  %v1965_v49 = vsel %vm4640_vm9, %v1923_v29, %v6710_v27 }
 0x451   :  { %v3262_v6 = vpop.eup %3261  ;;  %2476 = vadd.xlane.f32.xlu0 %v2475_v42  ;;  %v2365_v40 = vmul.f32 0.6931472, %v3260_v3  ;;  %3277 = vlog2.f32 %v2317_v54  ;;  %v2286_v37 = vsub.f32 1.0, %v2254_v53  ;;  %v2066_v61 = vadd.f32 %v2034_v21, %v6711_v51  ;;  %v6722_v42 = vld [vmem:[#allocation80_spill] sm:$0xff] }
 0x452   :  { %v3264_v22 = vpop.eup %3263  ;;  %v1875_v31 = vsel %vm4640_vm9, %v5852_v50, %v6712_v15  ;;  %v1925_v30 = vmul.f32 0.6931472, %v3256_v63  ;;  %3279 = vlog2.f32 %v5849_v1  ;;  %v2158_v55 = vmul.f32 -0.5, %v5563_v19 }
 0x453   :  { %v3266_v0 = vpop.eup %3265  ;;  %v2410_v36 = vsub.f32 %v2706_v5, %v2365_v40  ;;  %v2367_v43 = vmul.f32 0.6931472, %v3264_v22  ;;  %v2318_v38 = vadd.f32 1e-07, %v2286_v37  ;;  %3281 = vtanh.f32 %v2066_v61  ;;  %v6723_v40 = vld [vmem:[#allocation19_spill] sm:$0xff] }
 0x454   :  { %v2255_v32 = vmul.f32 %v3266_v0, %v3266_v0  ;;  %2543 = vst.msk [vmem:[%s6245_s8 + $0xb8] sm:$0xff] %vm6713_vm12, %v3266_v0  ;;  %v3268_v17 = vpop.eup %3267  ;;  %v1927_v46 = vmul.f32 0.6931472, %v3262_v6  ;;  %v2035_v60 = vmul.f32 %v5954_v24, %v1875_v31  ;;  %v2708_v1 = vadd.f32 -0.9189385, %v2188_v39  ;;  %vm6741_vm12 = vmmov %vm6640_vm0 }
 0x455   :  { %v2478_v10 = vsel %vm6714_vm15, %v2410_v36, 0.0  ;;  %v2411_v14 = vsub.f32 %v2707_v59, %v2367_v43  ;;  %v2189_v18 = vsub.f32 %v2157_v47, %v1965_v49  ;;  %3283 = vlog2.f32 %v2318_v38  ;;  %v6724_v49 = vld [vmem:[#allocation60_spill] sm:$0xff]  ;;  %v6727_v36 = vld [vmem:[#allocation59_spill] sm:$0xff]  ;;  %v6006_v43 = vld [vmem:[%s6244_s7 + $0xe0] sm:$0xff] }
 0x456   :  { %v3270_v62 = vpop.eup %3269  ;;  %2479 = vadd.xlane.f32.xlu1 %v2478_v10  ;;  %v2287_v19 = vsub.f32 1.0, %v2255_v32  ;;  %v1966_v4 = vsel %vm4640_vm9, %v1925_v30, %v6716_v12  ;;  %v2067_v25 = vadd.f32 %v2035_v60, %v6717_v28  ;;  %v2159_v57 = vmul.f32 -0.5, %v6718_v7  ;;  %vm6744_vm15 = vmmov %vm6640_vm0 }
 0x457   :  { %v3272_v9 = vpop.eup %3271  ;;  %v2481_v34 = vsel %vm6715_vm10, %v2411_v14, 0.0  ;;  %v2369_v23 = vmul.f32 0.6931472, %v3270_v62  ;;  %v2130_v44 = vmul.f32 %v5922_v26, %v5922_v26  ;;  %v1967_v16 = vsel %vm4640_vm9, %v1927_v46, %v6719_v45  ;;  %v6728_v14 = vld [vmem:[#allocation116_spill] sm:$0xff]  ;;  %vm6745_vm10 = vmmov %vm6640_vm0 }
 0x458   :  { %v3274_v33 = vpop.eup %3273  ;;  %2482 = vadd.xlane.f32.xlu0 %v2481_v34  ;;  %v2319_v20 = vadd.f32 1e-07, %v2287_v19  ;;  %v2256_v48 = vmul.f32 %v3272_v9, %v3272_v9  ;;  %2544 = vst.msk [vmem:[%s6245_s8 + $0xc0] sm:$0xff] %vm6640_vm0, %v3272_v9  ;;  %v2160_v58 = vmul.f32 -0.5, %v5685_v8  ;;  %3285 = vtanh.f32 %v2067_v25  ;;  %v6020_v34 = vld [vmem:[%s6244_s7 + $0xe8] sm:$0xff]  ;;  %v6730_v25 = vld [vmem:[#allocation82_spill] sm:$0xff] }
 0x459   :  { %v2412_v41 = vsub.f32 %v2708_v1, %v2369_v23  ;;  %v3276_v63 = vpop.eup %3275  ;;  %v2709_v2 = vadd.f32 -0.9189385, %v2189_v18  ;;  %v2190_v29 = vsub.f32 %v2158_v55, %v1966_v4  ;;  %v1929_v13 = vmul.f32 0.6931472, %v3268_v17 }
 0x45a   :  { %3287 = vlog2.f32 %v2319_v20  ;;  %v2288_v35 = vsub.f32 1.0, %v2256_v48  ;;  %v1931_v47 = vmul.f32 0.6931472, %v3274_v33  ;;  %v2257_v54 = vmul.f32 %v3276_v63, %v3276_v63  ;;  %2545 = vst.msk [vmem:[%s6245_s8 + $0xc8] sm:$0xff] %vm6721_vm8, %v3276_v63  ;;  %vm6746_vm8 = vmmov %vm6640_vm0 }
 0x45b   :  { %v3278_v56 = vpop.eup %3277  ;;  %v2484_v26 = vsel %vm6720_vm4, %v2412_v41, 0.0  ;;  %v2191_v8 = vsub.f32 %v2159_v57, %v1967_v16  ;;  %vm1780_vm13 = vcmp.eq.f32.partialorder %v6722_v42, -inf  ;;  %3289 = vlog2.f32 %v5852_v50  ;;  %v6733_v57 = vld [vmem:[#allocation12_spill] sm:$0xff] }
 0x45c   :  { %2485 = vadd.xlane.f32.xlu1 %v2484_v26  ;;  %v2371_v21 = vmul.f32 0.6931472, %v3278_v56  ;;  %v2320_v3 = vadd.f32 1e-07, %v2288_v35  ;;  %v3280_v5 = vpop.eup %3279  ;;  %v2289_v53 = vsub.f32 1.0, %v2257_v54  ;;  %vm1781_vm3 = vcmp.eq.f32.partialorder %v6723_v40, -inf }
 0x45d   :  { %v1812_v6 = vsel %vm1780_vm13, -3.4028235e+38, %v6722_v42  ;;  %v3282_v59 = vpop.eup %3281  ;;  %v2161_v22 = vmul.f32 -0.5, %v5934_v11  ;;  %v5990_v27 = vmul.f32 -0.5, %v2130_v44  ;;  %v1968_v37 = vsel %vm4640_vm9, %v1929_v13, %v6724_v49  ;;  %v6735_v56 = vld [vmem:[#allocation68_spill] sm:$0xff]  ;;  %v6738_v42 = vld [vmem:[#allocation87_spill] sm:$0xff]  ;;  %vm6747_vm13 = vmmov %vm6640_vm0 }
 0x45e   :  { %v2413_v39 = vsub.f32 %v2709_v2, %v2371_v21  ;;  %3291 = vlog2.f32 %v2320_v3  ;;  %v2321_v51 = vadd.f32 1e-07, %v2289_v53  ;;  %v2258_v61 = vmul.f32 %v3282_v59, %v3282_v59  ;;  %2546 = vst.msk [vmem:[%s6245_s8 + $0xd0] sm:$0xff] %vm6725_vm5, %v3282_v59  ;;  %v6037_v2 = vld [vmem:[%s6244_s7 + $0xf0] sm:$0xff]  ;;  %v6053_v59 = vld [vmem:[%s6244_s7 + $0xf8] sm:$0xff]  ;;  %vm6750_vm5 = vmmov %vm6640_vm0 }
 0x45f   :  { %v1844_v15 = vadd.f32 1e-06, %v1812_v6  ;;  %v3284_v50 = vpop.eup %3283  ;;  %v2710_v0 = vadd.f32 -0.9189385, %v2190_v29  ;;  %v1969_v11 = vsel %vm4640_vm9, %v1931_v47, %v6727_v36  ;;  %v1813_v30 = vsel %vm1781_vm3, -3.4028235e+38, %v6723_v40  ;;  %vm6748_vm3 = vmmov %vm6640_vm0 }
 0x460   :  { %v2487_v31 = vsel %vm6726_vm6, %v2413_v39, 0.0  ;;  %v2373_v55 = vmul.f32 0.6931472, %v3284_v50  ;;  %v2711_v38 = vadd.f32 -0.9189385, %v2191_v8  ;;  %3293 = vlog2.f32 %v2321_v51  ;;  %v6734_v29 = vld [vmem:[#allocation20_spill] sm:$0xff]  ;;  %vm6754_vm6 = vmmov %vm6640_vm0 }
 0x461   :  { %2488 = vadd.xlane.f32.xlu0 %v2487_v31  ;;  %v2290_v32 = vsub.f32 1.0, %v2258_v61  ;;  %v2192_v17 = vsub.f32 %v2160_v58, %v1968_v37  ;;  %v2131_v10 = vmul.f32 %v5954_v24, %v5954_v24  ;;  %v1876_v46 = vsel %vm4640_vm9, %v1844_v15, %v6728_v14  ;;  %v6729_v24 = vld [vmem:[#allocation113_spill] sm:$0xff]  ;;  %v6736_v47 = vld [vmem:[#allocation14_spill] sm:$0xff]  ;;  %v6739_v61 = vld [vmem:[#allocation16_spill] sm:$0xff] }
 0x462   :  { %v1845_v60 = vadd.f32 1e-06, %v1813_v30  ;;  %v3286_v62 = vpop.eup %3285  ;;  %v2414_v1 = vsub.f32 %v2710_v0, %v2373_v55  ;;  %v2193_v18 = vsub.f32 %v2161_v22, %v1969_v11  ;;  %v2036_v9 = vmul.f32 %v6006_v43, %v1876_v46  ;;  %v6740_v50 = vld [vmem:[#allocation17_spill] sm:$0xff] }
 0x463   :  { %v2322_v19 = vadd.f32 1e-07, %v2290_v32  ;;  %v1933_v12 = vmul.f32 0.6931472, %v3280_v5  ;;  %v2259_v4 = vmul.f32 %v3286_v62, %v3286_v62  ;;  %vm1782_vm1 = vcmp.eq.f32.partialorder %v6730_v25, -inf  ;;  %2547 = vst.msk [vmem:[%s6245_s8 + $0xd8] sm:$0xff] %vm6731_vm2, %v3286_v62  ;;  %vm6757_vm2 = vmmov %vm6640_vm0 }
 0x464   :  { %v3288_v23 = vpop.eup %3287  ;;  %v1877_v28 = vsel %vm4640_vm9, %v1845_v60, %v6729_v24  ;;  %v2490_v33 = vsel %vm6732_vm11, %v2414_v1, 0.0  ;;  %v2068_v20 = vadd.f32 %v2036_v9, %v6733_v57  ;;  %v2712_v48 = vadd.f32 -0.9189385, %v2192_v17  ;;  %v6742_v55 = vld [vmem:[#allocation65_spill] sm:$0xff] }
 0x465   :  { %v2375_v7 = vmul.f32 0.6931472, %v3288_v23  ;;  %3295 = vlog2.f32 %v2322_v19  ;;  %2491 = vadd.xlane.f32.xlu1 %v2490_v33  ;;  %v2291_v44 = vsub.f32 1.0, %v2259_v4  ;;  %v2037_v41 = vmul.f32 %v6020_v34, %v1877_v28  ;;  %v3290_v16 = vpop.eup %3289 }
 0x466   :  { %v1814_v45 = vsel %vm1782_vm1, -3.4028235e+38, %v6730_v25  ;;  %3297 = vtanh.f32 %v2068_v20  ;;  %vm1783_vm7 = vcmp.eq.f32.partialorder %v6734_v29, -inf  ;;  %v1970_v26 = vsel %vm4640_vm9, %v1933_v12, %v6735_v56  ;;  %vm6755_vm1 = vmmov %vm6640_vm0 }
 0x467   :  { %v2415_v58 = vsub.f32 %v2711_v38, %v2375_v7  ;;  %v1846_v63 = vadd.f32 1e-06, %v1814_v45  ;;  %v2323_v13 = vadd.f32 1e-07, %v2291_v44  ;;  %v2069_v54 = vadd.f32 %v2037_v41, %v6736_v47 }
 0x468   :  { %v3292_v35 = vpop.eup %3291  ;;  %v1815_v21 = vsel %vm1783_vm7, -3.4028235e+38, %v6734_v29  ;;  %3299 = vlog2.f32 %v1844_v15  ;;  %v1935_v53 = vmul.f32 0.6931472, %v3290_v16  ;;  %v2713_v49 = vadd.f32 -0.9189385, %v2193_v18 }
 0x469   :  { %v2493_v8 = vsel %vm6737_vm14, %v2415_v58, 0.0  ;;  %v2377_v3 = vmul.f32 0.6931472, %v3292_v35  ;;  %v1878_v5 = vsel %vm4640_vm9, %v1846_v63, %v6738_v42  ;;  %3301 = vlog2.f32 %v2323_v13  ;;  %v6749_v13 = vld [vmem:[#allocation71_spill] sm:$0xff] }
 0x46a   :  { %2494 = vadd.xlane.f32.xlu0 %v2493_v8  ;;  %v2038_v6 = vmul.f32 %v6037_v2, %v1878_v5  ;;  %v1847_v40 = vadd.f32 1e-06, %v1815_v21  ;;  %v3294_v39 = vpop.eup %3293  ;;  %3303 = vtanh.f32 %v2069_v54  ;;  %v2194_v51 = vsub.f32 %v5990_v27, %v1970_v26  ;;  %v6743_v27 = vld [vmem:[#allocation15_spill] sm:$0xff] }
 0x46b   :  { %v2416_v22 = vsub.f32 %v2712_v48, %v2377_v3  ;;  %v2379_v37 = vmul.f32 0.6931472, %v3294_v39  ;;  %v2163_v36 = vmul.f32 -0.5, %v2131_v10  ;;  %v1971_v38 = vsel %vm4640_vm9, %v1935_v53, %v6742_v55  ;;  %v6751_v39 = vld [vmem:[#allocation70_spill] sm:$0xff] }
 0x46c   :  { %v2070_v15 = vadd.f32 %v2038_v6, %v6739_v61  ;;  %v1879_v31 = vsel %vm4640_vm9, %v1847_v40, %v6740_v50  ;;  %v2714_v46 = vadd.f32 -0.9189385, %v2194_v51  ;;  %vm2552_vm4 = vcmask 72768  }
 0x46d   :  { %v2496_v0 = vsel %vm6741_vm12, %v2416_v22, 0.0  ;;  %v2039_v11 = vmul.f32 %v6053_v59, %v1879_v31  ;;  %v2417_v30 = vsub.f32 %v2713_v49, %v2379_v37  ;;  %v2195_v10 = vsub.f32 %v2163_v36, %v1971_v38 }
 0x46e   :  { %2497 = vadd.xlane.f32.xlu1 %v2496_v0  ;;  %3305 = vtanh.f32 %v2070_v15  ;;  %v2132_v20 = vmul.f32 %v6006_v43, %v6006_v43  ;;  %v2133_v35 = vmul.f32 %v6020_v34, %v6020_v34  ;;  %v2134_v3 = vmul.f32 %v6037_v2, %v6037_v2  ;;  %v6752_v0 = vld [vmem:[#allocation74_spill] sm:$0xff] }
 0x46f   :  { %v3296_v32 = vpop.eup %3295  ;;  %3307 = vlog2.f32 %v1845_v60  ;;  %v2071_v17 = vadd.f32 %v2039_v11, %v6743_v27  ;;  %v2499_v14 = vsel %vm6744_vm15, %v2417_v30, 0.0  ;;  %v2715_v24 = vadd.f32 -0.9189385, %v2195_v10 }
 0x470   :  { %v2381_v62 = vmul.f32 0.6931472, %v3296_v32  ;;  %v3298_v1 = vpop.eup %3297  ;;  %2500 = vadd.xlane.f32.xlu0 %v2499_v14  ;;  %v2164_v29 = vmul.f32 -0.5, %v2132_v20  ;;  %v2165_v53 = vmul.f32 -0.5, %v2133_v35  ;;  %v2135_v2 = vmul.f32 %v6053_v59, %v6053_v59  ;;  %v6753_v32 = vld [vmem:[#allocation73_spill] sm:$0xff] }
 0x471   :  { %3309 = vtanh.f32 %v2071_v17  ;;  %v2260_v19 = vmul.f32 %v3298_v1, %v3298_v1  ;;  %2548 = vst.msk [vmem:[%s6245_s8 + $0xe0] sm:$0xff] %vm6745_vm10, %v3298_v1  ;;  %v2166_v51 = vmul.f32 -0.5, %v2134_v3 }
 0x472   :  { %v2418_v18 = vsub.f32 %v2714_v46, %v2381_v62  ;;  %3311 = vlog2.f32 %v1846_v63  ;;  %v3300_v9 = vpop.eup %3299  ;;  %v2167_v30 = vmul.f32 -0.5, %v2135_v2 }
 0x473   :  { %v3302_v60 = vpop.eup %3301  ;;  %v2292_v12 = vsub.f32 1.0, %v2260_v19  ;;  %3313 = vlog2.f32 %v1847_v40  ;;  %v2429_v7 = vpop.xlane.xlu1 %2428  ;;  %v1937_v44 = vmul.f32 0.6931472, %v3300_v9 }
 0x474   :  { %v2502_v23 = vsel %vm6640_vm0, %v2418_v18, 0.0  ;;  %v3304_v4 = vpop.eup %3303  ;;  %v2383_v28 = vmul.f32 0.6931472, %v3302_v60  ;;  %2554 = vst.msk [vmem:[%s6245_s8 + $0x8] sm:$0xff] %vm2552_vm4, %v2429_v7 }
 0x475   :  { %2503 = vadd.xlane.f32.xlu1 %v2502_v23  ;;  %v2324_v25 = vadd.f32 1e-07, %v2292_v12  ;;  %v2261_v33 = vmul.f32 %v3304_v4, %v3304_v4  ;;  %2549 = vst.msk [vmem:[%s6245_s8 + $0xe8] sm:$0xff] %vm6746_vm8, %v3304_v4  ;;  %v1972_v47 = vsel %vm4640_vm9, %v1937_v44, %v6749_v13 }
 0x476   :  { %v2419_v57 = vsub.f32 %v2715_v24, %v2383_v28  ;;  %v2196_v5 = vsub.f32 %v2164_v29, %v1972_v47 }
 0x477   :  { %3315 = vlog2.f32 %v2324_v25  ;;  %v2293_v41 = vsub.f32 1.0, %v2261_v33 }
 0x478   :  { %v3306_v48 = vpop.eup %3305  ;;  %v2505_v16 = vsel %vm6747_vm13, %v2419_v57, 0.0  ;;  %v2716_v15 = vadd.f32 -0.9189385, %v2196_v5 }
 0x479   :  { %v3308_v45 = vpop.eup %3307  ;;  %v2262_v58 = vmul.f32 %v3306_v48, %v3306_v48  ;;  %2550 = vst.msk [vmem:[%s6245_s8 + $0xf0] sm:$0xff] %vm6748_vm3, %v3306_v48  ;;  %2506 = vadd.xlane.f32.xlu0 %v2505_v16  ;;  %v2325_v43 = vadd.f32 1e-07, %v2293_v41 }
 0x47a   :  { %v1939_v54 = vmul.f32 0.6931472, %v3308_v45 }
 0x47b   :  { %v3310_v63 = vpop.eup %3309  ;;  %v2294_v56 = vsub.f32 1.0, %v2262_v58  ;;  %3317 = vlog2.f32 %v2325_v43 }
 0x47c   :  { %v3312_v26 = vpop.eup %3311  ;;  %v2263_v21 = vmul.f32 %v3310_v63, %v3310_v63  ;;  %2551 = vst.msk [vmem:[%s6245_s8 + $0xf8] sm:$0xff] %vm6750_vm5, %v3310_v63  ;;  %v2426_v40 = vpop.xlane.xlu0 %2425  ;;  %v1973_v22 = vsel %vm4640_vm9, %v1939_v54, %v6751_v39 }
 0x47d   :  { %v2326_v8 = vadd.f32 1e-07, %v2294_v56  ;;  %v3314_v34 = vpop.eup %3313  ;;  %v1941_v6 = vmul.f32 0.6931472, %v3312_v26  ;;  %2553 = vst.msk [vmem:[%s6245_s8] sm:$0xff] %vm2552_vm4, %v2426_v40  ;;  %v2197_v31 = vsub.f32 %v2165_v53, %v1973_v22 }
 0x47e   :  { %v2295_v42 = vsub.f32 1.0, %v2263_v21  ;;  %v1943_v61 = vmul.f32 0.6931472, %v3314_v34 }
 0x47f   :  { %3319 = vlog2.f32 %v2326_v8  ;;  %v1974_v36 = vsel %vm4640_vm9, %v1941_v6, %v6752_v0  ;;  %v2717_v17 = vadd.f32 -0.9189385, %v2197_v31 }
 0x480   :  { %v2327_v49 = vadd.f32 1e-07, %v2295_v42  ;;  %v2198_v38 = vsub.f32 %v2166_v51, %v1974_v36  ;;  %v1975_v27 = vsel %vm4640_vm9, %v1943_v61, %v6753_v32  ;;  %vm6756_vm9 = vmmov %vm6640_vm0 }
 0x481   :  { %v3316_v37 = vpop.eup %3315  ;;  %v2199_v1 = vsub.f32 %v2167_v30, %v1975_v27 }
 0x482   :  { %3321 = vlog2.f32 %v2327_v49  ;;  %v2385_v50 = vmul.f32 0.6931472, %v3316_v37  ;;  %v2718_v18 = vadd.f32 -0.9189385, %v2198_v38 }
 0x483   :  { %v2719_v23 = vadd.f32 -0.9189385, %v2199_v1 }
 0x484   :  { %v2420_v11 = vsub.f32 %v2716_v15, %v2385_v50 }
 0x485   :  { %v3318_v55 = vpop.eup %3317 }
 0x486   :  { %v2508_v59 = vsel %vm6754_vm6, %v2420_v11, 0.0  ;;  %v2387_v14 = vmul.f32 0.6931472, %v3318_v55  ;;  %v2432_v10 = vpop.xlane.xlu1 %2431 }
 0x487   :  { %2509 = vadd.xlane.f32.xlu1 %v2508_v59  ;;  %2555 = vst.msk [vmem:[%s6245_s8 + $0x10] sm:$0xff] %vm2552_vm4, %v2432_v10 }
 0x488   :  { %v2421_v62 = vsub.f32 %v2717_v17, %v2387_v14 }
 0x489   :  { %v3320_v46 = vpop.eup %3319 }
 0x48a   :  { %v2389_v19 = vmul.f32 0.6931472, %v3320_v46  ;;  %v2511_v9 = vsel %vm6755_vm1, %v2421_v62, 0.0 }
 0x48b   :  { %2512 = vadd.xlane.f32.xlu0 %v2511_v9 }
 0x48c   :  { %v3322_v52 = vpop.eup %3321  ;;  %v2422_v60 = vsub.f32 %v2718_v18, %v2389_v19 }
 0x48d   :  { %v2391_v12 = vmul.f32 0.6931472, %v3322_v52 }
 0x48e   :  { %v2514_v4 = vsel %vm6756_vm9, %v2422_v60, 0.0 }
 0x48f   :  { %2515 = vadd.xlane.f32.xlu1 %v2514_v4  ;;  %v2423_v24 = vsub.f32 %v2719_v23, %v2391_v12 }
 0x491   :  { %v2517_v28 = vsel %vm6757_vm2, %v2423_v24, 0.0 }
 0x492   :  { %2518 = vadd.xlane.f32.xlu0 %v2517_v28 }
 0x494   :  { %v2435_v25 = vpop.xlane.xlu0 %2434 }
 0x495   :  { %2556 = vst.msk [vmem:[%s6245_s8 + $0x18] sm:$0xff] %vm2552_vm4, %v2435_v25 }
 0x4a1   :  { %v2438_v33 = vpop.xlane.xlu1 %2437 }
 0x4a2   :  { %2557 = vst.msk [vmem:[%s6245_s8 + $0x20] sm:$0xff] %vm2552_vm4, %v2438_v33 }
 0x4ab   :  { %v2441_v7 = vpop.xlane.xlu0 %2440 }
 0x4ac   :  { %2558 = vst.msk [vmem:[%s6245_s8 + $0x28] sm:$0xff] %vm2552_vm4, %v2441_v7 }
 0x4b5   :  { %v2444_v57 = vpop.xlane.xlu1 %2443 }
 0x4b6   :  { %2559 = vst.msk [vmem:[%s6245_s8 + $0x30] sm:$0xff] %vm2552_vm4, %v2444_v57 }
 0x4bd   :  { %v2447_v20 = vpop.xlane.xlu0 %2446 }
 0x4be   :  { %2560 = vst.msk [vmem:[%s6245_s8 + $0x38] sm:$0xff] %vm2552_vm4, %v2447_v20  ;;  %v2450_v48 = vpop.xlane.xlu1 %2449 }
 0x4bf   :  { %2561 = vst.msk [vmem:[%s6245_s8 + $0x40] sm:$0xff] %vm2552_vm4, %v2450_v48 }
 0x4c1   :  { %v2453_v44 = vpop.xlane.xlu0 %2452 }
 0x4c2   :  { %2562 = vst.msk [vmem:[%s6245_s8 + $0x48] sm:$0xff] %vm2552_vm4, %v2453_v44  ;;  %v2456_v41 = vpop.xlane.xlu1 %2455 }
 0x4c3   :  { %2563 = vst.msk [vmem:[%s6245_s8 + $0x50] sm:$0xff] %vm2552_vm4, %v2456_v41 }
 0x4c5   :  { %v2459_v45 = vpop.xlane.xlu0 %2458 }
 0x4c6   :  { %2564 = vst.msk [vmem:[%s6245_s8 + $0x58] sm:$0xff] %vm2552_vm4, %v2459_v45  ;;  %v2462_v16 = vpop.xlane.xlu1 %2461 }
 0x4c7   :  { %2565 = vst.msk [vmem:[%s6245_s8 + $0x60] sm:$0xff] %vm2552_vm4, %v2462_v16 }
 0x4c9   :  { %v2465_v58 = vpop.xlane.xlu0 %2464 }
 0x4ca   :  { %2566 = vst.msk [vmem:[%s6245_s8 + $0x68] sm:$0xff] %vm2552_vm4, %v2465_v58 }
 0x4cb   :  { %v2468_v43 = vpop.xlane.xlu1 %2467 }
 0x4cc   :  { %2567 = vst.msk [vmem:[%s6245_s8 + $0x70] sm:$0xff] %vm2552_vm4, %v2468_v43 }
 0x4d7   :  { %v2471_v63 = vpop.xlane.xlu0 %2470 }
 0x4d8   :  { %2568 = vst.msk [vmem:[%s6245_s8 + $0x78] sm:$0xff] %vm2552_vm4, %v2471_v63 }
 0x4da   :  { %v2474_v29 = vpop.xlane.xlu1 %2473 }
 0x4db   :  { %2569 = vst.msk [vmem:[%s6245_s8 + $0x80] sm:$0xff] %vm2552_vm4, %v2474_v29 }
 0x4de   :  { %v2477_v35 = vpop.xlane.xlu0 %2476 }
 0x4df   :  { %2570 = vst.msk [vmem:[%s6245_s8 + $0x88] sm:$0xff] %vm2552_vm4, %v2477_v35 }
 0x4e3   :  { %v2480_v56 = vpop.xlane.xlu1 %2479 }
 0x4e4   :  { %2571 = vst.msk [vmem:[%s6245_s8 + $0x90] sm:$0xff] %vm2552_vm4, %v2480_v56 }
 0x4e5   :  { %v2483_v26 = vpop.xlane.xlu0 %2482 }
 0x4e6   :  { %2572 = vst.msk [vmem:[%s6245_s8 + $0x98] sm:$0xff] %vm2552_vm4, %v2483_v26 }
 0x4e9   :  { %v2486_v13 = vpop.xlane.xlu1 %2485 }
 0x4ea   :  { %2573 = vst.msk [vmem:[%s6245_s8 + $0xa0] sm:$0xff] %vm2552_vm4, %v2486_v13 }
 0x4ee   :  { %v2489_v47 = vpop.xlane.xlu0 %2488 }
 0x4ef   :  { %2574 = vst.msk [vmem:[%s6245_s8 + $0xa8] sm:$0xff] %vm2552_vm4, %v2489_v47 }
 0x4f2   :  { %v2492_v54 = vpop.xlane.xlu1 %2491 }
 0x4f3   :  { %2575 = vst.msk [vmem:[%s6245_s8 + $0xb0] sm:$0xff] %vm2552_vm4, %v2492_v54 }
 0x4f7   :  { %v2495_v21 = vpop.xlane.xlu0 %2494 }
 0x4f8   :  { %2576 = vst.msk [vmem:[%s6245_s8 + $0xb8] sm:$0xff] %vm2552_vm4, %v2495_v21 }
 0x4fb   :  { %v2498_v8 = vpop.xlane.xlu1 %2497 }
 0x4fc   :  { %2577 = vst.msk [vmem:[%s6245_s8 + $0xc0] sm:$0xff] %vm2552_vm4, %v2498_v8 }
 0x4fd   :  { %v2501_v3 = vpop.xlane.xlu0 %2500 }
 0x4fe   :  { %2578 = vst.msk [vmem:[%s6245_s8 + $0xc8] sm:$0xff] %vm2552_vm4, %v2501_v3 }
 0x502   :  { %v2504_v42 = vpop.xlane.xlu1 %2503 }
 0x503   :  { %2579 = vst.msk [vmem:[%s6245_s8 + $0xd0] sm:$0xff] %vm2552_vm4, %v2504_v42 }
 0x506   :  { %v2507_v34 = vpop.xlane.xlu0 %2506 }
 0x507   :  { %2580 = vst.msk [vmem:[%s6245_s8 + $0xd8] sm:$0xff] %vm2552_vm4, %v2507_v34 }
 0x514   :  { %v2510_v5 = vpop.xlane.xlu1 %2509 }
 0x515   :  { %2581 = vst.msk [vmem:[%s6245_s8 + $0xe0] sm:$0xff] %vm2552_vm4, %v2510_v5 }
 0x518   :  { %v2513_v53 = vpop.xlane.xlu0 %2512 }
 0x519   :  { %2582 = vst.msk [vmem:[%s6245_s8 + $0xe8] sm:$0xff] %vm2552_vm4, %v2513_v53 }
 0x51c   :  { %v2516_v6 = vpop.xlane.xlu1 %2515 }
 0x51d   :  { %2583 = vst.msk [vmem:[%s6245_s8 + $0xf0] sm:$0xff] %vm2552_vm4, %v2516_v6 }
 0x51f   :  { %v2519_v40 = vpop.xlane.xlu0 %2518 }
 0x520   :  { %2584 = vst.msk [vmem:[%s6245_s8 + $0xf8] sm:$0xff] %vm2552_vm4, %v2519_v40 }

</bundles_post_ra>
